<compile_context>
chip_gen: v6e
topology: v6e:2x2x1
jax: 0.10.0
libtpu: 0.0.40
codegen_flags: <defaults>
</compile_context>

<pallas_src>
import jax
import jax.numpy as jnp
from jax.experimental import pallas as pl
from jax.experimental.pallas import tpu as pltpu


def _se_basic_block_kernel(x_ref, w1_ref, w2_ref, bn1_ref, bn2_ref,
                           fc1w_ref, fc1b_ref, fc2w_ref, fc2b_ref,
                           o_ref, xpad_ref):
    """Fully fused SEBasicBlock forward for one batch element.

    x_ref:    (1, H, W, C)   f32 input features (dense NHWC grid)
    w1_ref:   (3, 3*C, C)    bf16 conv1 weights, rows ordered [dy][dx*C + cin]
    w2_ref:   (3, 3*C, C)    bf16 conv2 weights
    bn*_ref:  (2, C)         f32 folded BN: row 0 = scale, row 1 = bias
    fc1w_ref: (C, Cse)  fc1b_ref: (1, Cse)   SE squeeze FC
    fc2w_ref: (Cse, C)  fc2b_ref: (1, C)     SE excite FC
    o_ref:    (1, H, W, C)   f32 output
    xpad_ref: (H+2, W+2, C)  f32 VMEM scratch (zero halo), reused by both convs
    """
    H, W, C = x_ref.shape[1], x_ref.shape[2], x_ref.shape[3]
    HW = H * W

    def write_padded(img):
        # Overwrite the interior of the zero-padded scratch; the 1-pixel halo stays 0.
        xpad_ref[1:H + 1, 1:W + 1, :] = img

    def conv3x3(w_ref):
        # im2col at load time: for each kernel row dy gather the three dx-shifted
        # windows straight from the padded VMEM scratch, fuse them along channels
        # into one (HW, 3*C) operand, and do a single fat bf16 MXU dot per row
        # (3 dots with K=3*C instead of 9 dots with K=C). f32 accumulation.
        acc = jnp.zeros((HW, w_ref.shape[-1]), jnp.float32)
        for dy in range(3):
            rows = jnp.concatenate(
                [xpad_ref[dy:dy + H, dx:dx + W, :].reshape(HW, C) for dx in range(3)],
                axis=-1,
            ).astype(jnp.bfloat16)                                   # (HW, 3*C)
            acc += jnp.dot(rows, w_ref[dy], preferred_element_type=jnp.float32)
        return acc                                                   # (HW, C) f32

    x = x_ref[0]                                                     # (H, W, C) f32

    # Zero the halo scratch once; both convs only rewrite its interior.
    xpad_ref[...] = jnp.zeros_like(xpad_ref)

    # ---- conv1 -> BN1 -> ReLU ----------------------------------------------------
    write_padded(x)
    h = conv3x3(w1_ref)
    h = jnp.maximum(h * bn1_ref[0:1, :] + bn1_ref[1:2, :], 0.0)      # (HW, C) f32

    # ---- conv2 -> BN2 (no ReLU before SE) ----------------------------------------
    write_padded(h.reshape(H, W, C))
    h = conv3x3(w2_ref)
    h = h * bn2_ref[0:1, :] + bn2_ref[1:2, :]                        # (HW, C) f32

    # ---- SE: global average pool -> FC -> ReLU -> FC -> sigmoid -> channel scale --
    pooled = jnp.mean(h, axis=0, keepdims=True)                      # (1, C)
    z = jnp.maximum(
        jnp.dot(pooled, fc1w_ref[...], preferred_element_type=jnp.float32)
        + fc1b_ref[...], 0.0)                                        # (1, Cse)
    gate = jax.nn.sigmoid(
        jnp.dot(z, fc2w_ref[...], preferred_element_type=jnp.float32)
        + fc2b_ref[...])                                             # (1, C)
    h = h * gate                                                     # broadcast over pixels

    # ---- identity residual add + final ReLU --------------------------------------
    out = jnp.maximum(h + x.reshape(HW, C), 0.0)
    o_ref[0] = out.reshape(H, W, C).astype(o_ref.dtype)


def se_basic_block(x, params):
    """x: (N, H, W, C) f32, channels-last dense grid. Returns (N, H, W, C) f32."""
    N, H, W, C = x.shape
    w1, w2, bn1, bn2, fc1w, fc1b, fc2w, fc2b = params

    return pl.pallas_call(
        _se_basic_block_kernel,
        out_shape=jax.ShapeDtypeStruct((N, H, W, C), jnp.float32),
        grid=(N,),
        in_specs=[
            pl.BlockSpec((1, H, W, C), lambda n: (n, 0, 0, 0)),
            # Weights / BN / SE params: constant index maps -> DMA'd once, stay resident.
            pl.BlockSpec(w1.shape, lambda n: (0, 0, 0)),
            pl.BlockSpec(w2.shape, lambda n: (0, 0, 0)),
            pl.BlockSpec(bn1.shape, lambda n: (0, 0)),
            pl.BlockSpec(bn2.shape, lambda n: (0, 0)),
            pl.BlockSpec(fc1w.shape, lambda n: (0, 0)),
            pl.BlockSpec(fc1b.shape, lambda n: (0, 0)),
            pl.BlockSpec(fc2w.shape, lambda n: (0, 0)),
            pl.BlockSpec(fc2b.shape, lambda n: (0, 0)),
        ],
        out_specs=pl.BlockSpec((1, H, W, C), lambda n: (n, 0, 0, 0)),
        scratch_shapes=[pltpu.VMEM((H + 2, W + 2, C), jnp.float32)],
        compiler_params=pltpu.CompilerParams(dimension_semantics=("parallel",)),
    )(x, w1, w2, bn1, bn2, fc1w, fc1b, fc2w, fc2b)


def init_se_basic_block_params(key, channels, reduction=16):
    """Deterministic synthetic parameters (conv weights, folded BN, SE FCs)."""
    c = channels
    cse = max(channels // reduction, 1)
    eps = 1e-5  # nn.BatchNorm default
    keys = jax.random.split(key, 12)

    def conv_w(k):
        # (3, 3, Cin, Cout) -> (3, 3*Cin, Cout), row index dy, inner index dx*Cin + cin.
        w = jax.random.normal(k, (3, 3, c, c), jnp.float32) / jnp.sqrt(9.0 * c)
        return w.reshape(3, 3 * c, c).astype(jnp.bfloat16)

    def folded_bn(kg, kb, km, kv):
        gamma = 1.0 + 0.05 * jax.random.normal(kg, (c,), jnp.float32)
        beta = 0.05 * jax.random.normal(kb, (c,), jnp.float32)
        mean = 0.05 * jax.random.normal(km, (c,), jnp.float32)
        var = 1.0 + 0.1 * jax.nn.softplus(jax.random.normal(kv, (c,), jnp.float32))
        scale = gamma / jnp.sqrt(var + eps)
        bias = beta - mean * scale
        return jnp.stack([scale, bias], axis=0)  # (2, C) f32

    w1 = conv_w(keys[0])
    w2 = conv_w(keys[1])
    bn1 = folded_bn(keys[2], keys[3], keys[4], keys[5])
    bn2 = folded_bn(keys[6], keys[7], keys[8], keys[9])
    fc1w = jax.random.normal(keys[10], (c, cse), jnp.float32) / jnp.sqrt(1.0 * c)
    fc1b = jnp.zeros((1, cse), jnp.float32)
    fc2w = jax.random.normal(keys[11], (cse, c), jnp.float32) / jnp.sqrt(1.0 * cse)
    fc2b = jnp.zeros((1, c), jnp.float32)
    return (w1, w2, bn1, bn2, fc1w, fc1b, fc2w, fc2b)


if __name__ == "__main__":
    # inplanes == planes (downsample=None => identity residual), reduction = SE default.
    N, H, W = 2, 16, 16
    channels = 32
    reduction = 16

    key = jax.random.PRNGKey(0)
    kx, kp = jax.random.split(key)
    # Minkowski features are channels-last; on a fully dense 2-D grid that is NHWC.
    x = jax.random.normal(kx, (N, H, W, channels), jnp.float32)
    params = init_se_basic_block_params(kp, channels, reduction)

    out = jax.jit(se_basic_block)(x, params)
    jax.block_until_ready(out)

    assert out.shape == (N, H, W, channels)
    assert bool(jnp.isfinite(out).all())
    assert bool((out >= 0.0).all())  # final ReLU
    print("KERNEL_OK")
</pallas_src>

<mosaic_0001>
module attributes {stable_mosaic.version = 11 : i64} {
  func.func @_se_basic_block_kernel(%arg0: i32, %arg1: memref<1x16x16x32xf32, #tpu.memory_space<vmem>>, %arg2: memref<3x96x32xbf16, #tpu.memory_space<vmem>>, %arg3: memref<3x96x32xbf16, #tpu.memory_space<vmem>>, %arg4: memref<2x32xf32, #tpu.memory_space<vmem>>, %arg5: memref<2x32xf32, #tpu.memory_space<vmem>>, %arg6: memref<32x2xf32, #tpu.memory_space<vmem>>, %arg7: memref<1x2xf32, #tpu.memory_space<vmem>>, %arg8: memref<2x32xf32, #tpu.memory_space<vmem>>, %arg9: memref<1x32xf32, #tpu.memory_space<vmem>>, %arg10: memref<1x16x16x32xf32, #tpu.memory_space<vmem>>, %arg11: memref<18x18x32xf32, #tpu.memory_space<vmem>>) attributes {dimension_semantics = [#tpu.dimension_semantics<parallel>], iteration_bounds = array<i64: 2>, scalar_prefetch = 0 : i64, scratch_operands = 1 : i64, tpu.core_type = #tpu.core_type<tc>, window_params = [{transform_indices = @transform_0, window_bounds = array<i64: 1, 16, 16, 32>}, {pipeline_mode = #tpu.pipeline_mode<synchronous>, transform_indices = @transform_1, window_bounds = array<i64: 3, 96, 32>}, {pipeline_mode = #tpu.pipeline_mode<synchronous>, transform_indices = @transform_2, window_bounds = array<i64: 3, 96, 32>}, {pipeline_mode = #tpu.pipeline_mode<synchronous>, transform_indices = @transform_3, window_bounds = array<i64: 2, 32>}, {pipeline_mode = #tpu.pipeline_mode<synchronous>, transform_indices = @transform_4, window_bounds = array<i64: 2, 32>}, {pipeline_mode = #tpu.pipeline_mode<synchronous>, transform_indices = @transform_5, window_bounds = array<i64: 32, 2>}, {pipeline_mode = #tpu.pipeline_mode<synchronous>, transform_indices = @transform_6, window_bounds = array<i64: 1, 2>}, {pipeline_mode = #tpu.pipeline_mode<synchronous>, transform_indices = @transform_7, window_bounds = array<i64: 2, 32>}, {pipeline_mode = #tpu.pipeline_mode<synchronous>, transform_indices = @transform_8, window_bounds = array<i64: 1, 32>}, {transform_indices = @transform_9, window_bounds = array<i64: 1, 16, 16, 32>}]} {
    %c0 = arith.constant 0 : index
    %c0_0 = arith.constant 0 : index
    %c0_1 = arith.constant 0 : index
    %c0_2 = arith.constant 0 : index
    %0 = vector.load %arg1[%c0, %c0_0, %c0_1, %c0_2] : memref<1x16x16x32xf32, #tpu.memory_space<vmem>>, vector<1x16x16x32xf32>
    %1 = vector.shape_cast %0 : vector<1x16x16x32xf32> to vector<16x16x32xf32>
    %cst = arith.constant 0.000000e+00 : f32
    %2 = vector.broadcast %cst : f32 to vector<18x18x32xf32>
    %c0_3 = arith.constant 0 : index
    %c0_4 = arith.constant 0 : index
    %c0_5 = arith.constant 0 : index
    %3 = vector.load %arg11[%c0_3, %c0_4, %c0_5] : memref<18x18x32xf32, #tpu.memory_space<vmem>>, vector<18x18x32xf32>
    tpu.vector_store %arg11[%c0_3, %c0_4, %c0_5], %2 {strides = array<i32>} : memref<18x18x32xf32, #tpu.memory_space<vmem>>, vector<18x18x32xf32>,
    %c1 = arith.constant 1 : index
    %c1_6 = arith.constant 1 : index
    %c0_7 = arith.constant 0 : index
    %4 = vector.load %arg11[%c1, %c1_6, %c0_7] : memref<18x18x32xf32, #tpu.memory_space<vmem>>, vector<16x16x32xf32>
    tpu.vector_store %arg11[%c1, %c1_6, %c0_7], %1 {strides = array<i32>} : memref<18x18x32xf32, #tpu.memory_space<vmem>>, vector<16x16x32xf32>,
    %cst_8 = arith.constant 0.000000e+00 : f32
    %5 = vector.broadcast %cst_8 : f32 to vector<256x32xf32>
    %c0_9 = arith.constant 0 : index
    %c0_10 = arith.constant 0 : index
    %c0_11 = arith.constant 0 : index
    %6 = vector.load %arg11[%c0_9, %c0_10, %c0_11] : memref<18x18x32xf32, #tpu.memory_space<vmem>>, vector<16x16x32xf32>
    %7 = vector.shape_cast %6 : vector<16x16x32xf32> to vector<256x32xf32>
    %c0_12 = arith.constant 0 : index
    %c1_13 = arith.constant 1 : index
    %c0_14 = arith.constant 0 : index
    %8 = vector.load %arg11[%c0_12, %c1_13, %c0_14] : memref<18x18x32xf32, #tpu.memory_space<vmem>>, vector<16x16x32xf32>
    %9 = vector.shape_cast %8 : vector<16x16x32xf32> to vector<256x32xf32>
    %c0_15 = arith.constant 0 : index
    %c2 = arith.constant 2 : index
    %c0_16 = arith.constant 0 : index
    %10 = vector.load %arg11[%c0_15, %c2, %c0_16] : memref<18x18x32xf32, #tpu.memory_space<vmem>>, vector<16x16x32xf32>
    %11 = vector.shape_cast %10 : vector<16x16x32xf32> to vector<256x32xf32>
    %12 = tpu.concatenate %7, %9, %11 in 1 : vector<256x32xf32>, vector<256x32xf32>, vector<256x32xf32> -> vector<256x96xf32>
    %13 = arith.truncf %12 : vector<256x96xf32> to vector<256x96xbf16>
    %c0_17 = arith.constant 0 : index
    %c0_18 = arith.constant 0 : index
    %c0_19 = arith.constant 0 : index
    %14 = vector.load %arg2[%c0_17, %c0_18, %c0_19] : memref<3x96x32xbf16, #tpu.memory_space<vmem>>, vector<1x96x32xbf16>
    %15 = vector.shape_cast %14 : vector<1x96x32xbf16> to vector<96x32xbf16>
    %cst_20 = arith.constant dense<0.000000e+00> : vector<256x32xf32>
    %16 = tpu.matmul %13, %15, %cst_20 {dimension_numbers = #tpu.dot_dimension_numbers<[1], [0], [0], [1], [0, 0, 1, 1], [], []>} : vector<256x96xbf16>, vector<96x32xbf16>, vector<256x32xf32> -> vector<256x32xf32>
    %17 = arith.addf %5, %16 : vector<256x32xf32>
    %c1_21 = arith.constant 1 : index
    %c0_22 = arith.constant 0 : index
    %c0_23 = arith.constant 0 : index
    %18 = vector.load %arg11[%c1_21, %c0_22, %c0_23] : memref<18x18x32xf32, #tpu.memory_space<vmem>>, vector<16x16x32xf32>
    %19 = vector.shape_cast %18 : vector<16x16x32xf32> to vector<256x32xf32>
    %c1_24 = arith.constant 1 : index
    %c1_25 = arith.constant 1 : index
    %c0_26 = arith.constant 0 : index
    %20 = vector.load %arg11[%c1_24, %c1_25, %c0_26] : memref<18x18x32xf32, #tpu.memory_space<vmem>>, vector<16x16x32xf32>
    %21 = vector.shape_cast %20 : vector<16x16x32xf32> to vector<256x32xf32>
    %c1_27 = arith.constant 1 : index
    %c2_28 = arith.constant 2 : index
    %c0_29 = arith.constant 0 : index
    %22 = vector.load %arg11[%c1_27, %c2_28, %c0_29] : memref<18x18x32xf32, #tpu.memory_space<vmem>>, vector<16x16x32xf32>
    %23 = vector.shape_cast %22 : vector<16x16x32xf32> to vector<256x32xf32>
    %24 = tpu.concatenate %19, %21, %23 in 1 : vector<256x32xf32>, vector<256x32xf32>, vector<256x32xf32> -> vector<256x96xf32>
    %25 = arith.truncf %24 : vector<256x96xf32> to vector<256x96xbf16>
    %c1_30 = arith.constant 1 : index
    %c0_31 = arith.constant 0 : index
    %c0_32 = arith.constant 0 : index
    %26 = vector.load %arg2[%c1_30, %c0_31, %c0_32] : memref<3x96x32xbf16, #tpu.memory_space<vmem>>, vector<1x96x32xbf16>
    %27 = vector.shape_cast %26 : vector<1x96x32xbf16> to vector<96x32xbf16>
    %cst_33 = arith.constant dense<0.000000e+00> : vector<256x32xf32>
    %28 = tpu.matmul %25, %27, %cst_33 {dimension_numbers = #tpu.dot_dimension_numbers<[1], [0], [0], [1], [0, 0, 1, 1], [], []>} : vector<256x96xbf16>, vector<96x32xbf16>, vector<256x32xf32> -> vector<256x32xf32>
    %29 = arith.addf %17, %28 : vector<256x32xf32>
    %c2_34 = arith.constant 2 : index
    %c0_35 = arith.constant 0 : index
    %c0_36 = arith.constant 0 : index
    %30 = vector.load %arg11[%c2_34, %c0_35, %c0_36] : memref<18x18x32xf32, #tpu.memory_space<vmem>>, vector<16x16x32xf32>
    %31 = vector.shape_cast %30 : vector<16x16x32xf32> to vector<256x32xf32>
    %c2_37 = arith.constant 2 : index
    %c1_38 = arith.constant 1 : index
    %c0_39 = arith.constant 0 : index
    %32 = vector.load %arg11[%c2_37, %c1_38, %c0_39] : memref<18x18x32xf32, #tpu.memory_space<vmem>>, vector<16x16x32xf32>
    %33 = vector.shape_cast %32 : vector<16x16x32xf32> to vector<256x32xf32>
    %c2_40 = arith.constant 2 : index
    %c2_41 = arith.constant 2 : index
    %c0_42 = arith.constant 0 : index
    %34 = vector.load %arg11[%c2_40, %c2_41, %c0_42] : memref<18x18x32xf32, #tpu.memory_space<vmem>>, vector<16x16x32xf32>
    %35 = vector.shape_cast %34 : vector<16x16x32xf32> to vector<256x32xf32>
    %36 = tpu.concatenate %31, %33, %35 in 1 : vector<256x32xf32>, vector<256x32xf32>, vector<256x32xf32> -> vector<256x96xf32>
    %37 = arith.truncf %36 : vector<256x96xf32> to vector<256x96xbf16>
    %c2_43 = arith.constant 2 : index
    %c0_44 = arith.constant 0 : index
    %c0_45 = arith.constant 0 : index
    %38 = vector.load %arg2[%c2_43, %c0_44, %c0_45] : memref<3x96x32xbf16, #tpu.memory_space<vmem>>, vector<1x96x32xbf16>
    %39 = vector.shape_cast %38 : vector<1x96x32xbf16> to vector<96x32xbf16>
    %cst_46 = arith.constant dense<0.000000e+00> : vector<256x32xf32>
    %40 = tpu.matmul %37, %39, %cst_46 {dimension_numbers = #tpu.dot_dimension_numbers<[1], [0], [0], [1], [0, 0, 1, 1], [], []>} : vector<256x96xbf16>, vector<96x32xbf16>, vector<256x32xf32> -> vector<256x32xf32>
    %41 = arith.addf %29, %40 : vector<256x32xf32>
    %c0_47 = arith.constant 0 : index
    %c0_48 = arith.constant 0 : index
    %42 = vector.load %arg4[%c0_47, %c0_48] : memref<2x32xf32, #tpu.memory_space<vmem>>, vector<1x32xf32>
    %43 = vector.broadcast %42 : vector<1x32xf32> to vector<256x32xf32>
    %44 = arith.mulf %41, %43 : vector<256x32xf32>
    %c1_49 = arith.constant 1 : index
    %c0_50 = arith.constant 0 : index
    %45 = vector.load %arg4[%c1_49, %c0_50] : memref<2x32xf32, #tpu.memory_space<vmem>>, vector<1x32xf32>
    %46 = vector.broadcast %45 : vector<1x32xf32> to vector<256x32xf32>
    %47 = arith.addf %44, %46 : vector<256x32xf32>
    %cst_51 = arith.constant 0.000000e+00 : f32
    %48 = vector.broadcast %cst_51 : f32 to vector<256x32xf32>
    %49 = arith.maximumf %47, %48 : vector<256x32xf32>
    %50 = vector.shape_cast %49 : vector<256x32xf32> to vector<16x16x32xf32>
    %c1_52 = arith.constant 1 : index
    %c1_53 = arith.constant 1 : index
    %c0_54 = arith.constant 0 : index
    %51 = vector.load %arg11[%c1_52, %c1_53, %c0_54] : memref<18x18x32xf32, #tpu.memory_space<vmem>>, vector<16x16x32xf32>
    tpu.vector_store %arg11[%c1_52, %c1_53, %c0_54], %50 {strides = array<i32>} : memref<18x18x32xf32, #tpu.memory_space<vmem>>, vector<16x16x32xf32>,
    %cst_55 = arith.constant 0.000000e+00 : f32
    %52 = vector.broadcast %cst_55 : f32 to vector<256x32xf32>
    %c0_56 = arith.constant 0 : index
    %c0_57 = arith.constant 0 : index
    %c0_58 = arith.constant 0 : index
    %53 = vector.load %arg11[%c0_56, %c0_57, %c0_58] : memref<18x18x32xf32, #tpu.memory_space<vmem>>, vector<16x16x32xf32>
    %54 = vector.shape_cast %53 : vector<16x16x32xf32> to vector<256x32xf32>
    %c0_59 = arith.constant 0 : index
    %c1_60 = arith.constant 1 : index
    %c0_61 = arith.constant 0 : index
    %55 = vector.load %arg11[%c0_59, %c1_60, %c0_61] : memref<18x18x32xf32, #tpu.memory_space<vmem>>, vector<16x16x32xf32>
    %56 = vector.shape_cast %55 : vector<16x16x32xf32> to vector<256x32xf32>
    %c0_62 = arith.constant 0 : index
    %c2_63 = arith.constant 2 : index
    %c0_64 = arith.constant 0 : index
    %57 = vector.load %arg11[%c0_62, %c2_63, %c0_64] : memref<18x18x32xf32, #tpu.memory_space<vmem>>, vector<16x16x32xf32>
    %58 = vector.shape_cast %57 : vector<16x16x32xf32> to vector<256x32xf32>
    %59 = tpu.concatenate %54, %56, %58 in 1 : vector<256x32xf32>, vector<256x32xf32>, vector<256x32xf32> -> vector<256x96xf32>
    %60 = arith.truncf %59 : vector<256x96xf32> to vector<256x96xbf16>
    %c0_65 = arith.constant 0 : index
    %c0_66 = arith.constant 0 : index
    %c0_67 = arith.constant 0 : index
    %61 = vector.load %arg3[%c0_65, %c0_66, %c0_67] : memref<3x96x32xbf16, #tpu.memory_space<vmem>>, vector<1x96x32xbf16>
    %62 = vector.shape_cast %61 : vector<1x96x32xbf16> to vector<96x32xbf16>
    %cst_68 = arith.constant dense<0.000000e+00> : vector<256x32xf32>
    %63 = tpu.matmul %60, %62, %cst_68 {dimension_numbers = #tpu.dot_dimension_numbers<[1], [0], [0], [1], [0, 0, 1, 1], [], []>} : vector<256x96xbf16>, vector<96x32xbf16>, vector<256x32xf32> -> vector<256x32xf32>
    %64 = arith.addf %52, %63 : vector<256x32xf32>
    %c1_69 = arith.constant 1 : index
    %c0_70 = arith.constant 0 : index
    %c0_71 = arith.constant 0 : index
    %65 = vector.load %arg11[%c1_69, %c0_70, %c0_71] : memref<18x18x32xf32, #tpu.memory_space<vmem>>, vector<16x16x32xf32>
    %66 = vector.shape_cast %65 : vector<16x16x32xf32> to vector<256x32xf32>
    %c1_72 = arith.constant 1 : index
    %c1_73 = arith.constant 1 : index
    %c0_74 = arith.constant 0 : index
    %67 = vector.load %arg11[%c1_72, %c1_73, %c0_74] : memref<18x18x32xf32, #tpu.memory_space<vmem>>, vector<16x16x32xf32>
    %68 = vector.shape_cast %67 : vector<16x16x32xf32> to vector<256x32xf32>
    %c1_75 = arith.constant 1 : index
    %c2_76 = arith.constant 2 : index
    %c0_77 = arith.constant 0 : index
    %69 = vector.load %arg11[%c1_75, %c2_76, %c0_77] : memref<18x18x32xf32, #tpu.memory_space<vmem>>, vector<16x16x32xf32>
    %70 = vector.shape_cast %69 : vector<16x16x32xf32> to vector<256x32xf32>
    %71 = tpu.concatenate %66, %68, %70 in 1 : vector<256x32xf32>, vector<256x32xf32>, vector<256x32xf32> -> vector<256x96xf32>
    %72 = arith.truncf %71 : vector<256x96xf32> to vector<256x96xbf16>
    %c1_78 = arith.constant 1 : index
    %c0_79 = arith.constant 0 : index
    %c0_80 = arith.constant 0 : index
    %73 = vector.load %arg3[%c1_78, %c0_79, %c0_80] : memref<3x96x32xbf16, #tpu.memory_space<vmem>>, vector<1x96x32xbf16>
    %74 = vector.shape_cast %73 : vector<1x96x32xbf16> to vector<96x32xbf16>
    %cst_81 = arith.constant dense<0.000000e+00> : vector<256x32xf32>
    %75 = tpu.matmul %72, %74, %cst_81 {dimension_numbers = #tpu.dot_dimension_numbers<[1], [0], [0], [1], [0, 0, 1, 1], [], []>} : vector<256x96xbf16>, vector<96x32xbf16>, vector<256x32xf32> -> vector<256x32xf32>
    %76 = arith.addf %64, %75 : vector<256x32xf32>
    %c2_82 = arith.constant 2 : index
    %c0_83 = arith.constant 0 : index
    %c0_84 = arith.constant 0 : index
    %77 = vector.load %arg11[%c2_82, %c0_83, %c0_84] : memref<18x18x32xf32, #tpu.memory_space<vmem>>, vector<16x16x32xf32>
    %78 = vector.shape_cast %77 : vector<16x16x32xf32> to vector<256x32xf32>
    %c2_85 = arith.constant 2 : index
    %c1_86 = arith.constant 1 : index
    %c0_87 = arith.constant 0 : index
    %79 = vector.load %arg11[%c2_85, %c1_86, %c0_87] : memref<18x18x32xf32, #tpu.memory_space<vmem>>, vector<16x16x32xf32>
    %80 = vector.shape_cast %79 : vector<16x16x32xf32> to vector<256x32xf32>
    %c2_88 = arith.constant 2 : index
    %c2_89 = arith.constant 2 : index
    %c0_90 = arith.constant 0 : index
    %81 = vector.load %arg11[%c2_88, %c2_89, %c0_90] : memref<18x18x32xf32, #tpu.memory_space<vmem>>, vector<16x16x32xf32>
    %82 = vector.shape_cast %81 : vector<16x16x32xf32> to vector<256x32xf32>
    %83 = tpu.concatenate %78, %80, %82 in 1 : vector<256x32xf32>, vector<256x32xf32>, vector<256x32xf32> -> vector<256x96xf32>
    %84 = arith.truncf %83 : vector<256x96xf32> to vector<256x96xbf16>
    %c2_91 = arith.constant 2 : index
    %c0_92 = arith.constant 0 : index
    %c0_93 = arith.constant 0 : index
    %85 = vector.load %arg3[%c2_91, %c0_92, %c0_93] : memref<3x96x32xbf16, #tpu.memory_space<vmem>>, vector<1x96x32xbf16>
    %86 = vector.shape_cast %85 : vector<1x96x32xbf16> to vector<96x32xbf16>
    %cst_94 = arith.constant dense<0.000000e+00> : vector<256x32xf32>
    %87 = tpu.matmul %84, %86, %cst_94 {dimension_numbers = #tpu.dot_dimension_numbers<[1], [0], [0], [1], [0, 0, 1, 1], [], []>} : vector<256x96xbf16>, vector<96x32xbf16>, vector<256x32xf32> -> vector<256x32xf32>
    %88 = arith.addf %76, %87 : vector<256x32xf32>
    %c0_95 = arith.constant 0 : index
    %c0_96 = arith.constant 0 : index
    %89 = vector.load %arg5[%c0_95, %c0_96] : memref<2x32xf32, #tpu.memory_space<vmem>>, vector<1x32xf32>
    %90 = vector.broadcast %89 : vector<1x32xf32> to vector<256x32xf32>
    %91 = arith.mulf %88, %90 : vector<256x32xf32>
    %c1_97 = arith.constant 1 : index
    %c0_98 = arith.constant 0 : index
    %92 = vector.load %arg5[%c1_97, %c0_98] : memref<2x32xf32, #tpu.memory_space<vmem>>, vector<1x32xf32>
    %93 = vector.broadcast %92 : vector<1x32xf32> to vector<256x32xf32>
    %94 = arith.addf %91, %93 : vector<256x32xf32>
    %cst_99 = arith.constant dense<0.000000e+00> : vector<32xf32>
    %95 = vector.multi_reduction <add>, %94, %cst_99 [0] : vector<256x32xf32> to vector<32xf32>
    %96 = vector.shape_cast %95 : vector<32xf32> to vector<1x32xf32>
    %cst_100 = arith.constant 2.560000e+02 : f32
    %97 = vector.broadcast %cst_100 : f32 to vector<1x32xf32>
    %98 = arith.divf %96, %97 : vector<1x32xf32>
    %c0_101 = arith.constant 0 : index
    %c0_102 = arith.constant 0 : index
    %99 = vector.load %arg6[%c0_101, %c0_102] : memref<32x2xf32, #tpu.memory_space<vmem>>, vector<32x2xf32>
    %cst_103 = arith.constant dense<0.000000e+00> : vector<1x2xf32>
    %100 = tpu.matmul %98, %99, %cst_103 {dimension_numbers = #tpu.dot_dimension_numbers<[1], [0], [0], [1], [0, 0, 1, 1], [], []>} : vector<1x32xf32>, vector<32x2xf32>, vector<1x2xf32> -> vector<1x2xf32>
    %c0_104 = arith.constant 0 : index
    %c0_105 = arith.constant 0 : index
    %101 = vector.load %arg7[%c0_104, %c0_105] : memref<1x2xf32, #tpu.memory_space<vmem>>, vector<1x2xf32>
    %102 = arith.addf %100, %101 : vector<1x2xf32>
    %cst_106 = arith.constant 0.000000e+00 : f32
    %103 = vector.broadcast %cst_106 : f32 to vector<1x2xf32>
    %104 = arith.maximumf %102, %103 : vector<1x2xf32>
    %c0_107 = arith.constant 0 : index
    %c0_108 = arith.constant 0 : index
    %105 = vector.load %arg8[%c0_107, %c0_108] : memref<2x32xf32, #tpu.memory_space<vmem>>, vector<2x32xf32>
    %cst_109 = arith.constant dense<0.000000e+00> : vector<1x32xf32>
    %106 = tpu.matmul %104, %105, %cst_109 {dimension_numbers = #tpu.dot_dimension_numbers<[1], [0], [0], [1], [0, 0, 1, 1], [], []>} : vector<1x2xf32>, vector<2x32xf32>, vector<1x32xf32> -> vector<1x32xf32>
    %c0_110 = arith.constant 0 : index
    %c0_111 = arith.constant 0 : index
    %107 = vector.load %arg9[%c0_110, %c0_111] : memref<1x32xf32, #tpu.memory_space<vmem>>, vector<1x32xf32>
    %108 = arith.addf %106, %107 : vector<1x32xf32>
    %109 = arith.negf %108 : vector<1x32xf32>
    %110 = math.exp %109 : vector<1x32xf32>
    %cst_112 = arith.constant 1.000000e+00 : f32
    %111 = vector.broadcast %cst_112 : f32 to vector<1x32xf32>
    %112 = arith.addf %111, %110 : vector<1x32xf32>
    %113 = arith.divf %111, %112 : vector<1x32xf32>
    %114 = vector.broadcast %113 : vector<1x32xf32> to vector<256x32xf32>
    %115 = arith.mulf %94, %114 : vector<256x32xf32>
    %116 = vector.shape_cast %1 : vector<16x16x32xf32> to vector<256x32xf32>
    %117 = arith.addf %115, %116 : vector<256x32xf32>
    %cst_113 = arith.constant 0.000000e+00 : f32
    %118 = vector.broadcast %cst_113 : f32 to vector<256x32xf32>
    %119 = arith.maximumf %117, %118 : vector<256x32xf32>
    %120 = vector.shape_cast %119 : vector<256x32xf32> to vector<16x16x32xf32>
    %c0_114 = arith.constant 0 : index
    %c0_115 = arith.constant 0 : index
    %c0_116 = arith.constant 0 : index
    %c0_117 = arith.constant 0 : index
    %121 = vector.load %arg10[%c0_114, %c0_115, %c0_116, %c0_117] : memref<1x16x16x32xf32, #tpu.memory_space<vmem>>, vector<1x16x16x32xf32>
    %122 = vector.shape_cast %121 : vector<1x16x16x32xf32> to vector<16x16x32xf32>
    %123 = vector.shape_cast %120 : vector<16x16x32xf32> to vector<1x16x16x32xf32>
    tpu.vector_store %arg10[%c0_114, %c0_115, %c0_116, %c0_117], %123 {strides = array<i32>} : memref<1x16x16x32xf32, #tpu.memory_space<vmem>>, vector<1x16x16x32xf32>,
    return
  }
  func.func @transform_0(%arg0: i32) -> (i32, i32, i32, i32) {
    %c0_i32 = arith.constant 0 : i32
    %c0_i32_0 = arith.constant 0 : i32
    %c0_i32_1 = arith.constant 0 : i32
    %c0_i32_2 = arith.constant 0 : i32
    return %arg0, %c0_i32, %c0_i32_0, %c0_i32_1 : i32, i32, i32, i32
  }
  func.func @transform_1(%arg0: i32) -> (i32, i32, i32) {
    %c0_i32 = arith.constant 0 : i32
    %c0_i32_0 = arith.constant 0 : i32
    %c0_i32_1 = arith.constant 0 : i32
    %c0_i32_2 = arith.constant 0 : i32
    return %c0_i32, %c0_i32_0, %c0_i32_1 : i32, i32, i32
  }
  func.func @transform_2(%arg0: i32) -> (i32, i32, i32) {
    %c0_i32 = arith.constant 0 : i32
    %c0_i32_0 = arith.constant 0 : i32
    %c0_i32_1 = arith.constant 0 : i32
    %c0_i32_2 = arith.constant 0 : i32
    return %c0_i32, %c0_i32_0, %c0_i32_1 : i32, i32, i32
  }
  func.func @transform_3(%arg0: i32) -> (i32, i32) {
    %c0_i32 = arith.constant 0 : i32
    %c0_i32_0 = arith.constant 0 : i32
    %c0_i32_1 = arith.constant 0 : i32
    return %c0_i32, %c0_i32_0 : i32, i32
  }
  func.func @transform_4(%arg0: i32) -> (i32, i32) {
    %c0_i32 = arith.constant 0 : i32
    %c0_i32_0 = arith.constant 0 : i32
    %c0_i32_1 = arith.constant 0 : i32
    return %c0_i32, %c0_i32_0 : i32, i32
  }
  func.func @transform_5(%arg0: i32) -> (i32, i32) {
    %c0_i32 = arith.constant 0 : i32
    %c0_i32_0 = arith.constant 0 : i32
    %c0_i32_1 = arith.constant 0 : i32
    return %c0_i32, %c0_i32_0 : i32, i32
  }
  func.func @transform_6(%arg0: i32) -> (i32, i32) {
    %c0_i32 = arith.constant 0 : i32
    %c0_i32_0 = arith.constant 0 : i32
    %c0_i32_1 = arith.constant 0 : i32
    return %c0_i32, %c0_i32_0 : i32, i32
  }
  func.func @transform_7(%arg0: i32) -> (i32, i32) {
    %c0_i32 = arith.constant 0 : i32
    %c0_i32_0 = arith.constant 0 : i32
    %c0_i32_1 = arith.constant 0 : i32
    return %c0_i32, %c0_i32_0 : i32, i32
  }
  func.func @transform_8(%arg0: i32) -> (i32, i32) {
    %c0_i32 = arith.constant 0 : i32
    %c0_i32_0 = arith.constant 0 : i32
    %c0_i32_1 = arith.constant 0 : i32
    return %c0_i32, %c0_i32_0 : i32, i32
  }
  func.func @transform_9(%arg0: i32) -> (i32, i32, i32, i32) {
    %c0_i32 = arith.constant 0 : i32
    %c0_i32_0 = arith.constant 0 : i32
    %c0_i32_1 = arith.constant 0 : i32
    %c0_i32_2 = arith.constant 0 : i32
    return %arg0, %c0_i32, %c0_i32_0, %c0_i32_1 : i32, i32, i32, i32
  }
}

</mosaic_0001>

<bundles_post_ra>
// kernel: se_basic_block.1
= control target key start
LH: loop header
LB: loop body
LE: loop exit
PB: predicated region body
PF: predicated region fallthrough
CT: control target
= control target key end

     0   :  { %14 = vsyncpa [#allocation4], 0  ;;  %s9718_s0 = inlined_call_operand.hbm [shape: f32[2,16,16,32], index: 0, kind: input, shape index: {}]   ;;  %s9719_s1 = inlined_call_operand.vmem [shape: bf16[3,96,32], index: 1, kind: input, shape index: {}]   ;;  %s9720_s2 = inlined_call_operand.vmem [shape: bf16[3,96,32], index: 2, kind: input, shape index: {}]   ;;  %s9721_s3 = inlined_call_operand.vmem [shape: f32[2,32], index: 3, kind: input, shape index: {}]   ;;  %s9722_s4 = inlined_call_operand.vmem [shape: f32[2,32], index: 4, kind: input, shape index: {}]   ;;  %s9723_s5 = inlined_call_operand.vmem [shape: f32[32,2], index: 5, kind: input, shape index: {}]   ;;  %s9724_s6 = inlined_call_operand.vmem [shape: f32[1,2], index: 6, kind: input, shape index: {}]   ;;  %s9725_s7 = inlined_call_operand.vmem [shape: f32[2,32], index: 7, kind: input, shape index: {}]   ;;  %s9726_s8 = inlined_call_operand.vmem [shape: f32[1,32], index: 8, kind: input, shape index: {}]   ;;  %s9727_s9 = inlined_call_operand.hbm [shape: f32[2,16,16,32], index: 9, kind: output, shape index: {}]  }
   0x1   :  { %16 = vsyncpa [#allocation4 + $0x1], 0 }
   0x2   :  { %17 = vsyncpa [#allocation5], 0 }
   0x3   :  { %19 = vsyncpa [#allocation5 + $0x1], 0  ;;  %s7176_s30 = smov 0   ;;  %s7178_s10 = smov 0  }
   0x4   :  { %s7180_s11 = smov 0   ;;  %s7182_s12 = smov 0  }
   0x5 LB: > { %9760 = sst [smem:[#allocation9_spill]] %s7110_s11  ;;  %s7197_s13 = sadd.s32 4294967295, %s7114_s12   ;;  %s7114_s12 = sphi %s7182_s12, %s9838_s12   ;;  %s7110_s11 = sphi %s7180_s11, %s9835_s11   ;;  %s7106_s10 = sphi %s7178_s10, %s9837_s10   ;;  %s7102_s30 = sphi %s7176_s30, %s9836_s30  }
   0x6   : > { %s5345_s14 = sadd.s32 4294967294, %s7114_s12   ;;  %s7201_s15 = sadd.s32 1, %s7114_s12  }
   0x7   : > { %s32_s16 = sadd.s32 1, %s7110_s11  ;;  %s29_s17 = ssub.s32 %s7114_s12, %s7201_s15 }
   0x8   : > { %p39_p0 = scmp.ne.s32.totalorder %s7110_s11, %s7106_s10  ;;  %p30_p1 = scmp.eq.s32.totalorder %s29_s17, 0 }
   0x9   : > { %p40_p2 = scmp.eq.s32.totalorder %s7114_s12, 0  ;;  %p45_p3 = scmp.ne.s32.totalorder %s7106_s10, %s7102_s30 }
   0xa   : > { %p46_p4 = scmp.eq.s32.totalorder %s7197_s13, 0  ;;  %p237_p7 = scmp.eq.s32.totalorder %s7197_s13, 1 }
   0xb   : > { %s7213_s18 = scalar_select %p30_p1, %s7110_s11, %s32_s16  }
   0xc   : > { %p7215_p5 = por %p40_p2, %p39_p0  ;;  %p7219_p6 = por %p46_p4, %p45_p3 }
   0xd   : > { %9761 = sst [smem:[#allocation10_spill]] %s7213_s18  ;;  %p243_p8 = scmp.eq.s32.totalorder %s5345_s14, 1 }
   0xe   : > { %s9763_s20 = scalar_select %p7219_p6, 1, 0 }
   0xf   : > { %p5980_p10 = scmp.lt.s32.totalorder %s7114_s12, 2  ;;  %p7226_p11 = por %p237_p7, %p39_p0 }
  0x10   : > { %p7230_p12 = por %p243_p8, %p45_p3  ;;  %s287_s23 = sand.u32 1, %s7110_s11  }
  0x11   : > { %s9764_s21 = scalar_select %p7226_p11, 1, 0 }
  0x12   : > { %s9765_s22 = scalar_select %p7230_p12, 1, 0 }
  0x13   : > { %s5547_s24 = sshll.u32 %s7114_s12, 12  ;;  %s5348_s25 = sshll.u32 %s287_s23, 8 }
  0x14   : > { %s7239_s28 = scalar_lea.hbm %s9718_s0, %s5547_s24  ;;  %s291_s29 = scalar_lea.vmem [#allocation3], %s5348_s25 }
  0x15   : > { %s298_s14 = sshll.u32 %s291_s29, 4  ;;  %p7243_p13 = pnand %p5980_p10, %p7215_p5  ;;  %s7247_s14 = int_to_ptr.vmem [resolvable:$true] %s298_s14 }
  0x16   : > { %s7249_s17 = scalar_lea.sflag [#allocation4], %s287_s23  ;;  %s7022_s18 = scalar_lea.hbm %s7239_s28, 4096 }
  0x17   : > { %p7023_p0 = scmp.ne.s32.totalorder %s7239_s28, %s7022_s18  ;;  %p7024_p1 = pneg %p7243_p13 }
  0x18   : > { %s7027_s25 = scalar_lea.hbm %s9718_s0, 8192  ;;  %p7028_p4 = scmp.lt.s32.totalorder %s7239_s28, %s9718_s0 }
  0x19   : > { %p7025_p2 = pnand %p7024_p1, %p7023_p0  ;;  %p7029_p5 = scmp.lt.s32.totalorder %s7027_s25, %s7022_s18 }
  0x1b   : > { %p7026_p3 = pneg %p7025_p2  ;;  %p7030_p7 = por %p7029_p5, %p7028_p4 }
  0x1d   : > { %p7031_p8 = pnand %p7030_p7, %p7026_p3 }
  0x1f   : > { %7034 = shalt.err (!%p7031_p8)
}
  0x20   : > { %s7035_s23 = scalar_lea.vmem %s7247_s14, 4096  ;;  %s7116_s29 = smov [#allocation3]  }
  0x21   : > { %p7036_p10 = scmp.ne.s32.totalorder %s7247_s14, %s7035_s23  ;;  %s7040_s11 = sshll.u32 %s7116_s29, 4  ;;  %s7041_s11 = int_to_ptr.vmem [resolvable:$false] %s7040_s11 }
  0x22   : > { %s7042_s24 = scalar_lea.vmem %s7041_s11, 8192  ;;  %p7043_p2 = scmp.lt.s32.totalorder %s7247_s14, %s7041_s11 }
  0x23   : > { %p7038_p9 = pnand %p7036_p10, %p7024_p1  ;;  %p7044_p12 = scmp.lt.s32.totalorder %s7042_s24, %s7035_s23 }
  0x25   : > { %p7039_p0 = pneg %p7038_p9  ;;  %p7045_p11 = por %p7044_p12, %p7043_p2 }
  0x27   : > { %p7046_p6 = pnand %p7045_p11, %p7039_p0 }
  0x29   : > { %7049 = shalt.err (!%p7046_p6)
}
  0x2a   : > { %s7117_s18 = smov 128   ;;  %s7118_s26 = smov 8  }
  0x2b   : > { %5975 = dma.hbm_to_vmem [thread:$0]  (!%p7243_p13), %s7239_s28, 4096, %s7247_s14, %s7249_s17, %s7117_s18, %s7117_s18, %s7118_s26  }
  0x2c   : > { %p5351_p9 = scmp.ge.s32.totalorder %s7114_s12, 1  ;;  %p306_p1 = scmp.lt.s32.totalorder %s7114_s12, 3 }
  0x2e   : > { %p307_p3 = pnand %p5351_p9, %p306_p1 }
  0x30   : > { %310 = sbr.rel (%p307_p3) target bundleno = 1515 (0x5eb), region = 56 }
  0x35   : > { %s7273_s11 = sand.u32 1, %s7106_s10   ;;  %p9767_p6 = scmp.ne.s32.totalorder %s9763_s20, 0 }
  0x36   : > { %s5352_s25 = sshll.u32 %s7273_s11, 8  ;;  %s313_s19 = scalar_lea.sflag [#allocation4], %s7273_s11 }
  0x37   : > { %s7279_s27 = scalar_lea.vmem [#allocation3], %s5352_s25 }
  0x38   : > { %7093 = dma.done.wait (%p9767_p6), %s313_s19, 4096  }
  0x39   : > { %7095 = vsyncadd (%p9767_p6), %s313_s19, 4294963200  ;;  %vm384_vm0 = vcmask 261120   ;;  %vm387_vm1 = vcmask 254976   ;;  %v9731_v0 = vmov 0.0   ;;  %v7394_v1 = vld [vmem:[%s7279_s27] sm:$0xff]  ;;  %v7397_v2 = vld [vmem:[%s7279_s27 + $0x8] sm:$0xff] }
  0x3a   : > { %389 = vst.msk [vmem:[#allocation2 + $0x18] sm:$0xff] %vm384_vm0, %v9731_v0  ;;  %390 = vst.msk [vmem:[#allocation2 + $0x20] sm:$0xff] %vm384_vm0, %v9731_v0  ;;  %v7400_v3 = vld [vmem:[%s7279_s27 + $0x10] sm:$0xff]  ;;  %v7407_v4 = vld [vmem:[%s7279_s27 + $0x18] sm:$0xff]  ;;  %s7120_s20 = smov 64   ;;  %s7121_s28 = smov 32  }
  0x3b   : > { %391 = vst.msk [vmem:[#allocation2 + $0x28] sm:$0x3] %vm387_vm1, %v9731_v0  ;;  %388 = vst.msk [vmem:[#allocation2 + $0x10] sm:$0x3] %vm387_vm1, %v9731_v0  ;;  %v7412_v5 = vld [vmem:[%s7279_s27 + $0x30] sm:$0xff]  ;;  %v7415_v6 = vld [vmem:[%s7279_s27 + $0x38] sm:$0xff] }
  0x3c   : > { %385 = vst.msk [vmem:[#allocation2] sm:$0xff] %vm384_vm0, %v9731_v0  ;;  %386 = vst.msk [vmem:[#allocation2 + $0x8] sm:$0xff] %vm384_vm0, %v9731_v0  ;;  %v7424_v7 = vld [vmem:[%s7279_s27 + $0x20] sm:$0xff]  ;;  %v7427_v8 = vld [vmem:[%s7279_s27 + $0x28] sm:$0xff]  ;;  %vm857_vm2 = vcmask 523264   ;;  %vm1399_vm3 = vcmask 785408  }
  0x3d   : > { %392 = vst.msk [vmem:[#allocation2 + $0x30] sm:$0xff] %vm384_vm0, %v9731_v0  ;;  %393 = vst.msk [vmem:[#allocation2 + $0x38] sm:$0xff] %vm384_vm0, %v9731_v0  ;;  %v7430_v9 = vld [vmem:[%s7279_s27 + $0x50] sm:$0xff]  ;;  %v7437_v10 = vld [vmem:[%s7279_s27 + $0x58] sm:$0xff]  ;;  %vm7122_vm4 = vmmov 0   ;;  %vm5046_vm5 = vcmask 1041408  }
  0x3e   : > { %394 = vst.msk [vmem:[#allocation2 + $0x40] sm:$0x3] %vm387_vm1, %v9731_v0  ;;  %397 = vst.msk [vmem:[#allocation2 + $0x58] sm:$0x3] %vm387_vm1, %v9731_v0  ;;  %v7442_v11 = vld [vmem:[%s7279_s27 + $0x40] sm:$0xff]  ;;  %v7445_v12 = vld [vmem:[%s7279_s27 + $0x48] sm:$0xff] }
  0x3f   : > { %395 = vst.msk [vmem:[#allocation2 + $0x48] sm:$0xff] %vm384_vm0, %v9731_v0  ;;  %396 = vst.msk [vmem:[#allocation2 + $0x50] sm:$0xff] %vm384_vm0, %v9731_v0  ;;  %v7454_v13 = vld [vmem:[%s7279_s27 + $0x70] sm:$0xff]  ;;  %v7457_v14 = vld [vmem:[%s7279_s27 + $0x78] sm:$0xff]  ;;  %vm5042_vm6 = vcmask 15360   ;;  %s9586_s14 = scalar_lea.vmem [#allocation6], %s5352_s25 }
  0x40   : > { %398 = vst.msk [vmem:[#allocation2 + $0x60] sm:$0xff] %vm384_vm0, %v9731_v0  ;;  %399 = vst.msk [vmem:[#allocation2 + $0x68] sm:$0xff] %vm384_vm0, %v9731_v0  ;;  %v7460_v15 = vld [vmem:[%s7279_s27 + $0x60] sm:$0xff]  ;;  %v7467_v16 = vld [vmem:[%s7279_s27 + $0x68] sm:$0xff]  ;;  %s5548_s25 = sshll.u32 %s7197_s13, 12  ;;  %s5272_s16 = sshll.u32 %s9586_s14, 4  ;;  %s9647_s16 = int_to_ptr.vmem [resolvable:$true] %s5272_s16 }
  0x41   : > { %400 = vst.msk [vmem:[#allocation2 + $0x70] sm:$0x3] %vm387_vm1, %v9731_v0  ;;  %403 = vst.msk [vmem:[#allocation2 + $0x88] sm:$0x3] %vm387_vm1, %v9731_v0  ;;  %v7472_v17 = vld [vmem:[%s7279_s27 + $0x90] sm:$0xff]  ;;  %v7475_v18 = vld [vmem:[%s7279_s27 + $0x98] sm:$0xff]  ;;  %s9645_s23 = scalar_lea.hbm %s9727_s9, %s5548_s25 }
  0x42   : > { %401 = vst.msk [vmem:[#allocation2 + $0x78] sm:$0xff] %vm384_vm0, %v9731_v0  ;;  %402 = vst.msk [vmem:[#allocation2 + $0x80] sm:$0xff] %vm384_vm0, %v9731_v0  ;;  %v7484_v19 = vld [vmem:[%s7279_s27 + $0x80] sm:$0xff]  ;;  %v7487_v20 = vld [vmem:[%s7279_s27 + $0x88] sm:$0xff]  ;;  %s5259_s29 = scalar_lea.sflag [#allocation5], %s7273_s11  ;;  %s7050_s24 = scalar_lea.vmem %s9647_s16, 4096 }
  0x43   : > { %404 = vst.msk [vmem:[#allocation2 + $0x90] sm:$0xff] %vm384_vm0, %v9731_v0  ;;  %405 = vst.msk [vmem:[#allocation2 + $0x98] sm:$0xff] %vm384_vm0, %v9731_v0  ;;  %v7490_v21 = vld [vmem:[%s7279_s27 + $0xb0] sm:$0xff]  ;;  %v7497_v22 = vld [vmem:[%s7279_s27 + $0xb8] sm:$0xff]  ;;  %p7051_p11 = scmp.ne.s32.totalorder %s9647_s16, %s7050_s24  ;;  %p9831_p12 = scmp.ne.s32.totalorder %s9764_s21, 0 }
  0x44   : > { %406 = vst.msk [vmem:[#allocation2 + $0xa0] sm:$0x3] %vm387_vm1, %v9731_v0  ;;  %409 = vst.msk [vmem:[#allocation2 + $0xb8] sm:$0x3] %vm387_vm1, %v9731_v0  ;;  %v7502_v23 = vld [vmem:[%s7279_s27 + $0xa0] sm:$0xff]  ;;  %v7505_v24 = vld [vmem:[%s7279_s27 + $0xa8] sm:$0xff] }
  0x45   : > { %407 = vst.msk [vmem:[#allocation2 + $0xa8] sm:$0xff] %vm384_vm0, %v9731_v0  ;;  %408 = vst.msk [vmem:[#allocation2 + $0xb0] sm:$0xff] %vm384_vm0, %v9731_v0  ;;  %v7550_v59 = vld [vmem:[%s7279_s27 + $0xd0] sm:$0xff]  ;;  %v7553_v60 = vld [vmem:[%s7279_s27 + $0xd8] sm:$0xff]  ;;  %p7052_p13 = pnand %p7051_p11, %p9831_p12 }
  0x46   : > { %410 = vst.msk [vmem:[#allocation2 + $0xc0] sm:$0xff] %vm384_vm0, %v9731_v0  ;;  %411 = vst.msk [vmem:[#allocation2 + $0xc8] sm:$0xff] %vm384_vm0, %v9731_v0  ;;  %v7556_v61 = vld [vmem:[%s7279_s27 + $0xc0] sm:$0xff]  ;;  %v7563_v62 = vld [vmem:[%s7279_s27 + $0xc8] sm:$0xff] }
  0x47   : > { %412 = vst.msk [vmem:[#allocation2 + $0xd0] sm:$0x3] %vm387_vm1, %v9731_v0  ;;  %415 = vst.msk [vmem:[#allocation2 + $0xe8] sm:$0x3] %vm387_vm1, %v9731_v0  ;;  %v7568_v63 = vld [vmem:[%s7279_s27 + $0xf0] sm:$0xff]  ;;  %p7053_p4 = pneg %p7052_p13 }
  0x48   : > { %413 = vst.msk [vmem:[#allocation2 + $0xd8] sm:$0xff] %vm384_vm0, %v9731_v0  ;;  %414 = vst.msk [vmem:[#allocation2 + $0xe0] sm:$0xff] %vm384_vm0, %v9731_v0 }
  0x49   : > { %416 = vst.msk [vmem:[#allocation2 + $0xf0] sm:$0xff] %vm384_vm0, %v9731_v0  ;;  %417 = vst.msk [vmem:[#allocation2 + $0xf8] sm:$0xff] %vm384_vm0, %v9731_v0 }
  0x4a   : > { %418 = vst.msk [vmem:[#allocation2 + $0x100] sm:$0x3] %vm387_vm1, %v9731_v0  ;;  %421 = vst.msk [vmem:[#allocation2 + $0x118] sm:$0x3] %vm387_vm1, %v9731_v0 }
  0x4b   : > { %419 = vst.msk [vmem:[#allocation2 + $0x108] sm:$0xff] %vm384_vm0, %v9731_v0  ;;  %420 = vst.msk [vmem:[#allocation2 + $0x110] sm:$0xff] %vm384_vm0, %v9731_v0 }
  0x4c   : > { %422 = vst.msk [vmem:[#allocation2 + $0x120] sm:$0xff] %vm384_vm0, %v9731_v0  ;;  %423 = vst.msk [vmem:[#allocation2 + $0x128] sm:$0xff] %vm384_vm0, %v9731_v0 }
  0x4d   : > { %424 = vst.msk [vmem:[#allocation2 + $0x130] sm:$0x3] %vm387_vm1, %v9731_v0  ;;  %427 = vst.msk [vmem:[#allocation2 + $0x148] sm:$0x3] %vm387_vm1, %v9731_v0 }
  0x4e   : > { %425 = vst.msk [vmem:[#allocation2 + $0x138] sm:$0xff] %vm384_vm0, %v9731_v0  ;;  %426 = vst.msk [vmem:[#allocation2 + $0x140] sm:$0xff] %vm384_vm0, %v9731_v0 }
  0x4f   : > { %428 = vst.msk [vmem:[#allocation2 + $0x150] sm:$0xff] %vm384_vm0, %v9731_v0  ;;  %429 = vst.msk [vmem:[#allocation2 + $0x158] sm:$0xff] %vm384_vm0, %v9731_v0 }
  0x50   : > { %430 = vst.msk [vmem:[#allocation2 + $0x160] sm:$0x3] %vm387_vm1, %v9731_v0  ;;  %433 = vst.msk [vmem:[#allocation2 + $0x178] sm:$0x3] %vm387_vm1, %v9731_v0 }
  0x51   : > { %431 = vst.msk [vmem:[#allocation2 + $0x168] sm:$0xff] %vm384_vm0, %v9731_v0  ;;  %432 = vst.msk [vmem:[#allocation2 + $0x170] sm:$0xff] %vm384_vm0, %v9731_v0 }
  0x52   : > { %434 = vst.msk [vmem:[#allocation2 + $0x180] sm:$0xff] %vm384_vm0, %v9731_v0  ;;  %435 = vst.msk [vmem:[#allocation2 + $0x188] sm:$0xff] %vm384_vm0, %v9731_v0 }
  0x53   : > { %436 = vst.msk [vmem:[#allocation2 + $0x190] sm:$0x3] %vm387_vm1, %v9731_v0  ;;  %439 = vst.msk [vmem:[#allocation2 + $0x1a8] sm:$0x3] %vm387_vm1, %v9731_v0 }
  0x54   : > { %437 = vst.msk [vmem:[#allocation2 + $0x198] sm:$0xff] %vm384_vm0, %v9731_v0  ;;  %438 = vst.msk [vmem:[#allocation2 + $0x1a0] sm:$0xff] %vm384_vm0, %v9731_v0  ;;  %v7658_v0 = vld [vmem:[%s9719_s1 + $0x88] sm:$0xff]  }
  0x55   : > { %441 = vst.msk [vmem:[#allocation2 + $0x19] sm:$0xff] %vm384_vm0, %v7394_v1  ;;  %442 = vst.msk [vmem:[#allocation2 + $0x21] sm:$0xff] %vm384_vm0, %v7397_v2 }
  0x56   : > { %443 = vst.msk [vmem:[#allocation2 + $0x31] sm:$0xff] %vm384_vm0, %v7400_v3  ;;  %9768 = vst [vmem:[#allocation11_spill] sm:$0xff] %v7412_v5 }
  0x57   : > { %9769 = vst [vmem:[#allocation12_spill] sm:$0xff] %v7415_v6  ;;  %444 = vst.msk [vmem:[#allocation2 + $0x39] sm:$0xff] %vm384_vm0, %v7407_v4 }
  0x58   : > { %447 = vst.msk [vmem:[#allocation2 + $0x61] sm:$0xff] %vm384_vm0, %v7412_v5  ;;  %448 = vst.msk [vmem:[#allocation2 + $0x69] sm:$0xff] %vm384_vm0, %v7415_v6 }
  0x59   : > { %9770 = vst [vmem:[#allocation13_spill] sm:$0xff] %v7427_v8  ;;  %9771 = vst [vmem:[#allocation14_spill] sm:$0xff] %v7430_v9 }
  0x5a   : > { %445 = vst.msk [vmem:[#allocation2 + $0x49] sm:$0xff] %vm384_vm0, %v7424_v7  ;;  %446 = vst.msk [vmem:[#allocation2 + $0x51] sm:$0xff] %vm384_vm0, %v7427_v8 }
  0x5b   : > { %9772 = vst [vmem:[#allocation15_spill] sm:$0xff] %v7437_v10  ;;  %451 = vst.msk [vmem:[#allocation2 + $0x91] sm:$0xff] %vm384_vm0, %v7430_v9 }
  0x5c   : > { %9773 = vst [vmem:[#allocation16_spill] sm:$0xff] %v7442_v11  ;;  %9774 = vst [vmem:[#allocation17_spill] sm:$0xff] %v7445_v12  ;;  %v982_v25 = vld [vmem:[#allocation2 + $0x1a] sm:$0xff]  ;;  %v983_v26 = vld [vmem:[#allocation2 + $0x22] sm:$0xff] }
  0x5d   : > { %452 = vst.msk [vmem:[#allocation2 + $0x99] sm:$0xff] %vm384_vm0, %v7437_v10  ;;  %449 = vst.msk [vmem:[#allocation2 + $0x79] sm:$0xff] %vm384_vm0, %v7442_v11  ;;  %v950_v27 = vld [vmem:[#allocation2 + $0x19] sm:$0xff]  ;;  %v7513_v28 = vpack.i.bf16 %v983_v26, %v982_v25  ;;  %v951_v29 = vld [vmem:[#allocation2 + $0x21] sm:$0xff] }
  0x5e   : > { %450 = vst.msk [vmem:[#allocation2 + $0x81] sm:$0xff] %vm384_vm0, %v7445_v12  ;;  %9775 = vst [vmem:[#allocation18_spill] sm:$0xff] %v7454_v13  ;;  %v984_v30 = vld [vmem:[#allocation2 + $0x32] sm:$0xff]  ;;  %v985_v31 = vld [vmem:[#allocation2 + $0x3a] sm:$0xff]  ;;  %v7515_v32 = vpack.i.bf16 %v951_v29, %v950_v27 }
  0x5f   : > { %9776 = vst [vmem:[#allocation19_spill] sm:$0xff] %v7457_v14  ;;  %9777 = vst [vmem:[#allocation20_spill] sm:$0xff] %v7460_v15  ;;  %v952_v33 = vld [vmem:[#allocation2 + $0x31] sm:$0xff]  ;;  %v953_v34 = vld [vmem:[#allocation2 + $0x39] sm:$0xff]  ;;  %6033 = vrot.lane.b32.xlu1 %v7513_v28, %s7120_s20  ;;  %v7519_v35 = vpack.i.bf16 %v985_v31, %v984_v30 }
  0x60   : > { %455 = vst.msk [vmem:[#allocation2 + $0xc1] sm:$0xff] %vm384_vm0, %v7454_v13  ;;  %456 = vst.msk [vmem:[#allocation2 + $0xc9] sm:$0xff] %vm384_vm0, %v7457_v14  ;;  %6023 = vrot.lane.b32.xlu0 %v7515_v32, %s7121_s28  ;;  %v7523_v36 = vpack.i.bf16 %v953_v34, %v952_v33  ;;  %v956_v37 = vld [vmem:[#allocation2 + $0x61] sm:$0xff]  ;;  %v957_v38 = vld [vmem:[#allocation2 + $0x69] sm:$0xff] }
  0x61   : > { %9778 = vst [vmem:[#allocation21_spill] sm:$0xff] %v7467_v16  ;;  %453 = vst.msk [vmem:[#allocation2 + $0xa9] sm:$0xff] %vm384_vm0, %v7460_v15  ;;  %v954_v39 = vld [vmem:[#allocation2 + $0x49] sm:$0xff]  ;;  %v955_v40 = vld [vmem:[#allocation2 + $0x51] sm:$0xff]  ;;  %v7527_v41 = vpack.i.bf16 %v957_v38, %v956_v37 }
  0x62   : > { %9779 = vst [vmem:[#allocation22_spill] sm:$0xff] %v7472_v17  ;;  %9780 = vst [vmem:[#allocation23_spill] sm:$0xff] %v7475_v18  ;;  %v7531_v42 = vpack.i.bf16 %v955_v40, %v954_v39  ;;  %v988_v43 = vld [vmem:[#allocation2 + $0x62] sm:$0xff]  ;;  %v989_v44 = vld [vmem:[#allocation2 + $0x6a] sm:$0xff] }
  0x63   : > { %454 = vst.msk [vmem:[#allocation2 + $0xb1] sm:$0xff] %vm384_vm0, %v7467_v16  ;;  %459 = vst.msk [vmem:[#allocation2 + $0xf1] sm:$0xff] %vm384_vm0, %v7472_v17  ;;  %6038 = vrot.lane.b32.xlu1 %v7519_v35, %s7120_s20  ;;  %v986_v45 = vld [vmem:[#allocation2 + $0x4a] sm:$0xff]  ;;  %v987_v46 = vld [vmem:[#allocation2 + $0x52] sm:$0xff]  ;;  %v7535_v47 = vpack.i.bf16 %v989_v44, %v988_v43 }
  0x64   : > { %460 = vst.msk [vmem:[#allocation2 + $0xf9] sm:$0xff] %vm384_vm0, %v7475_v18  ;;  %9781 = vst [vmem:[#allocation24_spill] sm:$0xff] %v7484_v19  ;;  %6028 = vrot.lane.b32.xlu0 %v7523_v36, %s7121_s28  ;;  %v7539_v48 = vpack.i.bf16 %v987_v46, %v986_v45  ;;  %v960_v49 = vld [vmem:[#allocation2 + $0x91] sm:$0xff]  ;;  %v961_v50 = vld [vmem:[#allocation2 + $0x99] sm:$0xff] }
  0x65   : > { %9782 = vst [vmem:[#allocation25_spill] sm:$0xff] %v7487_v20  ;;  %9783 = vst [vmem:[#allocation26_spill] sm:$0xff] %v7490_v21  ;;  %v958_v51 = vld [vmem:[#allocation2 + $0x79] sm:$0xff]  ;;  %v959_v52 = vld [vmem:[#allocation2 + $0x81] sm:$0xff]  ;;  %v7543_v54 = vpack.i.bf16 %v961_v50, %v960_v49 }
  0x66   : > { %457 = vst.msk [vmem:[#allocation2 + $0xd9] sm:$0xff] %vm384_vm0, %v7484_v19  ;;  %458 = vst.msk [vmem:[#allocation2 + $0xe1] sm:$0xff] %vm384_vm0, %v7487_v20  ;;  %v992_v53 = vld [vmem:[#allocation2 + $0x92] sm:$0xff]  ;;  %v993_v55 = vld [vmem:[#allocation2 + $0x9a] sm:$0xff]  ;;  %v7547_v58 = vpack.i.bf16 %v959_v52, %v958_v51 }
  0x67   : > { %9784 = vst [vmem:[#allocation27_spill] sm:$0xff] %v7497_v22  ;;  %463 = vst.msk [vmem:[#allocation2 + $0x121] sm:$0xff] %vm384_vm0, %v7490_v21  ;;  %6048 = vrot.lane.b32.xlu1 %v7527_v41, %s7121_s28  ;;  %v990_v56 = vld [vmem:[#allocation2 + $0x7a] sm:$0xff]  ;;  %v991_v57 = vld [vmem:[#allocation2 + $0x82] sm:$0xff]  ;;  %v7587_v30 = vpack.i.bf16 %v993_v55, %v992_v53 }
  0x68   : > { %9785 = vst [vmem:[#allocation28_spill] sm:$0xff] %v7502_v23  ;;  %9786 = vst [vmem:[#allocation29_spill] sm:$0xff] %v7505_v24  ;;  %6043 = vrot.lane.b32.xlu0 %v7531_v42, %s7121_s28  ;;  %v7571_v25 = vld [vmem:[%s7279_s27 + $0xf8] sm:$0xff]  ;;  %v7580_v27 = vld [vmem:[%s7279_s27 + $0xe0] sm:$0xff]  ;;  %v7595_v37 = vpack.i.bf16 %v991_v57, %v990_v56 }
  0x69   : > { %464 = vst.msk [vmem:[#allocation2 + $0x129] sm:$0xff] %vm384_vm0, %v7497_v22  ;;  %461 = vst.msk [vmem:[#allocation2 + $0x109] sm:$0xff] %vm384_vm0, %v7502_v23  ;;  %v964_v26 = vld [vmem:[#allocation2 + $0xc1] sm:$0xff]  ;;  %v7583_v29 = vld [vmem:[%s7279_s27 + $0xe8] sm:$0xff] }
  0x6a   : > { %462 = vst.msk [vmem:[#allocation2 + $0x111] sm:$0xff] %vm384_vm0, %v7505_v24  ;;  %9787 = vst [vmem:[#allocation30_spill] sm:$0xff] %v7550_v59  ;;  %v965_v31 = vld [vmem:[#allocation2 + $0xc9] sm:$0xff]  ;;  %v963_v34 = vld [vmem:[#allocation2 + $0xb1] sm:$0xff] }
  0x6b   : > { %6058 = vrot.lane.b32.xlu1 %v7535_v47, %s7120_s20  ;;  %9788 = vst [vmem:[#allocation31_spill] sm:$0xff] %v7553_v60  ;;  %9789 = vst [vmem:[#allocation32_spill] sm:$0xff] %v7556_v61  ;;  %v962_v33 = vld [vmem:[#allocation2 + $0xa9] sm:$0xff]  ;;  %v6982_v38 = vld [vmem:[%s9719_s1 + $0x58] sm:$0xff]   ;;  %v7605_v40 = vpack.i.bf16 %v965_v31, %v964_v26 }
  0x6c   : > { %6053 = vrot.lane.b32.xlu0 %v7539_v48, %s7120_s20  ;;  %467 = vst.msk [vmem:[#allocation2 + $0x151] sm:$0xff] %vm384_vm0, %v7550_v59  ;;  %468 = vst.msk [vmem:[#allocation2 + $0x159] sm:$0xff] %vm384_vm0, %v7553_v60  ;;  %v6983_v39 = vld [vmem:[%s9719_s1 + $0x50] sm:$0xff]   ;;  %5688 = vmatprep.subr.bf16.mxu0 %v6982_v38  ;;  %v7609_v43 = vpack.i.bf16 %v963_v34, %v962_v33  ;;  %v996_v44 = vld [vmem:[#allocation2 + $0xc2] sm:$0xff] }
  0x6d   : > { %9790 = vst [vmem:[#allocation33_spill] sm:$0xff] %v7563_v62  ;;  %465 = vst.msk [vmem:[#allocation2 + $0x139] sm:$0xff] %vm384_vm0, %v7556_v61  ;;  %5689 = vmatpush3.bf16.msra.mxu0 %v6982_v38  ;;  %v997_v45 = vld [vmem:[#allocation2 + $0xca] sm:$0xff]  ;;  %v995_v50 = vld [vmem:[#allocation2 + $0xb2] sm:$0xff] }
  0x6e   : > { %9791 = vst [vmem:[#allocation34_spill] sm:$0xff] %v7568_v63  ;;  %9792 = vst [vmem:[#allocation35_spill] sm:$0xff] %v7571_v25  ;;  %5690 = vmatprep.subr.bf16.mxu0 %v6983_v39  ;;  %v6984_v46 = vld [vmem:[%s9719_s1 + $0x48] sm:$0xff]   ;;  %v7616_v51 = vpack.i.bf16 %v997_v45, %v996_v44  ;;  %v968_v52 = vld [vmem:[#allocation2 + $0xf1] sm:$0xff] }
  0x6f   : > { %466 = vst.msk [vmem:[#allocation2 + $0x141] sm:$0xff] %vm384_vm0, %v7563_v62  ;;  %471 = vst.msk [vmem:[#allocation2 + $0x181] sm:$0xff] %vm384_vm0, %v7568_v63  ;;  %6068 = vrot.lane.b32.xlu1 %v7543_v54, %s7121_s28  ;;  %v994_v49 = vld [vmem:[#allocation2 + $0xaa] sm:$0xff]  ;;  %v969_v55 = vld [vmem:[#allocation2 + $0xf9] sm:$0xff] }
  0x70   : > { %472 = vst.msk [vmem:[#allocation2 + $0x189] sm:$0xff] %vm384_vm0, %v7571_v25  ;;  %9793 = vst [vmem:[#allocation36_spill] sm:$0xff] %v7580_v27  ;;  %6063 = vrot.lane.b32.xlu0 %v7547_v58, %s7121_s28  ;;  %v7620_v53 = vpack.i.bf16 %v995_v50, %v994_v49  ;;  %v966_v56 = vld [vmem:[#allocation2 + $0xd9] sm:$0xff]  ;;  %v967_v26 = vld [vmem:[#allocation2 + $0xe1] sm:$0xff]  ;;  %v7627_v31 = vpack.i.bf16 %v969_v55, %v968_v52 }
  0x71   : > { %9794 = vst [vmem:[#allocation37_spill] sm:$0xff] %v7583_v29  ;;  %469 = vst.msk [vmem:[#allocation2 + $0x169] sm:$0xff] %vm384_vm0, %v7580_v27  ;;  %5691 = vmatpush3.bf16.msra.mxu0 %v6983_v39  ;;  %v6985_v57 = vld [vmem:[%s9719_s1 + $0x40] sm:$0xff]   ;;  %v7631_v33 = vpack.i.bf16 %v967_v26, %v966_v56  ;;  %v1000_v34 = vld [vmem:[#allocation2 + $0xf2] sm:$0xff] }
  0x72   : > { %470 = vst.msk [vmem:[#allocation2 + $0x171] sm:$0xff] %vm384_vm0, %v7583_v29  ;;  %5692 = vmatprep.subr.bf16.mxu0 %v6984_v46  ;;  %v1001_v38 = vld [vmem:[#allocation2 + $0xfa] sm:$0xff]  ;;  %v999_v45 = vld [vmem:[#allocation2 + $0xe2] sm:$0xff]  ;;  %v6987_v55 = vld [vmem:[%s9719_s1 + $0x30] sm:$0xff]  }
  0x73   : > { %6078 = vrot.lane.b32.xlu1 %v7587_v30, %s7120_s20  ;;  %v6986_v39 = vld [vmem:[%s9719_s1 + $0x38] sm:$0xff]   ;;  %v7638_v49 = vpack.i.bf16 %v1001_v38, %v1000_v34  ;;  %v972_v50 = vld [vmem:[#allocation2 + $0x121] sm:$0xff]  ;;  %v973_v52 = vld [vmem:[#allocation2 + $0x129] sm:$0xff] }
  0x74   : > { %6073 = vrot.lane.b32.xlu0 %v7595_v37, %s7120_s20  ;;  %v998_v44 = vld [vmem:[#allocation2 + $0xda] sm:$0xff]  ;;  %v970_v56 = vld [vmem:[#allocation2 + $0x109] sm:$0xff]  ;;  %v971_v26 = vld [vmem:[#allocation2 + $0x111] sm:$0xff]  ;;  %v7649_v34 = vpack.i.bf16 %v973_v52, %v972_v50 }
  0x75   : > { %5693 = vmatpush3.bf16.msra.mxu0 %v6984_v46  ;;  %v7642_v46 = vpack.i.bf16 %v999_v45, %v998_v44  ;;  %v7653_v38 = vpack.i.bf16 %v971_v26, %v970_v56  ;;  %v1005_v44 = vld [vmem:[#allocation2 + $0x12a] sm:$0xff]  ;;  %v1003_v25 = vld [vmem:[#allocation2 + $0x112] sm:$0xff]  ;;  %v1009_v27 = vld [vmem:[#allocation2 + $0x15a] sm:$0xff] }
  0x76   : > { %5694 = vmatprep.subr.bf16.mxu0 %v6985_v57  ;;  %v1002_v45 = vld [vmem:[#allocation2 + $0x10a] sm:$0xff]  ;;  %v974_v52 = vld [vmem:[#allocation2 + $0x139] sm:$0xff]  ;;  %v975_v26 = vld [vmem:[#allocation2 + $0x141] sm:$0xff] }
  0x77   : > { %6088 = vrot.lane.b32.xlu1 %v7605_v40, %s7121_s28  ;;  %v976_v63 = vld [vmem:[#allocation2 + $0x151] sm:$0xff]  ;;  %v7666_v56 = vpack.i.bf16 %v1003_v25, %v1002_v45  ;;  %v6992_v29 = vld [vmem:[%s9719_s1 + $0x28] sm:$0xff]   ;;  %v7681_v25 = vpack.i.bf16 %v975_v26, %v974_v52  ;;  %v1006_v45 = vld [vmem:[#allocation2 + $0x13a] sm:$0xff] }
  0x78   : > { %6083 = vrot.lane.b32.xlu0 %v7609_v43, %s7121_s28  ;;  %5732 = vmatprep.subr.bf16.mxu1 %v6992_v29  ;;  %v1007_v60 = vld [vmem:[#allocation2 + $0x142] sm:$0xff]  ;;  %v6994_v59 = vld [vmem:[%s9719_s1 + $0x18] sm:$0xff]   ;;  %v9232_v11 = vld [vmem:[%s9722_s4] ss:$0 sm:$0xff] }
  0x79   : > { %5695 = vmatpush3.bf16.msra.mxu0 %v6985_v57  ;;  %v1004_v57 = vld [vmem:[#allocation2 + $0x122] sm:$0xff]  ;;  %5733 = vmatpush3.bf16.msra.mxu1 %v6992_v29  ;;  %v7690_v61 = vpack.i.bf16 %v1007_v60, %v1006_v45  ;;  %v979_v26 = vld [vmem:[#allocation2 + $0x171] sm:$0xff] }
  0x7a   : > { %5696 = vmatprep.subr.bf16.mxu0 %v6986_v39  ;;  %v7662_v50 = vpack.i.bf16 %v1005_v44, %v1004_v57  ;;  %v6993_v57 = vld [vmem:[%s9719_s1 + $0x20] sm:$0xff]   ;;  %v1008_v44 = vld [vmem:[#allocation2 + $0x152] sm:$0xff]  ;;  %v978_v52 = vld [vmem:[#allocation2 + $0x169] sm:$0xff] }
  0x7b   : > { %6098 = vrot.lane.b32.xlu1 %v7616_v51, %s7120_s20  ;;  %5734 = vmatprep.subr.bf16.mxu1 %v6993_v57  ;;  %v980_v62 = vld [vmem:[#allocation2 + $0x181] sm:$0xff]  ;;  %v6996_v29 = vld [vmem:[%s9719_s1 + $0x10] sm:$0xff]  }
  0x7c   : > { %6093 = vrot.lane.b32.xlu0 %v7620_v53, %s7120_s20  ;;  %v1012_v21 = vld [vmem:[#allocation2 + $0x182] sm:$0xff]  ;;  %v1010_v60 = vld [vmem:[#allocation2 + $0x16a] sm:$0xff]  ;;  %v1011_v45 = vld [vmem:[#allocation2 + $0x172] sm:$0xff] }
  0x7d   : > { %5697 = vmatpush3.bf16.msra.mxu0 %v6986_v39  ;;  %v977_v39 = vld [vmem:[#allocation2 + $0x159] sm:$0xff]  ;;  %5735 = vmatpush3.bf16.msra.mxu1 %v6993_v57  ;;  %v6997_v57 = vld [vmem:[%s9719_s1 + $0x8] sm:$0xff]  }
  0x7e   : > { %5698 = vmatprep.subr.bf16.mxu0 %v6987_v55  ;;  %5736 = vmatprep.subr.bf16.mxu1 %v6994_v59  ;;  %v1947_v16 = vld [vmem:[#allocation2 + $0x182] sm:$0xff] }
  0x7f   : > { %6108 = vrot.lane.b32.xlu1 %v7627_v31, %s7121_s28 }
  0x80   : > { %6103 = vrot.lane.b32.xlu0 %v7631_v33, %s7121_s28 }
  0x81   : > { %5699 = vmatpush3.bf16.msra.mxu0 %v6987_v55  ;;  %v7677_v55 = vpack.i.bf16 %v977_v39, %v976_v63  ;;  %v6157_v63 = vpack.i.bf16 %v1009_v27, %v1008_v44  ;;  %v981_v39 = vld [vmem:[#allocation2 + $0x189] sm:$0xff]  ;;  %v7698_v27 = vpack.i.bf16 %v979_v26, %v978_v52  ;;  %5737 = vmatpush3.bf16.msra.mxu1 %v6994_v59  ;;  %v6998_v59 = vld [vmem:[%s9719_s1] sm:$0xff]  }
  0x82   : > { %5776 = vmatprep.subr.bf16.mxu0 %v7658_v0  ;;  %v6167_v22 = vpack.i.bf16 %v981_v39, %v980_v62  ;;  %v1013_v44 = vld [vmem:[#allocation2 + $0x18a] sm:$0xff]  ;;  %5738 = vmatprep.subr.bf16.mxu1 %v6996_v29  ;;  %v7706_v62 = vpack.i.bf16 %v1011_v45, %v1010_v60  ;;  %v537_v52 = vld [vmem:[#allocation2 + $0x2] sm:$0xff] }
  0x83   : > { %6118 = vrot.lane.b32.xlu1 %v7638_v49, %s7120_s20  ;;  %v6177_v24 = vpack.i.bf16 %v1013_v44, %v1012_v21  ;;  %v506_v39 = vld [vmem:[#allocation2 + $0x9] sm:$0xff]  ;;  %v7778_v44 = vld [vmem:[#allocation2 + $0x38] sm:$0xff] }
  0x84   : > { %6113 = vrot.lane.b32.xlu0 %v7642_v46, %s7120_s20 }
  0x85   : > { %5739 = vmatpush3.bf16.msra.mxu1 %v6996_v29  ;;  %v7776_v29 = vld [vmem:[#allocation2 + $0x30] sm:$0xff] }
  0x86   : > { %5740 = vmatprep.subr.bf16.mxu1 %v6997_v57 }
  0x87   : > { %6128 = vrot.lane.b32.xlu1 %v7649_v34, %s7121_s28 }
  0x88   : > { %6123 = vrot.lane.b32.xlu0 %v7653_v38, %s7121_s28 }
  0x89   : > { %5741 = vmatpush3.bf16.msra.mxu1 %v6997_v57 }
  0x8a   : > { %5742 = vmatprep.subr.bf16.mxu1 %v6998_v59 }
  0x8b   : > { %6138 = vrot.lane.b32.xlu1 %v7662_v50, %s7120_s20 }
  0x8c   : > { %6133 = vrot.lane.b32.xlu0 %v7666_v56, %s7120_s20 }
  0x8d   : > { %5743 = vmatpush3.bf16.msra.mxu1 %v6998_v59 }
  0x8f   : > { %6148 = vrot.lane.b32.xlu1 %v7677_v55, %s7121_s28 }
  0x90   : > { %6143 = vrot.lane.b32.xlu0 %v7681_v25, %s7121_s28 }
  0x93   : > { %6158 = vrot.lane.b32.xlu1 %v6157_v63, %s7120_s20  ;;  %v505_v63 = vld [vmem:[#allocation2 + $0x1] sm:$0xff] }
  0x94   : > { %6153 = vrot.lane.b32.xlu0 %v7690_v61, %s7120_s20  ;;  %v6182_v21 = vpack.i.bf16 %v506_v39, %v505_v63 }
  0x97   : > { %6168 = vrot.lane.b32.xlu1 %v6167_v22, %s7121_s28  ;;  %v538_v22 = vld [vmem:[#allocation2 + $0xa] sm:$0xff] }
  0x98   : > { %6163 = vrot.lane.b32.xlu0 %v7698_v27, %s7121_s28  ;;  %v6192_v26 = vpack.i.bf16 %v538_v22, %v537_v52 }
  0x9b   : > { %6178 = vrot.lane.b32.xlu1 %v6177_v24, %s7120_s20 }
  0x9c   : > { %6173 = vrot.lane.b32.xlu0 %v7706_v62, %s7120_s20 }
  0x9f   : > { %6188 = vrot.lane.b32.xlu1 %v7515_v32, %s7121_s28 }
  0xa0   : > { %6183 = vrot.lane.b32.xlu0 %v6182_v21, %s7121_s28 }
  0xa3   : > { %6198 = vrot.lane.b32.xlu1 %v7513_v28, %s7120_s20 }
  0xa4   : > { %6193 = vrot.lane.b32.xlu0 %v6192_v26, %s7120_s20 }
  0xa7   : > { %6208 = vrot.lane.b32.xlu1 %v7531_v42, %s7121_s28 }
  0xa8   : > { %6203 = vrot.lane.b32.xlu0 %v7523_v36, %s7121_s28 }
  0xab   : > { %6218 = vrot.lane.b32.xlu1 %v7539_v48, %s7120_s20 }
  0xac   : > { %6213 = vrot.lane.b32.xlu0 %v7519_v35, %s7120_s20 }
  0xaf   : > { %6228 = vrot.lane.b32.xlu1 %v7531_v42, %s7121_s28 }
  0xb0   : > { %6223 = vrot.lane.b32.xlu0 %v7523_v36, %s7121_s28  ;;  %v7764_v36 = vld [vmem:[#allocation2 + $0x18] sm:$0xff] }
  0xb3   : > { %6238 = vrot.lane.b32.xlu1 %v7539_v48, %s7120_s20 }
  0xb4   : > { %6233 = vrot.lane.b32.xlu0 %v7519_v35, %s7120_s20 }
  0xb7   : > { %6248 = vrot.lane.b32.xlu1 %v7547_v58, %s7121_s28 }
  0xb8   : > { %6243 = vrot.lane.b32.xlu0 %v7527_v41, %s7121_s28 }
  0xbb   : > { %6258 = vrot.lane.b32.xlu1 %v7595_v37, %s7120_s20 }
  0xbc   : > { %6253 = vrot.lane.b32.xlu0 %v7535_v47, %s7120_s20 }
  0xbf   : > { %6268 = vrot.lane.b32.xlu1 %v7547_v58, %s7121_s28 }
  0xc0   : > { %6263 = vrot.lane.b32.xlu0 %v7527_v41, %s7121_s28  ;;  %v7766_v41 = vld [vmem:[#allocation2 + $0x20] sm:$0xff] }
  0xc3   : > { %6278 = vrot.lane.b32.xlu1 %v7595_v37, %s7120_s20 }
  0xc4   : > { %6273 = vrot.lane.b32.xlu0 %v7535_v47, %s7120_s20 }
  0xc7   : > { %6288 = vrot.lane.b32.xlu1 %v7609_v43, %s7121_s28 }
  0xc8   : > { %6283 = vrot.lane.b32.xlu0 %v7543_v54, %s7121_s28 }
  0xcb   : > { %6298 = vrot.lane.b32.xlu1 %v7620_v53, %s7120_s20 }
  0xcc   : > { %6293 = vrot.lane.b32.xlu0 %v7587_v30, %s7120_s20 }
  0xcf   : > { %6308 = vrot.lane.b32.xlu1 %v7609_v43, %s7121_s28 }
  0xd0   : > { %6303 = vrot.lane.b32.xlu0 %v7543_v54, %s7121_s28 }
  0xd1   : > { %v6034_v24 = vpop.permute.xlu1 %6033 }
  0xd2   : > { %v6036_v28 = vunpack.i.h.bf16 %v6034_v24  ;;  %v6035_v32 = vunpack.i.l.bf16 %v6034_v24  ;;  %v6024_v35 = vpop.permute.xlu0 %6023 }
  0xd3   : > { %v6026_v42 = vunpack.i.h.bf16 %v6024_v35  ;;  %v6025_v47 = vunpack.i.l.bf16 %v6024_v35  ;;  %6318 = vrot.lane.b32.xlu1 %v7620_v53, %s7120_s20  ;;  %v6989_v35 = vld [vmem:[%s9719_s1 + $0x80] sm:$0xff]  }
  0xd4   : > { %6313 = vrot.lane.b32.xlu0 %v7587_v30, %s7120_s20 }
  0xd5   : > { %v6039_v48 = vpop.permute.xlu1 %6038  ;;  %v1270_v54 = vsel %vm384_vm0, %v7764_v36, %v6025_v47  ;;  %v1271_v58 = vsel %vm384_vm0, %v7766_v41, %v6026_v42  ;;  %v7798_v42 = vld [vmem:[#allocation2 + $0x60] sm:$0xff]  ;;  %v7800_v47 = vld [vmem:[#allocation2 + $0x68] sm:$0xff] }
  0xd6   : > { %v6041_v37 = vunpack.i.h.bf16 %v6039_v48  ;;  %v6040_v43 = vunpack.i.l.bf16 %v6039_v48  ;;  %v6029_v60 = vpop.permute.xlu0 %6028  ;;  %v1302_v53 = vsel %vm857_vm2, %v1270_v54, %v6035_v32  ;;  %v1303_v45 = vsel %vm857_vm2, %v1271_v58, %v6036_v28  ;;  %v7804_v58 = vld [vmem:[#allocation2 + $0x48] sm:$0xff] }
  0xd7   : > { %v6031_v30 = vunpack.i.h.bf16 %v6029_v60  ;;  %v6030_v57 = vunpack.i.l.bf16 %v6029_v60  ;;  %v1334_v63 = vpack.c.bf16 %v1303_v45, %v1302_v53  ;;  %6328 = vrot.lane.b32.xlu1 %v7631_v33, %s7121_s28 }
  0xd8   : > { %6323 = vrot.lane.b32.xlu0 %v7605_v40, %s7121_s28 }
  0xd9   : > { %v1273_v39 = vsel %vm384_vm0, %v7778_v44, %v6031_v30  ;;  %v1272_v59 = vsel %vm384_vm0, %v7776_v29, %v6030_v57  ;;  %5700 = vmatprep.mubr.msk.bf16.mxu0 %vm1399_vm3, %v1334_v63  ;;  %v6049_v52 = vpop.permute.xlu1 %6048 }
  0xda   : > { %v6044_v21 = vpop.permute.xlu0 %6043  ;;  %v1304_v22 = vsel %vm857_vm2, %v1272_v59, %v6040_v43  ;;  %v1305_v26 = vsel %vm857_vm2, %v1273_v39, %v6041_v37  ;;  %v6051_v24 = vunpack.i.h.bf16 %v6049_v52  ;;  %v6050_v28 = vunpack.i.l.bf16 %v6049_v52  ;;  %v7806_v37 = vld [vmem:[#allocation2 + $0x50] sm:$0xff]  ;;  %v6990_v59 = vld [vmem:[%s9719_s1 + $0x78] sm:$0xff]  }
  0xdb   : > { %v1335_v32 = vpack.c.bf16 %v1305_v26, %v1304_v22  ;;  %6338 = vrot.lane.b32.xlu1 %v7642_v46, %s7120_s20  ;;  %v6046_v48 = vunpack.i.h.bf16 %v6044_v21  ;;  %v6045_v54 = vunpack.i.l.bf16 %v6044_v21 }
  0xdc   : > { %6333 = vrot.lane.b32.xlu0 %v7616_v51, %s7120_s20  ;;  %v1277_v30 = vsel %vm384_vm0, %v7800_v47, %v6051_v24  ;;  %v1276_v57 = vsel %vm384_vm0, %v7798_v42, %v6050_v28 }
  0xdd   : > { %5701 = vmatmul.mubr.msk.bf16.vlgmr.msra.gmra.mxu0 %vm1399_vm3, %v1335_v32  ;;  %v6059_v43 = vpop.permute.xlu1 %6058  ;;  %v1275_v52 = vsel %vm384_vm0, %v7806_v37, %v6046_v48 }
  0xde   : > { %v6061_v60 = vunpack.i.h.bf16 %v6059_v43  ;;  %v6060_v53 = vunpack.i.l.bf16 %v6059_v43  ;;  %v6054_v45 = vpop.permute.xlu0 %6053  ;;  %5777 = vmatpush3.bf16.msra.mxu0 %v7658_v0  ;;  %v1274_v0 = vsel %vm384_vm0, %v7804_v58, %v6045_v54  ;;  %v6991_v54 = vld [vmem:[%s9719_s1 + $0x70] sm:$0xff]  }
  0xdf   : > { %v6056_v63 = vunpack.i.h.bf16 %v6054_v45  ;;  %v6055_v39 = vunpack.i.l.bf16 %v6054_v45  ;;  %6348 = vrot.lane.b32.xlu1 %v7631_v33, %s7121_s28  ;;  %5778 = vmatprep.subr.bf16.mxu0 %v6989_v35 }
  0xe0   : > { %v1308_v21 = vsel %vm857_vm2, %v1276_v57, %v6060_v53  ;;  %v1309_v22 = vsel %vm857_vm2, %v1277_v30, %v6061_v60  ;;  %6343 = vrot.lane.b32.xlu0 %v7605_v40, %s7121_s28  ;;  %v7834_v40 = vld [vmem:[#allocation2 + $0x90] sm:$0xff]  ;;  %v7836_v60 = vld [vmem:[#allocation2 + $0x98] sm:$0xff]  ;;  %v7843_v57 = vld [vmem:[#allocation2 + $0x80] sm:$0xff] }
  0xe1   : > { %v1306_v33 = vsel %vm857_vm2, %v1274_v0, %v6055_v39  ;;  %v1307_v26 = vsel %vm857_vm2, %v1275_v52, %v6056_v63  ;;  %v6069_v24 = vpop.permute.xlu1 %6068  ;;  %v1337_v28 = vpack.c.bf16 %v1309_v22, %v1308_v21 }
  0xe2   : > { %v6064_v32 = vpop.permute.xlu0 %6063  ;;  %v1336_v43 = vpack.c.bf16 %v1307_v26, %v1306_v33  ;;  %5779 = vmatpush3.bf16.msra.mxu0 %v6989_v35  ;;  %v6071_v48 = vunpack.i.h.bf16 %v6069_v24  ;;  %v6070_v45 = vunpack.i.l.bf16 %v6069_v24  ;;  %v7841_v35 = vld [vmem:[#allocation2 + $0x78] sm:$0xff]  ;;  %v6995_v33 = vld [vmem:[%s9719_s1 + $0x68] sm:$0xff]  }
  0xe3   : > { %6358 = vrot.lane.b32.xlu1 %v7642_v46, %s7120_s20  ;;  %5780 = vmatprep.subr.bf16.mxu0 %v6990_v59  ;;  %v6066_v53 = vunpack.i.h.bf16 %v6064_v32  ;;  %v6065_v30 = vunpack.i.l.bf16 %v6064_v32 }
  0xe4   : > { %6353 = vrot.lane.b32.xlu0 %v7616_v51, %s7120_s20  ;;  %5704 = vmatprep.mubr.msk.bf16.mxu0 %vm1399_vm3, %v1336_v43  ;;  %v1281_v0 = vsel %vm384_vm0, %v7836_v60, %v6071_v48  ;;  %v1280_v21 = vsel %vm384_vm0, %v7834_v40, %v6070_v45 }
  0xe5   : > { %5705 = vmatmul.mubr.msk.bf16.gmra.mxu0 %vm1399_vm3, %v1337_v28  ;;  %v6079_v46 = vpop.permute.xlu1 %6078  ;;  %v1279_v26 = vsel %vm384_vm0, %v7843_v57, %v6066_v53 }
  0xe6   : > { %v6081_v63 = vunpack.i.h.bf16 %v6079_v46  ;;  %v6080_v39 = vunpack.i.l.bf16 %v6079_v46  ;;  %v6074_v52 = vpop.permute.xlu0 %6073  ;;  %5781 = vmatpush3.bf16.msra.mxu0 %v6990_v59  ;;  %v1278_v59 = vsel %vm384_vm0, %v7841_v35, %v6065_v30  ;;  %v6999_v30 = vld [vmem:[%s9719_s1 + $0x60] sm:$0xff]  }
  0xe7   : > { %v6076_v51 = vunpack.i.h.bf16 %v6074_v52  ;;  %v6075_v22 = vunpack.i.l.bf16 %v6074_v52  ;;  %6368 = vrot.lane.b32.xlu1 %v7653_v38, %s7121_s28  ;;  %5782 = vmatprep.subr.bf16.mxu0 %v6991_v54 }
  0xe8   : > { %v1312_v24 = vsel %vm857_vm2, %v1280_v21, %v6080_v39  ;;  %v1313_v28 = vsel %vm857_vm2, %v1281_v0, %v6081_v63  ;;  %6363 = vrot.lane.b32.xlu0 %v7627_v31, %s7121_s28  ;;  %v7870_v63 = vld [vmem:[#allocation2 + $0xc0] sm:$0xff]  ;;  %v7872_v39 = vld [vmem:[#allocation2 + $0xc8] sm:$0xff] }
  0xe9   : > { %v1310_v32 = vsel %vm857_vm2, %v1278_v59, %v6075_v22  ;;  %v1311_v43 = vsel %vm857_vm2, %v1279_v26, %v6076_v51  ;;  %v6089_v48 = vpop.permute.xlu1 %6088  ;;  %v1339_v45 = vpack.c.bf16 %v1313_v28, %v1312_v24  ;;  %v7879_v51 = vld [vmem:[#allocation2 + $0xb0] sm:$0xff] }
  0xea   : > { %v6084_v46 = vpop.permute.xlu0 %6083  ;;  %v1338_v52 = vpack.c.bf16 %v1311_v43, %v1310_v32  ;;  %5783 = vmatpush3.bf16.msra.mxu0 %v6991_v54  ;;  %v6091_v53 = vunpack.i.h.bf16 %v6089_v48  ;;  %v6090_v23 = vunpack.i.l.bf16 %v6089_v48  ;;  %v7877_v54 = vld [vmem:[#allocation2 + $0xa8] sm:$0xff] }
  0xeb   : > { %6378 = vrot.lane.b32.xlu1 %v7666_v56, %s7120_s20  ;;  %5784 = vmatprep.subr.bf16.mxu0 %v6995_v33  ;;  %v6086_v0 = vunpack.i.h.bf16 %v6084_v46  ;;  %v6085_v21 = vunpack.i.l.bf16 %v6084_v46 }
  0xec   : > { %6373 = vrot.lane.b32.xlu0 %v7638_v49, %s7120_s20  ;;  %5708 = vmatprep.mubr.msk.bf16.mxu0 %vm1399_vm3, %v1338_v52  ;;  %v1285_v28 = vsel %vm384_vm0, %v7872_v39, %v6091_v53  ;;  %v1284_v32 = vsel %vm384_vm0, %v7870_v63, %v6090_v23 }
  0xed   : > { %5709 = vmatmul.mubr.msk.bf16.gmra.mxu0 %vm1399_vm3, %v1339_v45  ;;  %v6099_v22 = vpop.permute.xlu1 %6098  ;;  %v1283_v45 = vsel %vm384_vm0, %v7879_v51, %v6086_v0  ;;  %v1282_v46 = vsel %vm384_vm0, %v7877_v54, %v6085_v21  ;;  %v7900_v21 = vld [vmem:[#allocation2 + $0xf0] sm:$0xff] }
  0xee   : > { %v6101_v26 = vunpack.i.h.bf16 %v6099_v22  ;;  %v6100_v59 = vunpack.i.l.bf16 %v6099_v22  ;;  %v6094_v24 = vpop.permute.xlu0 %6093  ;;  %5785 = vmatpush3.bf16.msra.mxu0 %v6995_v33 }
  0xef   : > { %v6096_v43 = vunpack.i.h.bf16 %v6094_v24  ;;  %v6095_v48 = vunpack.i.l.bf16 %v6094_v24  ;;  %6388 = vrot.lane.b32.xlu1 %v7653_v38, %s7121_s28  ;;  %5786 = vmatprep.subr.bf16.mxu0 %v6999_v30 }
  0xf0   : > { %v1316_v33 = vsel %vm857_vm2, %v1284_v32, %v6100_v59  ;;  %v1317_v52 = vsel %vm857_vm2, %v1285_v28, %v6101_v26  ;;  %6383 = vrot.lane.b32.xlu0 %v7627_v31, %s7121_s28  ;;  %v7902_v26 = vld [vmem:[#allocation2 + $0xf8] sm:$0xff]  ;;  %v7909_v32 = vld [vmem:[#allocation2 + $0xe0] sm:$0xff] }
  0xf1   : > { %v1314_v23 = vsel %vm857_vm2, %v1282_v46, %v6095_v48  ;;  %v1315_v53 = vsel %vm857_vm2, %v1283_v45, %v6096_v43  ;;  %v6109_v22 = vpop.permute.xlu1 %6108  ;;  %v1341_v38 = vpack.c.bf16 %v1317_v52, %v1316_v33  ;;  %v7907_v28 = vld [vmem:[#allocation2 + $0xd8] sm:$0xff] }
  0xf2   : > { %v6104_v24 = vpop.permute.xlu0 %6103  ;;  %v1340_v18 = vpack.c.bf16 %v1315_v53, %v1314_v23  ;;  %5787 = vmatpush3.bf16.msra.mxu0 %v6999_v30  ;;  %v6111_v0 = vunpack.i.h.bf16 %v6109_v22  ;;  %v6110_v17 = vunpack.i.l.bf16 %v6109_v22 }
  0xf3   : > { %6398 = vrot.lane.b32.xlu1 %v7666_v56, %s7120_s20  ;;  %v6106_v59 = vunpack.i.h.bf16 %v6104_v24  ;;  %v6105_v31 = vunpack.i.l.bf16 %v6104_v24 }
  0xf4   : > { %6393 = vrot.lane.b32.xlu0 %v7638_v49, %s7120_s20  ;;  %5712 = vmatprep.mubr.msk.bf16.mxu0 %vm1399_vm3, %v1340_v18  ;;  %v1289_v45 = vsel %vm384_vm0, %v7902_v26, %v6111_v0  ;;  %v1288_v46 = vsel %vm384_vm0, %v7900_v21, %v6110_v17 }
  0xf5   : > { %5713 = vmatmul.mubr.msk.bf16.gmra.mxu0 %vm1399_vm3, %v1341_v38  ;;  %v6119_v30 = vpop.permute.xlu1 %6118  ;;  %v1287_v18 = vsel %vm384_vm0, %v7909_v32, %v6106_v59  ;;  %v1286_v52 = vsel %vm384_vm0, %v7907_v28, %v6105_v31  ;;  %v940_v31 = vld [vmem:[#allocation2 + $0x120] sm:$0xff] }
  0xf6   : > { %v6121_v43 = vunpack.i.h.bf16 %v6119_v30  ;;  %v6120_v56 = vunpack.i.l.bf16 %v6119_v30  ;;  %v6114_v48 = vpop.permute.xlu0 %6113 }
  0xf7   : > { %v6116_v33 = vunpack.i.h.bf16 %v6114_v48  ;;  %v6115_v49 = vunpack.i.l.bf16 %v6114_v48  ;;  %6408 = vrot.lane.b32.xlu1 %v7681_v25, %s7121_s28 }
  0xf8   : > { %v1320_v23 = vsel %vm857_vm2, %v1288_v46, %v6120_v56  ;;  %v1321_v53 = vsel %vm857_vm2, %v1289_v45, %v6121_v43  ;;  %6403 = vrot.lane.b32.xlu0 %v7649_v34, %s7121_s28  ;;  %v941_v56 = vld [vmem:[#allocation2 + $0x128] sm:$0xff] }
  0xf9   : > { %v1318_v17 = vsel %vm857_vm2, %v1286_v52, %v6115_v49  ;;  %v1319_v22 = vsel %vm857_vm2, %v1287_v18, %v6116_v33  ;;  %v6129_v38 = vpop.permute.xlu1 %6128  ;;  %v1343_v24 = vpack.c.bf16 %v1321_v53, %v1320_v23  ;;  %v7933_v45 = vld [vmem:[#allocation2 + $0x108] sm:$0xff]  ;;  %v7935_v33 = vld [vmem:[#allocation2 + $0x110] sm:$0xff] }
  0xfa   : > { %v6124_v0 = vpop.permute.xlu0 %6123  ;;  %v1342_v30 = vpack.c.bf16 %v1319_v22, %v1318_v17  ;;  %v6131_v48 = vunpack.i.h.bf16 %v6129_v38  ;;  %v6130_v59 = vunpack.i.l.bf16 %v6129_v38 }
  0xfb   : > { %6418 = vrot.lane.b32.xlu1 %v7690_v61, %s7120_s20  ;;  %v6126_v46 = vunpack.i.h.bf16 %v6124_v0  ;;  %v6125_v43 = vunpack.i.l.bf16 %v6124_v0 }
  0xfc   : > { %6413 = vrot.lane.b32.xlu0 %v7662_v50, %s7120_s20  ;;  %5716 = vmatprep.mubr.msk.bf16.mxu0 %vm1399_vm3, %v1342_v30  ;;  %v1293_v53 = vsel %vm384_vm0, %v941_v56, %v6131_v48  ;;  %v1292_v17 = vsel %vm384_vm0, %v940_v31, %v6130_v59 }
  0xfd   : > { %5717 = vmatmul.mubr.msk.bf16.gmra.mxu0 %vm1399_vm3, %v1343_v24  ;;  %v6139_v49 = vpop.permute.xlu1 %6138  ;;  %v1291_v0 = vsel %vm384_vm0, %v7935_v33, %v6126_v46  ;;  %v1290_v30 = vsel %vm384_vm0, %v7933_v45, %v6125_v43  ;;  %v1943_v43 = vld [vmem:[#allocation2 + $0x152] sm:$0xff] }
  0xfe   : > { %v6141_v18 = vunpack.i.h.bf16 %v6139_v49  ;;  %v6140_v52 = vunpack.i.l.bf16 %v6139_v49  ;;  %v6134_v23 = vpop.permute.xlu0 %6133 }
  0xff   : > { %v6136_v22 = vunpack.i.h.bf16 %v6134_v23  ;;  %v6135_v38 = vunpack.i.l.bf16 %v6134_v23  ;;  %6428 = vrot.lane.b32.xlu1 %v7681_v25, %s7121_s28 }
 0x100   : > { %v1324_v24 = vsel %vm857_vm2, %v1292_v17, %v6140_v52  ;;  %v1325_v49 = vsel %vm857_vm2, %v1293_v53, %v6141_v18  ;;  %6423 = vrot.lane.b32.xlu0 %v7649_v34, %s7121_s28  ;;  %v1944_v52 = vld [vmem:[#allocation2 + $0x15a] sm:$0xff]  ;;  %v944_v17 = vld [vmem:[#allocation2 + $0x150] sm:$0xff] }
 0x101   : > { %v1322_v48 = vsel %vm857_vm2, %v1290_v30, %v6135_v38  ;;  %v1323_v59 = vsel %vm857_vm2, %v1291_v0, %v6136_v22  ;;  %v6149_v31 = vpop.permute.xlu1 %6148  ;;  %v1345_v56 = vpack.c.bf16 %v1325_v49, %v1324_v24  ;;  %v945_v18 = vld [vmem:[#allocation2 + $0x158] sm:$0xff]  ;;  %v7959_v22 = vld [vmem:[#allocation2 + $0x140] sm:$0xff]  ;;  %v7962_v24 = vpack.i.bf16 %v1944_v52, %v1943_v43 }
 0x102   : > { %v6144_v25 = vpop.permute.xlu0 %6143  ;;  %v1344_v23 = vpack.c.bf16 %v1323_v59, %v1322_v48  ;;  %v6151_v20 = vunpack.i.h.bf16 %v6149_v31  ;;  %v6150_v46 = vunpack.i.l.bf16 %v6149_v31  ;;  %v7957_v34 = vld [vmem:[#allocation2 + $0x138] sm:$0xff] }
 0x103   : > { %6438 = vrot.lane.b32.xlu1 %v7690_v61, %s7120_s20  ;;  %v6146_v53 = vunpack.i.h.bf16 %v6144_v25  ;;  %v6145_v19 = vunpack.i.l.bf16 %v6144_v25 }
 0x104   : > { %6433 = vrot.lane.b32.xlu0 %v7662_v50, %s7120_s20  ;;  %5720 = vmatprep.mubr.msk.bf16.mxu0 %vm1399_vm3, %v1344_v23  ;;  %v1297_v49 = vsel %vm384_vm0, %v945_v18, %v6151_v20  ;;  %v1296_v48 = vsel %vm384_vm0, %v944_v17, %v6150_v46  ;;  %v535_v20 = vld [vmem:[#allocation2 + $0x169] sm:$0xff]  ;;  %v536_v46 = vld [vmem:[#allocation2 + $0x171] sm:$0xff] }
 0x105   : > { %5721 = vmatmul.mubr.msk.bf16.gmra.mxu0 %vm1399_vm3, %v1345_v56  ;;  %v6159_v38 = vpop.permute.xlu1 %6158  ;;  %v1295_v31 = vsel %vm384_vm0, %v7959_v22, %v6146_v53  ;;  %v1294_v56 = vsel %vm384_vm0, %v7957_v34, %v6145_v19  ;;  %v533_v18 = vld [vmem:[#allocation2 + $0x151] sm:$0xff]  ;;  %v534_v53 = vld [vmem:[#allocation2 + $0x159] sm:$0xff] }
 0x106   : > { %v6161_v0 = vunpack.i.h.bf16 %v6159_v38  ;;  %v6160_v61 = vunpack.i.l.bf16 %v6159_v38  ;;  %v6154_v30 = vpop.permute.xlu0 %6153 }
 0x107   : > { %v6156_v59 = vunpack.i.h.bf16 %v6154_v30  ;;  %v6155_v50 = vunpack.i.l.bf16 %v6154_v30  ;;  %6448 = vrot.lane.b32.xlu1 %v7698_v27, %s7121_s28 }
 0x108   : > { %v1328_v25 = vsel %vm857_vm2, %v1296_v48, %v6160_v61  ;;  %v1329_v23 = vsel %vm857_vm2, %v1297_v49, %v6161_v0  ;;  %6443 = vrot.lane.b32.xlu0 %v7677_v55, %s7121_s28  ;;  %v6467_v0 = vpack.i.bf16 %v536_v46, %v535_v20  ;;  %v567_v61 = vld [vmem:[#allocation2 + $0x16a] sm:$0xff]  ;;  %v568_v55 = vld [vmem:[#allocation2 + $0x172] sm:$0xff]  ;;  %v948_v49 = vld [vmem:[#allocation2 + $0x180] sm:$0xff] }
 0x109   : > { %v1326_v43 = vsel %vm857_vm2, %v1294_v56, %v6155_v50  ;;  %v1327_v52 = vsel %vm857_vm2, %v1295_v31, %v6156_v59  ;;  %v6169_v27 = vpop.permute.xlu1 %6168  ;;  %v1347_v17 = vpack.c.bf16 %v1329_v23, %v1328_v25  ;;  %v949_v48 = vld [vmem:[#allocation2 + $0x188] sm:$0xff]  ;;  %v6462_v59 = vpack.i.bf16 %v534_v53, %v533_v18  ;;  %v7985_v56 = vld [vmem:[#allocation2 + $0x170] sm:$0xff] }
 0x10a   : > { %v6164_v38 = vpop.permute.xlu0 %6163  ;;  %v1346_v30 = vpack.c.bf16 %v1327_v52, %v1326_v43  ;;  %v6171_v19 = vunpack.i.h.bf16 %v6169_v27  ;;  %v6170_v14 = vunpack.i.l.bf16 %v6169_v27  ;;  %v7983_v31 = vld [vmem:[#allocation2 + $0x168] sm:$0xff]  ;;  %v6477_v46 = vpack.i.bf16 %v568_v55, %v567_v61  ;;  %v1917_v61 = vld [vmem:[#allocation2 + $0x199] sm:$0xff] }
 0x10b   : > { %6458 = vrot.lane.b32.xlu1 %v7706_v62, %s7120_s20  ;;  %v6166_v13 = vunpack.i.h.bf16 %v6164_v38  ;;  %v6165_v50 = vunpack.i.l.bf16 %v6164_v38 }
 0x10c   : > { %6453 = vrot.lane.b32.xlu0 %v7962_v24, %s7120_s20  ;;  %5724 = vmatprep.mubr.msk.bf16.mxu0 %vm1399_vm3, %v1346_v30  ;;  %v1301_v43 = vsel %vm384_vm0, %v949_v48, %v6171_v19  ;;  %v1300_v52 = vsel %vm384_vm0, %v948_v49, %v6170_v14  ;;  %v1918_v19 = vld [vmem:[#allocation2 + $0x1a1] sm:$0xff] }
 0x10d   : > { %5725 = vmatmul.mubr.msk.bf16.gmra.mxu0 %vm1399_vm3, %v1347_v17  ;;  %v6179_v62 = vpop.permute.xlu1 %6178  ;;  %v1299_v18 = vsel %vm384_vm0, %v7985_v56, %v6166_v13  ;;  %v1298_v53 = vsel %vm384_vm0, %v7983_v31, %v6165_v50  ;;  %v1915_v48 = vld [vmem:[#allocation2 + $0x181] sm:$0xff] }
 0x10e   : > { %v6181_v25 = vunpack.i.h.bf16 %v6179_v62  ;;  %v6180_v23 = vunpack.i.l.bf16 %v6179_v62  ;;  %v6174_v20 = vpop.permute.xlu0 %6173  ;;  %v1916_v62 = vld [vmem:[#allocation2 + $0x189] sm:$0xff] }
 0x10f   : > { %v6176_v27 = vunpack.i.h.bf16 %v6174_v20  ;;  %v6175_v38 = vunpack.i.l.bf16 %v6174_v20  ;;  %6468 = vrot.lane.b32.xlu1 %v6467_v0, %s7121_s28 }
 0x110   : > { %v1332_v17 = vsel %vm857_vm2, %v1300_v52, %v6180_v23  ;;  %v1333_v30 = vsel %vm857_vm2, %v1301_v43, %v6181_v25  ;;  %6463 = vrot.lane.b32.xlu0 %v6462_v59, %s7121_s28  ;;  %v6487_v25 = vpack.i.bf16 %v1918_v19, %v1917_v61  ;;  %v1948_v23 = vld [vmem:[#allocation2 + $0x18a] sm:$0xff]  ;;  %v1949_v59 = vld [vmem:[#allocation2 + $0x19a] sm:$0xff]  ;;  %v1950_v43 = vld [vmem:[#allocation2 + $0x1a2] sm:$0xff] }
 0x111   : > { %v1330_v14 = vsel %vm857_vm2, %v1298_v53, %v6175_v38  ;;  %v1331_v55 = vsel %vm857_vm2, %v1299_v18, %v6176_v27  ;;  %v6189_v49 = vpop.permute.xlu1 %6188  ;;  %v1349_v0 = vpack.c.bf16 %v1333_v30, %v1332_v17  ;;  %v6482_v27 = vpack.i.bf16 %v1916_v62, %v1915_v48  ;;  %v473_v18 = vld [vmem:[#allocation2] sm:$0xff]  ;;  %v474_v53 = vld [vmem:[#allocation2 + $0x8] sm:$0xff] }
 0x112   : > { %v6184_v13 = vpop.permute.xlu0 %6183  ;;  %v1348_v20 = vpack.c.bf16 %v1331_v55, %v1330_v14  ;;  %v6191_v50 = vunpack.i.h.bf16 %v6189_v49  ;;  %v6190_v15 = vunpack.i.l.bf16 %v6189_v49  ;;  %v6492_v61 = vpack.i.bf16 %v1948_v23, %v1947_v16 }
 0x113   : > { %6478 = vrot.lane.b32.xlu1 %v6477_v46, %s7120_s20  ;;  %v6186_v52 = vunpack.i.h.bf16 %v6184_v13  ;;  %v6185_v10 = vunpack.i.l.bf16 %v6184_v13  ;;  %v6497_v19 = vpack.i.bf16 %v1950_v43, %v1949_v59 }
 0x114   : > { %6473 = vrot.lane.b32.xlu0 %v7962_v24, %s7120_s20  ;;  %5728 = vmatprep.mubr.msk.bf16.mxu0 %vm1399_vm3, %v1348_v20  ;;  %v827_v14 = vsel %vm384_vm0, %v7764_v36, %v6190_v15  ;;  %v828_v55 = vsel %vm384_vm0, %v7766_v41, %v6191_v50 }
 0x115   : > { %5729 = vmatmul.mubr.msk.bf16.gmra.mxu0 %vm1399_vm3, %v1349_v0  ;;  %v6199_v38 = vpop.permute.xlu1 %6198  ;;  %v825_v62 = vsel %vm384_vm0, %v473_v18, %v6185_v10  ;;  %v826_v16 = vsel %vm384_vm0, %v474_v53, %v6186_v52 }
 0x116   : > { %v6194_v17 = vpop.permute.xlu0 %6193  ;;  %v6201_v30 = vunpack.i.h.bf16 %v6199_v38  ;;  %v6200_v46 = vunpack.i.l.bf16 %v6199_v38 }
 0x117   : > { %v6196_v24 = vunpack.i.h.bf16 %v6194_v17  ;;  %v6195_v49 = vunpack.i.l.bf16 %v6194_v17  ;;  %6488 = vrot.lane.b32.xlu1 %v6487_v25, %s7121_s28 }
 0x118   : > { %v860_v0 = vsel %vm857_vm2, %v827_v14, %v6200_v46  ;;  %v861_v48 = vsel %vm857_vm2, %v828_v55, %v6201_v30  ;;  %6483 = vrot.lane.b32.xlu0 %v6482_v27, %s7121_s28 }
 0x119   : > { %v6209_v13 = vpop.permute.xlu1 %6208  ;;  %v858_v15 = vsel %vm857_vm2, %v825_v62, %v6195_v49  ;;  %v859_v36 = vsel %vm857_vm2, %v826_v16, %v6196_v24  ;;  %v891_v41 = vpack.c.bf16 %v861_v48, %v860_v0 }
 0x11a   : > { %v6204_v20 = vpop.permute.xlu0 %6203  ;;  %v890_v50 = vpack.c.bf16 %v859_v36, %v858_v15  ;;  %v6211_v23 = vunpack.i.h.bf16 %v6209_v13  ;;  %v6210_v25 = vunpack.i.l.bf16 %v6209_v13 }
 0x11b   : > { %6498 = vrot.lane.b32.xlu1 %v6497_v19, %s7120_s20  ;;  %v6206_v59 = vunpack.i.h.bf16 %v6204_v20  ;;  %v6205_v43 = vunpack.i.l.bf16 %v6204_v20 }
 0x11c   : > { %6493 = vrot.lane.b32.xlu0 %v6492_v61, %s7120_s20  ;;  %5744 = vmatprep.mubr.msk.bf16.mxu1 %vm1399_vm3, %v890_v50  ;;  %v2210_v18 = vsel %vm384_vm0, %v7806_v37, %v6211_v23  ;;  %v2209_v53 = vsel %vm384_vm0, %v7804_v58, %v6210_v25 }
 0x11d   : > { %5745 = vmatmul.mubr.msk.bf16.vlgmr.msra.gmra.mxu1 %vm1399_vm3, %v891_v41  ;;  %v6219_v10 = vpop.permute.xlu1 %6218  ;;  %v2208_v46 = vsel %vm384_vm0, %v7778_v44, %v6206_v59  ;;  %v2207_v61 = vsel %vm384_vm0, %v7776_v29, %v6205_v43 }
 0x11e   : > { %v6214_v52 = vpop.permute.xlu0 %6213  ;;  %v6221_v27 = vunpack.i.h.bf16 %v6219_v10  ;;  %v6220_v38 = vunpack.i.l.bf16 %v6219_v10 }
 0x11f   : > { %v6216_v17 = vunpack.i.h.bf16 %v6214_v52  ;;  %v6215_v30 = vunpack.i.l.bf16 %v6214_v52 }
 0x120   : > { %v2241_v19 = vsel %vm857_vm2, %v2209_v53, %v6220_v38  ;;  %v2242_v14 = vsel %vm857_vm2, %v2210_v18, %v6221_v27 }
 0x121   : > { %v2239_v55 = vsel %vm857_vm2, %v2207_v61, %v6215_v30  ;;  %v2240_v24 = vsel %vm857_vm2, %v2208_v46, %v6216_v17  ;;  %v2272_v49 = vpack.c.bf16 %v2242_v14, %v2241_v19  ;;  %v6229_v0 = vpop.permute.xlu1 %6228 }
 0x122   : > { %v6224_v48 = vpop.permute.xlu0 %6223  ;;  %v2271_v62 = vpack.c.bf16 %v2240_v24, %v2239_v55  ;;  %v6231_v16 = vunpack.i.h.bf16 %v6229_v0  ;;  %v6230_v13 = vunpack.i.l.bf16 %v6229_v0 }
 0x123   : > { %v6226_v15 = vunpack.i.h.bf16 %v6224_v48  ;;  %v6225_v36 = vunpack.i.l.bf16 %v6224_v48 }
 0x124   : > { %5788 = vmatprep.mubr.msk.bf16.mxu0 %vm1399_vm3, %v2271_v62  ;;  %v832_v25 = vsel %vm384_vm0, %v7806_v37, %v6231_v16  ;;  %v831_v59 = vsel %vm384_vm0, %v7804_v58, %v6230_v13 }
 0x125   : > { %5789 = vmatmul.mubr.msk.bf16.vlgmr.msra.gmra.mxu0 %vm1399_vm3, %v2272_v49  ;;  %v6239_v41 = vpop.permute.xlu1 %6238  ;;  %v830_v52 = vsel %vm384_vm0, %v7778_v44, %v6226_v15  ;;  %v829_v27 = vsel %vm384_vm0, %v7776_v29, %v6225_v36 }
 0x126   : > { %v6234_v20 = vpop.permute.xlu0 %6233  ;;  %v6241_v50 = vunpack.i.h.bf16 %v6239_v41  ;;  %v6240_v23 = vunpack.i.l.bf16 %v6239_v41 }
 0x127   : > { %v6236_v43 = vunpack.i.h.bf16 %v6234_v20  ;;  %v6235_v10 = vunpack.i.l.bf16 %v6234_v20 }
 0x128   : > { %v864_v38 = vsel %vm857_vm2, %v831_v59, %v6240_v23  ;;  %v865_v18 = vsel %vm857_vm2, %v832_v25, %v6241_v50 }
 0x129   : > { %v862_v53 = vsel %vm857_vm2, %v829_v27, %v6235_v10  ;;  %v863_v17 = vsel %vm857_vm2, %v830_v52, %v6236_v43  ;;  %v6249_v37 = vpop.permute.xlu1 %6248  ;;  %v893_v30 = vpack.c.bf16 %v865_v18, %v864_v38 }
 0x12a   : > { %v6244_v46 = vpop.permute.xlu0 %6243  ;;  %v892_v58 = vpack.c.bf16 %v863_v17, %v862_v53  ;;  %v6251_v61 = vunpack.i.h.bf16 %v6249_v37  ;;  %v6250_v19 = vunpack.i.l.bf16 %v6249_v37 }
 0x12b   : > { %v6246_v14 = vunpack.i.h.bf16 %v6244_v46  ;;  %v6245_v55 = vunpack.i.l.bf16 %v6244_v46 }
 0x12c   : > { %5748 = vmatprep.mubr.msk.bf16.mxu1 %vm1399_vm3, %v892_v58  ;;  %v2214_v0 = vsel %vm384_vm0, %v7843_v57, %v6251_v61  ;;  %v2213_v48 = vsel %vm384_vm0, %v7841_v35, %v6250_v19 }
 0x12d   : > { %5749 = vmatmul.mubr.msk.bf16.gmra.mxu1 %vm1399_vm3, %v893_v30  ;;  %v6259_v29 = vpop.permute.xlu1 %6258  ;;  %v2212_v13 = vsel %vm384_vm0, %v7800_v47, %v6246_v14  ;;  %v2211_v15 = vsel %vm384_vm0, %v7798_v42, %v6245_v55 }
 0x12e   : > { %v6254_v44 = vpop.permute.xlu0 %6253  ;;  %v6261_v24 = vunpack.i.h.bf16 %v6259_v29  ;;  %v6260_v49 = vunpack.i.l.bf16 %v6259_v29 }
 0x12f   : > { %v6256_v62 = vunpack.i.h.bf16 %v6254_v44  ;;  %v6255_v16 = vunpack.i.l.bf16 %v6254_v44 }
 0x130   : > { %v2245_v36 = vsel %vm857_vm2, %v2213_v48, %v6260_v49  ;;  %v2246_v41 = vsel %vm857_vm2, %v2214_v0, %v6261_v24 }
 0x131   : > { %v2243_v20 = vsel %vm857_vm2, %v2211_v15, %v6255_v16  ;;  %v2244_v50 = vsel %vm857_vm2, %v2212_v13, %v6256_v62  ;;  %v6269_v23 = vpop.permute.xlu1 %6268  ;;  %v2274_v25 = vpack.c.bf16 %v2246_v41, %v2245_v36 }
 0x132   : > { %v6264_v59 = vpop.permute.xlu0 %6263  ;;  %v6271_v43 = vunpack.i.h.bf16 %v6269_v23  ;;  %v6270_v10 = vunpack.i.l.bf16 %v6269_v23  ;;  %v2273_v52 = vpack.c.bf16 %v2244_v50, %v2243_v20 }
 0x133   : > { %v6266_v27 = vunpack.i.h.bf16 %v6264_v59  ;;  %v6265_v38 = vunpack.i.l.bf16 %v6264_v59 }
 0x134   : > { %5792 = vmatprep.mubr.msk.bf16.mxu0 %vm1399_vm3, %v2273_v52  ;;  %v836_v18 = vsel %vm384_vm0, %v7843_v57, %v6271_v43  ;;  %v835_v53 = vsel %vm384_vm0, %v7841_v35, %v6270_v10 }
 0x135   : > { %5793 = vmatmul.mubr.msk.bf16.gmra.mxu0 %vm1399_vm3, %v2274_v25  ;;  %v6279_v17 = vpop.permute.xlu1 %6278  ;;  %v834_v37 = vsel %vm384_vm0, %v7800_v47, %v6266_v27  ;;  %v833_v30 = vsel %vm384_vm0, %v7798_v42, %v6265_v38 }
 0x136   : > { %v6274_v46 = vpop.permute.xlu0 %6273  ;;  %v6281_v58 = vunpack.i.h.bf16 %v6279_v17  ;;  %v6280_v61 = vunpack.i.l.bf16 %v6279_v17 }
 0x137   : > { %v6276_v19 = vunpack.i.h.bf16 %v6274_v46  ;;  %v6275_v14 = vunpack.i.l.bf16 %v6274_v46 }
 0x138   : > { %v868_v55 = vsel %vm857_vm2, %v835_v53, %v6280_v61  ;;  %v869_v57 = vsel %vm857_vm2, %v836_v18, %v6281_v58 }
 0x139   : > { %v866_v35 = vsel %vm857_vm2, %v833_v30, %v6275_v14  ;;  %v867_v29 = vsel %vm857_vm2, %v834_v37, %v6276_v19  ;;  %v6289_v44 = vpop.permute.xlu1 %6288  ;;  %v895_v24 = vpack.c.bf16 %v869_v57, %v868_v55  ;;  %v486_v30 = vld [vmem:[#allocation2 + $0x98] sm:$0xff] }
 0x13a   : > { %v6284_v49 = vpop.permute.xlu0 %6283  ;;  %v6291_v47 = vunpack.i.h.bf16 %v6289_v44  ;;  %v6290_v0 = vunpack.i.l.bf16 %v6289_v44  ;;  %v894_v48 = vpack.c.bf16 %v867_v29, %v866_v35 }
 0x13b   : > { %v6286_v42 = vunpack.i.h.bf16 %v6284_v49  ;;  %v6285_v62 = vunpack.i.l.bf16 %v6284_v49 }
 0x13c   : > { %5752 = vmatprep.mubr.msk.bf16.mxu1 %vm1399_vm3, %v894_v48  ;;  %v2218_v16 = vsel %vm384_vm0, %v7879_v51, %v6291_v47  ;;  %v2217_v13 = vsel %vm384_vm0, %v7877_v54, %v6290_v0 }
 0x13d   : > { %5753 = vmatmul.mubr.msk.bf16.gmra.mxu1 %vm1399_vm3, %v895_v24  ;;  %v6299_v15 = vpop.permute.xlu1 %6298  ;;  %v2216_v36 = vsel %vm384_vm0, %v7836_v60, %v6286_v42  ;;  %v2215_v41 = vsel %vm384_vm0, %v7834_v40, %v6285_v62  ;;  %v485_v40 = vld [vmem:[#allocation2 + $0x90] sm:$0xff] }
 0x13e   : > { %v6294_v20 = vpop.permute.xlu0 %6293  ;;  %v6301_v50 = vunpack.i.h.bf16 %v6299_v15  ;;  %v6300_v23 = vunpack.i.l.bf16 %v6299_v15 }
 0x13f   : > { %v6296_v25 = vunpack.i.h.bf16 %v6294_v20  ;;  %v6295_v59 = vunpack.i.l.bf16 %v6294_v20 }
 0x140   : > { %v2249_v43 = vsel %vm857_vm2, %v2217_v13, %v6300_v23  ;;  %v2250_v10 = vsel %vm857_vm2, %v2218_v16, %v6301_v50 }
 0x141   : > { %v2247_v52 = vsel %vm857_vm2, %v2215_v41, %v6295_v59  ;;  %v2248_v27 = vsel %vm857_vm2, %v2216_v36, %v6296_v25  ;;  %v6309_v38 = vpop.permute.xlu1 %6308  ;;  %v2276_v18 = vpack.c.bf16 %v2250_v10, %v2249_v43 }
 0x142   : > { %v6304_v53 = vpop.permute.xlu0 %6303  ;;  %v6311_v60 = vunpack.i.h.bf16 %v6309_v38  ;;  %v6310_v17 = vunpack.i.l.bf16 %v6309_v38  ;;  %v2275_v37 = vpack.c.bf16 %v2248_v27, %v2247_v52 }
 0x143   : > { %v6306_v46 = vunpack.i.h.bf16 %v6304_v53  ;;  %v6305_v58 = vunpack.i.l.bf16 %v6304_v53 }
 0x144   : > { %5796 = vmatprep.mubr.msk.bf16.mxu0 %vm1399_vm3, %v2275_v37  ;;  %v840_v61 = vsel %vm384_vm0, %v7879_v51, %v6311_v60  ;;  %v839_v19 = vsel %vm384_vm0, %v7877_v54, %v6310_v17 }
 0x145   : > { %5797 = vmatmul.mubr.msk.bf16.gmra.mxu0 %vm1399_vm3, %v2276_v18  ;;  %v6319_v14 = vpop.permute.xlu1 %6318  ;;  %v838_v55 = vsel %vm384_vm0, %v486_v30, %v6306_v46  ;;  %v837_v57 = vsel %vm384_vm0, %v485_v40, %v6305_v58 }
 0x146   : > { %v6314_v35 = vpop.permute.xlu0 %6313  ;;  %v6321_v29 = vunpack.i.h.bf16 %v6319_v14  ;;  %v6320_v44 = vunpack.i.l.bf16 %v6319_v14 }
 0x147   : > { %v6316_v24 = vunpack.i.h.bf16 %v6314_v35  ;;  %v6315_v49 = vunpack.i.l.bf16 %v6314_v35 }
 0x148   : > { %v872_v47 = vsel %vm857_vm2, %v839_v19, %v6320_v44  ;;  %v873_v0 = vsel %vm857_vm2, %v840_v61, %v6321_v29  ;;  %v490_v61 = vld [vmem:[#allocation2 + $0xc8] sm:$0xff] }
 0x149   : > { %v870_v51 = vsel %vm857_vm2, %v837_v57, %v6315_v49  ;;  %v871_v54 = vsel %vm857_vm2, %v838_v55, %v6316_v24  ;;  %v6329_v48 = vpop.permute.xlu1 %6328  ;;  %v897_v42 = vpack.c.bf16 %v873_v0, %v872_v47 }
 0x14a   : > { %v6324_v62 = vpop.permute.xlu0 %6323  ;;  %v6331_v16 = vunpack.i.h.bf16 %v6329_v48  ;;  %v6330_v13 = vunpack.i.l.bf16 %v6329_v48  ;;  %v896_v15 = vpack.c.bf16 %v871_v54, %v870_v51 }
 0x14b   : > { %v6326_v36 = vunpack.i.h.bf16 %v6324_v62  ;;  %v6325_v41 = vunpack.i.l.bf16 %v6324_v62 }
 0x14c   : > { %5756 = vmatprep.mubr.msk.bf16.mxu1 %vm1399_vm3, %v896_v15  ;;  %v2222_v20 = vsel %vm384_vm0, %v7909_v32, %v6331_v16  ;;  %v2221_v50 = vsel %vm384_vm0, %v7907_v28, %v6330_v13 }
 0x14d   : > { %5757 = vmatmul.mubr.msk.bf16.gmra.mxu1 %vm1399_vm3, %v897_v42  ;;  %v6339_v23 = vpop.permute.xlu1 %6338  ;;  %v2220_v25 = vsel %vm384_vm0, %v7872_v39, %v6326_v36  ;;  %v2219_v59 = vsel %vm384_vm0, %v7870_v63, %v6325_v41  ;;  %v489_v63 = vld [vmem:[#allocation2 + $0xc0] sm:$0xff] }
 0x14e   : > { %v6334_v43 = vpop.permute.xlu0 %6333  ;;  %v6341_v10 = vunpack.i.h.bf16 %v6339_v23  ;;  %v6340_v52 = vunpack.i.l.bf16 %v6339_v23 }
 0x14f   : > { %v6336_v27 = vunpack.i.h.bf16 %v6334_v43  ;;  %v6335_v38 = vunpack.i.l.bf16 %v6334_v43 }
 0x150   : > { %v2253_v18 = vsel %vm857_vm2, %v2221_v50, %v6340_v52  ;;  %v2254_v53 = vsel %vm857_vm2, %v2222_v20, %v6341_v10 }
 0x151   : > { %v2251_v60 = vsel %vm857_vm2, %v2219_v59, %v6335_v38  ;;  %v2252_v17 = vsel %vm857_vm2, %v2220_v25, %v6336_v27  ;;  %v6349_v37 = vpop.permute.xlu1 %6348  ;;  %v2278_v40 = vpack.c.bf16 %v2254_v53, %v2253_v18 }
 0x152   : > { %v6344_v30 = vpop.permute.xlu0 %6343  ;;  %v6351_v39 = vunpack.i.h.bf16 %v6349_v37  ;;  %v6350_v46 = vunpack.i.l.bf16 %v6349_v37  ;;  %v2277_v58 = vpack.c.bf16 %v2252_v17, %v2251_v60 }
 0x153   : > { %v6346_v19 = vunpack.i.h.bf16 %v6344_v30  ;;  %v6345_v14 = vunpack.i.l.bf16 %v6344_v30 }
 0x154   : > { %5800 = vmatprep.mubr.msk.bf16.mxu0 %vm1399_vm3, %v2277_v58  ;;  %v844_v55 = vsel %vm384_vm0, %v7909_v32, %v6351_v39  ;;  %v843_v57 = vsel %vm384_vm0, %v7907_v28, %v6350_v46 }
 0x155   : > { %5801 = vmatmul.mubr.msk.bf16.gmra.mxu0 %vm1399_vm3, %v2278_v40  ;;  %v6359_v35 = vpop.permute.xlu1 %6358  ;;  %v842_v29 = vsel %vm384_vm0, %v490_v61, %v6346_v19  ;;  %v841_v44 = vsel %vm384_vm0, %v489_v63, %v6345_v14  ;;  %v494_v63 = vld [vmem:[#allocation2 + $0xf8] sm:$0xff] }
 0x156   : > { %v6354_v24 = vpop.permute.xlu0 %6353  ;;  %v6361_v49 = vunpack.i.h.bf16 %v6359_v35  ;;  %v6360_v47 = vunpack.i.l.bf16 %v6359_v35 }
 0x157   : > { %v6356_v0 = vunpack.i.h.bf16 %v6354_v24  ;;  %v6355_v51 = vunpack.i.l.bf16 %v6354_v24 }
 0x158   : > { %v876_v54 = vsel %vm857_vm2, %v843_v57, %v6360_v47  ;;  %v877_v48 = vsel %vm857_vm2, %v844_v55, %v6361_v49 }
 0x159   : > { %v874_v32 = vsel %vm857_vm2, %v841_v44, %v6355_v51  ;;  %v875_v28 = vsel %vm857_vm2, %v842_v29, %v6356_v0  ;;  %v6369_v42 = vpop.permute.xlu1 %6368  ;;  %v899_v62 = vpack.c.bf16 %v877_v48, %v876_v54 }
 0x15a   : > { %v6364_v16 = vpop.permute.xlu0 %6363  ;;  %v6371_v13 = vunpack.i.h.bf16 %v6369_v42  ;;  %v6370_v15 = vunpack.i.l.bf16 %v6369_v42  ;;  %v898_v36 = vpack.c.bf16 %v875_v28, %v874_v32 }
 0x15b   : > { %v6366_v41 = vunpack.i.h.bf16 %v6364_v16  ;;  %v6365_v20 = vunpack.i.l.bf16 %v6364_v16 }
 0x15c   : > { %5760 = vmatprep.mubr.msk.bf16.mxu1 %vm1399_vm3, %v898_v36  ;;  %v2226_v50 = vsel %vm384_vm0, %v7935_v33, %v6371_v13  ;;  %v2225_v23 = vsel %vm384_vm0, %v7933_v45, %v6370_v15  ;;  %v1875_v13 = vld [vmem:[#allocation2 + $0x120] sm:$0xff]  ;;  %v1876_v15 = vld [vmem:[#allocation2 + $0x128] sm:$0xff] }
 0x15d   : > { %5761 = vmatmul.mubr.msk.bf16.gmra.mxu1 %vm1399_vm3, %v899_v62  ;;  %v6379_v25 = vpop.permute.xlu1 %6378  ;;  %v2224_v59 = vsel %vm384_vm0, %v7902_v26, %v6366_v41  ;;  %v2223_v43 = vsel %vm384_vm0, %v7900_v21, %v6365_v20  ;;  %v493_v21 = vld [vmem:[#allocation2 + $0xf0] sm:$0xff] }
 0x15e   : > { %v6374_v10 = vpop.permute.xlu0 %6373  ;;  %v6381_v52 = vunpack.i.h.bf16 %v6379_v25  ;;  %v6380_v27 = vunpack.i.l.bf16 %v6379_v25 }
 0x15f   : > { %v6376_v38 = vunpack.i.h.bf16 %v6374_v10  ;;  %v6375_v18 = vunpack.i.l.bf16 %v6374_v10 }
 0x160   : > { %v2257_v53 = vsel %vm857_vm2, %v2225_v23, %v6380_v27  ;;  %v2258_v60 = vsel %vm857_vm2, %v2226_v50, %v6381_v52 }
 0x161   : > { %v2255_v17 = vsel %vm857_vm2, %v2223_v43, %v6375_v18  ;;  %v2256_v37 = vsel %vm857_vm2, %v2224_v59, %v6376_v38  ;;  %v6389_v40 = vpop.permute.xlu1 %6388  ;;  %v2280_v30 = vpack.c.bf16 %v2258_v60, %v2257_v53 }
 0x162   : > { %v6384_v39 = vpop.permute.xlu0 %6383  ;;  %v6391_v26 = vunpack.i.h.bf16 %v6389_v40  ;;  %v6390_v46 = vunpack.i.l.bf16 %v6389_v40  ;;  %v2279_v58 = vpack.c.bf16 %v2256_v37, %v2255_v17 }
 0x163   : > { %v6386_v61 = vunpack.i.h.bf16 %v6384_v39  ;;  %v6385_v19 = vunpack.i.l.bf16 %v6384_v39  ;;  %v2748_v39 = vld [vmem:[#allocation2 + $0x9] sm:$0xff] }
 0x164   : > { %5804 = vmatprep.mubr.msk.bf16.mxu0 %vm1399_vm3, %v2279_v58  ;;  %v848_v14 = vsel %vm384_vm0, %v7935_v33, %v6391_v26  ;;  %v847_v55 = vsel %vm384_vm0, %v7933_v45, %v6390_v46 }
 0x165   : > { %5805 = vmatmul.mubr.msk.bf16.gmra.mxu0 %vm1399_vm3, %v2280_v30  ;;  %v6399_v57 = vpop.permute.xlu1 %6398  ;;  %v846_v35 = vsel %vm384_vm0, %v494_v63, %v6386_v61  ;;  %v845_v29 = vsel %vm384_vm0, %v493_v21, %v6385_v19  ;;  %v2747_v30 = vld [vmem:[#allocation2 + $0x1] sm:$0xff] }
 0x166   : > { %v6394_v44 = vpop.permute.xlu0 %6393  ;;  %v6401_v24 = vunpack.i.h.bf16 %v6399_v57  ;;  %v6400_v49 = vunpack.i.l.bf16 %v6399_v57  ;;  %v6502_v63 = vpack.i.bf16 %v2748_v39, %v2747_v30 }
 0x167   : > { %v6396_v47 = vunpack.i.h.bf16 %v6394_v44  ;;  %v6395_v0 = vunpack.i.l.bf16 %v6394_v44  ;;  %v2780_v44 = vld [vmem:[#allocation2 + $0xa] sm:$0xff] }
 0x168   : > { %v880_v51 = vsel %vm857_vm2, %v847_v55, %v6400_v49  ;;  %v881_v54 = vsel %vm857_vm2, %v848_v14, %v6401_v24  ;;  %6503 = vrot.lane.b32.xlu0 %v6502_v63, %s7121_s28 }
 0x169   : > { %v878_v33 = vsel %vm857_vm2, %v845_v29, %v6395_v0  ;;  %v879_v45 = vsel %vm857_vm2, %v846_v35, %v6396_v47  ;;  %v6409_v48 = vpop.permute.xlu1 %6408  ;;  %v901_v32 = vpack.c.bf16 %v881_v54, %v880_v51  ;;  %v2779_v29 = vld [vmem:[#allocation2 + $0x2] sm:$0xff] }
 0x16a   : > { %v6404_v28 = vpop.permute.xlu0 %6403  ;;  %v6411_v42 = vunpack.i.h.bf16 %v6409_v48  ;;  %v6410_v62 = vunpack.i.l.bf16 %v6409_v48  ;;  %v900_v16 = vpack.c.bf16 %v879_v45, %v878_v33  ;;  %v6507_v51 = vpack.i.bf16 %v2780_v44, %v2779_v29 }
 0x16b   : > { %v6406_v36 = vunpack.i.h.bf16 %v6404_v28  ;;  %v6405_v41 = vunpack.i.l.bf16 %v6404_v28 }
 0x16c   : > { %5764 = vmatprep.mubr.msk.bf16.mxu1 %vm1399_vm3, %v900_v16  ;;  %v2230_v20 = vsel %vm384_vm0, %v7959_v22, %v6411_v42  ;;  %v2229_v50 = vsel %vm384_vm0, %v7957_v34, %v6410_v62  ;;  %6508 = vrot.lane.b32.xlu0 %v6507_v51, %s7120_s20 }
 0x16d   : > { %5765 = vmatmul.mubr.msk.bf16.gmra.mxu1 %vm1399_vm3, %v901_v32  ;;  %v6419_v23 = vpop.permute.xlu1 %6418  ;;  %v2228_v25 = vsel %vm384_vm0, %v1876_v15, %v6406_v36  ;;  %v2227_v59 = vsel %vm384_vm0, %v1875_v13, %v6405_v41  ;;  %v1880_v36 = vld [vmem:[#allocation2 + $0x158] sm:$0xff] }
 0x16e   : > { %v6414_v43 = vpop.permute.xlu0 %6413  ;;  %v6421_v10 = vunpack.i.h.bf16 %v6419_v23  ;;  %v6420_v52 = vunpack.i.l.bf16 %v6419_v23 }
 0x16f   : > { %v6416_v27 = vunpack.i.h.bf16 %v6414_v43  ;;  %v6415_v38 = vunpack.i.l.bf16 %v6414_v43 }
 0x170   : > { %v2261_v18 = vsel %vm857_vm2, %v2229_v50, %v6420_v52  ;;  %v2262_v53 = vsel %vm857_vm2, %v2230_v20, %v6421_v10 }
 0x171   : > { %v2259_v60 = vsel %vm857_vm2, %v2227_v59, %v6415_v38  ;;  %v2260_v17 = vsel %vm857_vm2, %v2228_v25, %v6416_v27  ;;  %v6429_v37 = vpop.permute.xlu1 %6428  ;;  %v2282_v40 = vpack.c.bf16 %v2262_v53, %v2261_v18 }
 0x172   : > { %v6424_v26 = vpop.permute.xlu0 %6423  ;;  %v6431_v46 = vunpack.i.h.bf16 %v6429_v37  ;;  %v6430_v58 = vunpack.i.l.bf16 %v6429_v37  ;;  %v2281_v21 = vpack.c.bf16 %v2260_v17, %v2259_v60 }
 0x173   : > { %v6426_v61 = vunpack.i.h.bf16 %v6424_v26  ;;  %v6425_v19 = vunpack.i.l.bf16 %v6424_v26 }
 0x174   : > { %5808 = vmatprep.mubr.msk.bf16.mxu0 %vm1399_vm3, %v2281_v21  ;;  %v852_v55 = vsel %vm384_vm0, %v7959_v22, %v6431_v46  ;;  %v851_v57 = vsel %vm384_vm0, %v7957_v34, %v6430_v58 }
 0x175   : > { %v850_v14 = vsel %vm384_vm0, %v1876_v15, %v6426_v61  ;;  %5809 = vmatmul.mubr.msk.bf16.gmra.mxu0 %vm1399_vm3, %v2282_v40  ;;  %v6439_v35 = vpop.permute.xlu1 %6438  ;;  %v849_v24 = vsel %vm384_vm0, %v1875_v13, %v6425_v19  ;;  %v1879_v15 = vld [vmem:[#allocation2 + $0x150] sm:$0xff] }
 0x176   : > { %v6434_v49 = vpop.permute.xlu0 %6433  ;;  %v6441_v47 = vunpack.i.h.bf16 %v6439_v35  ;;  %v6440_v0 = vunpack.i.l.bf16 %v6439_v35 }
 0x177   : > { %v6436_v54 = vunpack.i.h.bf16 %v6434_v49  ;;  %v6435_v33 = vunpack.i.l.bf16 %v6434_v49 }
 0x178   : > { %v884_v45 = vsel %vm857_vm2, %v851_v57, %v6440_v0  ;;  %v885_v22 = vsel %vm857_vm2, %v852_v55, %v6441_v47 }
 0x179   : > { %v882_v34 = vsel %vm857_vm2, %v849_v24, %v6435_v33  ;;  %v883_v48 = vsel %vm857_vm2, %v850_v14, %v6436_v54  ;;  %v6449_v32 = vpop.permute.xlu1 %6448  ;;  %v903_v28 = vpack.c.bf16 %v885_v22, %v884_v45  ;;  %v1885_v45 = vld [vmem:[#allocation2 + $0x198] sm:$0xff]  ;;  %v1886_v22 = vld [vmem:[#allocation2 + $0x1a0] sm:$0xff] }
 0x17a   : > { %v6444_v42 = vpop.permute.xlu0 %6443  ;;  %v6451_v62 = vunpack.i.h.bf16 %v6449_v32  ;;  %v6450_v16 = vunpack.i.l.bf16 %v6449_v32  ;;  %v902_v13 = vpack.c.bf16 %v883_v48, %v882_v34 }
 0x17b   : > { %v6446_v41 = vunpack.i.h.bf16 %v6444_v42  ;;  %v6445_v20 = vunpack.i.l.bf16 %v6444_v42  ;;  %v1884_v42 = vld [vmem:[#allocation2 + $0x188] sm:$0xff] }
 0x17c   : > { %5768 = vmatprep.mubr.msk.bf16.mxu1 %vm1399_vm3, %v902_v13  ;;  %v2234_v50 = vsel %vm384_vm0, %v7985_v56, %v6451_v62  ;;  %v2233_v23 = vsel %vm384_vm0, %v7983_v31, %v6450_v16 }
 0x17d   : > { %5769 = vmatmul.mubr.msk.bf16.gmra.mxu1 %vm1399_vm3, %v903_v28  ;;  %v6459_v25 = vpop.permute.xlu1 %6458  ;;  %v2232_v59 = vsel %vm384_vm0, %v1880_v36, %v6446_v41  ;;  %v2231_v43 = vsel %vm384_vm0, %v1879_v15, %v6445_v20  ;;  %v1883_v28 = vld [vmem:[#allocation2 + $0x180] sm:$0xff] }
 0x17e   : > { %v6454_v10 = vpop.permute.xlu0 %6453  ;;  %v6461_v52 = vunpack.i.h.bf16 %v6459_v25  ;;  %v6460_v27 = vunpack.i.l.bf16 %v6459_v25 }
 0x17f   : > { %v6456_v38 = vunpack.i.h.bf16 %v6454_v10  ;;  %v6455_v18 = vunpack.i.l.bf16 %v6454_v10 }
 0x180   : > { %v2265_v53 = vsel %vm857_vm2, %v2233_v23, %v6460_v27  ;;  %v2266_v60 = vsel %vm857_vm2, %v2234_v50, %v6461_v52 }
 0x181   : > { %v2263_v17 = vsel %vm857_vm2, %v2231_v43, %v6455_v18  ;;  %v2264_v37 = vsel %vm857_vm2, %v2232_v59, %v6456_v38  ;;  %v6469_v40 = vpop.permute.xlu1 %6468  ;;  %v2284_v30 = vpack.c.bf16 %v2266_v60, %v2265_v53 }
 0x182   : > { %v6464_v39 = vpop.permute.xlu0 %6463  ;;  %v6471_v26 = vunpack.i.h.bf16 %v6469_v40  ;;  %v6470_v46 = vunpack.i.l.bf16 %v6469_v40  ;;  %v2283_v58 = vpack.c.bf16 %v2264_v37, %v2263_v17 }
 0x183   : > { %v6466_v21 = vunpack.i.h.bf16 %v6464_v39  ;;  %v6465_v63 = vunpack.i.l.bf16 %v6464_v39 }
 0x184   : > { %5812 = vmatprep.mubr.msk.bf16.mxu0 %vm1399_vm3, %v2283_v58  ;;  %v856_v61 = vsel %vm384_vm0, %v7985_v56, %v6471_v26  ;;  %v855_v19 = vsel %vm384_vm0, %v7983_v31, %v6470_v46 }
 0x185   : > { %5813 = vmatmul.mubr.msk.bf16.gmra.mxu0 %vm1399_vm3, %v2284_v30  ;;  %v6479_v14 = vpop.permute.xlu1 %6478  ;;  %v854_v55 = vsel %vm384_vm0, %v1880_v36, %v6466_v21  ;;  %v853_v57 = vsel %vm384_vm0, %v1879_v15, %v6465_v63 }
 0x186   : > { %v6474_v35 = vpop.permute.xlu0 %6473  ;;  %v6481_v29 = vunpack.i.h.bf16 %v6479_v14  ;;  %v6480_v44 = vunpack.i.l.bf16 %v6479_v14 }
 0x187   : > { %v6476_v24 = vunpack.i.h.bf16 %v6474_v35  ;;  %v6475_v49 = vunpack.i.l.bf16 %v6474_v35 }
 0x188   : > { %v888_v47 = vsel %vm857_vm2, %v855_v19, %v6480_v44  ;;  %v889_v0 = vsel %vm857_vm2, %v856_v61, %v6481_v29 }
 0x189   : > { %v886_v56 = vsel %vm857_vm2, %v853_v57, %v6475_v49  ;;  %v887_v31 = vsel %vm857_vm2, %v854_v55, %v6476_v24  ;;  %v6489_v51 = vpop.permute.xlu1 %6488  ;;  %v905_v54 = vpack.c.bf16 %v889_v0, %v888_v47 }
 0x18a   : > { %v6484_v33 = vpop.permute.xlu0 %6483  ;;  %v6491_v34 = vunpack.i.h.bf16 %v6489_v51  ;;  %v6490_v48 = vunpack.i.l.bf16 %v6489_v51  ;;  %v904_v32 = vpack.c.bf16 %v887_v31, %v886_v56 }
 0x18b   : > { %v6486_v62 = vunpack.i.h.bf16 %v6484_v33  ;;  %v6485_v16 = vunpack.i.l.bf16 %v6484_v33 }
 0x18c   : > { %5772 = vmatprep.mubr.msk.bf16.mxu1 %vm1399_vm3, %v904_v32  ;;  %v2238_v13 = vsel %vm384_vm0, %v1886_v22, %v6491_v34  ;;  %v2237_v15 = vsel %vm384_vm0, %v1885_v45, %v6490_v48 }
 0x18d   : > { %5773 = vmatmul.mubr.msk.bf16.gmra.mxu1 %vm1399_vm3, %v905_v54  ;;  %v6499_v36 = vpop.permute.xlu1 %6498  ;;  %v2236_v41 = vsel %vm384_vm0, %v1884_v42, %v6486_v62  ;;  %v2235_v20 = vsel %vm384_vm0, %v1883_v28, %v6485_v16  ;;  %v7000_v16 = vld [vmem:[%s9720_s2 + $0x28] sm:$0xff]  }
 0x18e   : > { %v6494_v50 = vpop.permute.xlu0 %6493  ;;  %v6501_v23 = vunpack.i.h.bf16 %v6499_v36  ;;  %v6500_v25 = vunpack.i.l.bf16 %v6499_v36  ;;  %5864 = vmatprep.subr.bf16.mxu0 %v7000_v16 }
 0x18f   : > { %v6496_v59 = vunpack.i.h.bf16 %v6494_v50  ;;  %v6495_v43 = vunpack.i.l.bf16 %v6494_v50  ;;  %v2716_v50 = vld [vmem:[#allocation2 + $0x8] sm:$0xff]  ;;  %5865 = vmatpush3.bf16.msra.mxu0 %v7000_v16 }
 0x190   : > { %v2269_v10 = vsel %vm857_vm2, %v2237_v15, %v6500_v25  ;;  %v2270_v52 = vsel %vm857_vm2, %v2238_v13, %v6501_v23  ;;  %v8277_v15 = vld [vmem:[%s9721_s3] ss:$0 sm:$0xff]  ;;  %v8282_v25 = vld [vmem:[%s9721_s3 + $0x1] ss:$0 sm:$0xff] }
 0x191   : > { %v2267_v27 = vsel %vm857_vm2, %v2235_v20, %v6495_v43  ;;  %v2268_v38 = vsel %vm857_vm2, %v2236_v41, %v6496_v59  ;;  %v2286_v18 = vpack.c.bf16 %v2270_v52, %v2269_v10  ;;  %v2715_v43 = vld [vmem:[#allocation2] sm:$0xff] }
 0x192   : > { %v2285_v53 = vpack.c.bf16 %v2268_v38, %v2267_v27 }
 0x194   : > { %5816 = vmatprep.mubr.msk.bf16.mxu0 %vm1399_vm3, %v2285_v53  ;;  %v7001_v53 = vld [vmem:[%s9720_s2 + $0x20] sm:$0xff]  }
 0x195   : > { %5817 = vmatmul.mubr.msk.bf16.gmra.mxu0 %vm1399_vm3, %v2286_v18  ;;  %5866 = vmatprep.subr.bf16.mxu0 %v7001_v53 }
 0x196   : > { %5867 = vmatpush3.bf16.msra.mxu0 %v7001_v53 }
 0x19d   : > { %v5702_v60 = vpop.f32.mrf.mxu0 }
 0x19f   : > { %v1482_v17 = vpop.f32.mrf.mxu0 }
 0x1a1   : > { %v5703_v37 = vpop.f32.mrf.mxu0 }
 0x1a3   : > { %v1485_v40 = vpop.f32.mrf.mxu0 }
 0x1a5   : > { %v8215_v30 = vpop.f32.mrf.mxu0 }
 0x1a7   : > { %v8217_v39 = vpop.f32.mrf.mxu0 }
 0x1a9   : > { %v8219_v26 = vpop.f32.mrf.mxu0 }
 0x1ab   : > { %v8221_v46 = vpop.f32.mrf.mxu0 }
 0x1ad   : > { %v8223_v58 = vpop.f32.mrf.mxu0 }
 0x1af   : > { %v8225_v21 = vpop.f32.mrf.mxu0 }
 0x1b1   : > { %v8227_v63 = vpop.f32.mrf.mxu0 }
 0x1b3   : > { %v8229_v61 = vpop.f32.mrf.mxu0 }
 0x1b5   : > { %v8231_v19 = vpop.f32.mrf.mxu0 }
 0x1b7   : > { %v8233_v14 = vpop.f32.mrf.mxu0 }
 0x1b9   : > { %v8235_v55 = vpop.f32.mrf.mxu0 }
 0x1bb   : > { %v8237_v57 = vpop.f32.mrf.mxu0 }
 0x1bd   : > { %v8239_v35 = vpop.f32.mrf.mxu0 }
 0x1bf   : > { %v8241_v29 = vpop.f32.mrf.mxu0 }
 0x1c1   : > { %v8243_v44 = vpop.f32.mrf.mxu0 }
 0x1c3   : > { %v8245_v24 = vpop.f32.mrf.mxu0 }
 0x1c5   : > { %v8247_v49 = vpop.f32.mrf.mxu0 }
 0x1c7   : > { %v8249_v47 = vpop.f32.mrf.mxu0 }
 0x1c9   : > { %v8251_v0 = vpop.f32.mrf.mxu0 }
 0x1cb   : > { %v8253_v56 = vpop.f32.mrf.mxu0 }
 0x1cd   : > { %v8255_v31 = vpop.f32.mrf.mxu0 }
 0x1cf   : > { %v8257_v51 = vpop.f32.mrf.mxu0 }
 0x1d1   : > { %v8259_v54 = vpop.f32.mrf.mxu0 }
 0x1d3   : > { %v8261_v33 = vpop.f32.mrf.mxu0 }
 0x1d5   : > { %v8263_v45 = vpop.f32.mrf.mxu0 }
 0x1d7   : > { %v8265_v22 = vpop.f32.mrf.mxu0 }
 0x1d9   : > { %v8267_v48 = vpop.f32.mrf.mxu0 }
 0x1da   : > { %v6504_v23 = vpop.permute.xlu0 %6503 }
 0x1db   : > { %v8269_v42 = vpop.f32.mrf.mxu0  ;;  %v6506_v10 = vunpack.i.h.bf16 %v6504_v23  ;;  %v6505_v52 = vunpack.i.l.bf16 %v6504_v23 }
 0x1dd   : > { %v5746_v34 = vpop.f32.mrf.mxu1  ;;  %v3067_v23 = vsel %vm384_vm0, %v2715_v43, %v6505_v52 }
 0x1de   : > { %v1736_v62 = vadd.f32 %v5746_v34, %v5702_v60  ;;  %v3068_v34 = vsel %vm384_vm0, %v2716_v50, %v6506_v10  ;;  %v6509_v16 = vpop.permute.xlu0 %6508 }
 0x1df   : > { %v1727_v32 = vpop.f32.mrf.mxu1 }
 0x1e0   : > { %v1728_v36 = vadd.f32 %v1727_v32, %v1482_v17 }
 0x1e1   : > { %v5747_v28 = vpop.f32.mrf.mxu1 }
 0x1e2   : > { %v1739_v27 = vadd.f32 %v5747_v28, %v5703_v37  ;;  %v6511_v28 = vunpack.i.h.bf16 %v6509_v16 }
 0x1e3   : > { %v1730_v41 = vpop.f32.mrf.mxu1 }
 0x1e4   : > { %v1731_v60 = vadd.f32 %v1730_v41, %v1485_v40 }
 0x1e5   : > { %v5790_v13 = vpop.f32.mrf.mxu0 }
 0x1e6   : > { %v2547_v20 = vadd.f32 %v5790_v13, %v1736_v62 }
 0x1e7   : > { %v2418_v59 = vpop.f32.mrf.mxu0 }
 0x1e8   : > { %v2584_v38 = vmul.f32 %v8277_v15, %v2547_v20  ;;  %v2545_v18 = vadd.f32 %v2418_v59, %v1728_v36  ;;  %v6510_v36 = vunpack.i.l.bf16 %v6509_v16 }
 0x1e9   : > { %v5791_v17 = vpop.f32.mrf.mxu0 }
 0x1ea   : > { %v2621_v32 = vadd.f32 %v8282_v25, %v2584_v38  ;;  %v2582_v62 = vmul.f32 %v8277_v15, %v2545_v18  ;;  %v2548_v13 = vadd.f32 %v5791_v17, %v1739_v27  ;;  %v3099_v10 = vsel %vm857_vm2, %v3067_v23, %v6510_v36  ;;  %v7002_v17 = vld [vmem:[%s9720_s2 + $0x18] sm:$0xff]   ;;  %v7004_v23 = vld [vmem:[%s9720_s2 + $0x10] sm:$0xff]  }
 0x1eb   : > { %v2421_v37 = vpop.f32.mrf.mxu0  ;;  %v3100_v38 = vsel %vm857_vm2, %v3068_v34, %v6511_v28  ;;  %v7003_v34 = vld [vmem:[%s9720_s2 + $0x58] sm:$0xff]   ;;  %5868 = vmatprep.subr.bf16.mxu0 %v7002_v17 }
 0x1ec   : > { %v2653_v20 = vmax.f32 %v2621_v32, 0.0  ;;  %v2619_v59 = vadd.f32 %v8282_v25, %v2582_v62  ;;  %v2585_v40 = vmul.f32 %v8277_v15, %v2548_v13  ;;  %v2546_v41 = vadd.f32 %v2421_v37, %v1731_v60  ;;  %5820 = vmatprep.subr.bf16.mxu1 %v7003_v34  ;;  %5869 = vmatpush3.bf16.msra.mxu0 %v7002_v17  ;;  %v7005_v37 = vld [vmem:[%s9720_s2 + $0x50] sm:$0xff]  }
 0x1ed   : > { %v5750_v50 = vpop.f32.mrf.mxu1  ;;  %v3131_v53 = vpack.c.bf16 %v3100_v38, %v3099_v10  ;;  %5821 = vmatpush3.bf16.msra.mxu1 %v7003_v34  ;;  %5870 = vmatprep.subr.bf16.mxu0 %v7004_v23  ;;  %v7007_v38 = vld [vmem:[%s9720_s2 + $0x48] sm:$0xff]  }
 0x1ee   : > { %2685 = vst.msk [vmem:[#allocation2 + $0x31] sm:$0xff] %vm384_vm0, %v2653_v20  ;;  %v2651_v43 = vmax.f32 %v2619_v59, 0.0  ;;  %v2622_v52 = vadd.f32 %v8282_v25, %v2585_v40  ;;  %v2583_v27 = vmul.f32 %v8277_v15, %v2546_v41  ;;  %v1752_v16 = vadd.f32 %v5750_v50, %v8215_v30  ;;  %5822 = vmatprep.subr.bf16.mxu1 %v7005_v37  ;;  %v7006_v41 = vld [vmem:[%s9720_s2 + $0x8] sm:$0xff]  }
 0x1ef   : > { %v1743_v18 = vpop.f32.mrf.mxu1  ;;  %5876 = vmatprep.mubr.msk.bf16.mxu0 %vm1399_vm3, %v3131_v53 }
 0x1f0   : > { %2683 = vst.msk [vmem:[#allocation2 + $0x19] sm:$0xff] %vm384_vm0, %v2651_v43  ;;  %v2654_v60 = vmax.f32 %v2622_v52, 0.0  ;;  %v2620_v32 = vadd.f32 %v8282_v25, %v2583_v27  ;;  %v1744_v36 = vadd.f32 %v1743_v18, %v8217_v39  ;;  %5871 = vmatpush3.bf16.msra.mxu0 %v7004_v23 }
 0x1f1   : > { %v5751_v13 = vpop.f32.mrf.mxu1  ;;  %5823 = vmatpush3.bf16.msra.mxu1 %v7005_v37  ;;  %5872 = vmatprep.subr.bf16.mxu0 %v7006_v41  ;;  %v7009_v37 = vld [vmem:[%s9720_s2 + $0x40] sm:$0xff]  }
 0x1f2   : > { %2686 = vst.msk [vmem:[#allocation2 + $0x39] sm:$0xff] %vm384_vm0, %v2654_v60  ;;  %v2652_v62 = vmax.f32 %v2620_v32, 0.0  ;;  %v1755_v30 = vadd.f32 %v5751_v13, %v8219_v26  ;;  %5824 = vmatprep.subr.bf16.mxu1 %v7007_v38 }
 0x1f3   : > { %v1746_v20 = vpop.f32.mrf.mxu1 }
 0x1f4   : > { %2684 = vst.msk [vmem:[#allocation2 + $0x21] sm:$0xff] %vm384_vm0, %v2652_v62  ;;  %v1747_v39 = vadd.f32 %v1746_v20, %v8221_v46  ;;  %5873 = vmatpush3.bf16.msra.mxu0 %v7006_v41 }
 0x1f5   : > { %v5794_v28 = vpop.f32.mrf.mxu0  ;;  %v4126_v52 = vld [vmem:[#allocation2 + $0x31] sm:$0xff]  ;;  %5825 = vmatpush3.bf16.msra.mxu1 %v7007_v38 }
 0x1f6   : > { %v2551_v59 = vadd.f32 %v5794_v28, %v1752_v16  ;;  %v7008_v16 = vld [vmem:[%s9720_s2] sm:$0xff]   ;;  %5826 = vmatprep.subr.bf16.mxu1 %v7009_v37  ;;  %v7010_v38 = vld [vmem:[%s9720_s2 + $0x38] sm:$0xff]  }
 0x1f7   : > { %v2434_v40 = vpop.f32.mrf.mxu0  ;;  %5874 = vmatprep.subr.bf16.mxu0 %v7008_v16 }
 0x1f8   : > { %v2588_v50 = vmul.f32 %v8277_v15, %v2551_v59  ;;  %v2549_v10 = vadd.f32 %v2434_v40, %v1744_v36  ;;  %5875 = vmatpush3.bf16.msra.mxu0 %v7008_v16 }
 0x1f9   : > { %v5795_v43 = vpop.f32.mrf.mxu0  ;;  %v4127_v27 = vld [vmem:[#allocation2 + $0x39] sm:$0xff]  ;;  %5827 = vmatpush3.bf16.msra.mxu1 %v7009_v37 }
 0x1fa   : > { %v2625_v18 = vadd.f32 %v8282_v25, %v2588_v50  ;;  %v2586_v53 = vmul.f32 %v8277_v15, %v2549_v10  ;;  %v2552_v17 = vadd.f32 %v5795_v43, %v1755_v30  ;;  %v6522_v60 = vpack.i.bf16 %v4127_v27, %v4126_v52  ;;  %v4158_v32 = vld [vmem:[#allocation2 + $0x32] sm:$0xff]  ;;  %v4159_v34 = vld [vmem:[#allocation2 + $0x3a] sm:$0xff]  ;;  %5828 = vmatprep.subr.bf16.mxu1 %v7010_v38 }
 0x1fb   : > { %v2437_v26 = vpop.f32.mrf.mxu0  ;;  %v6527_v40 = vpack.i.bf16 %v4159_v34, %v4158_v32  ;;  %v2750_v30 = vld [vmem:[#allocation2 + $0x21] sm:$0xff]  ;;  %v9795_v43 = vmov 0.0   ;;  %v7011_v32 = vld [vmem:[%s9720_s2 + $0x30] sm:$0xff]  }
 0x1fc   : > { %v2657_v62 = vmax.f32 %v2625_v18, 0.0  ;;  %v2623_v13 = vadd.f32 %v8282_v25, %v2586_v53  ;;  %v2589_v46 = vmul.f32 %v8277_v15, %v2552_v17  ;;  %v2550_v23 = vadd.f32 %v2437_v26, %v1747_v39  ;;  %6523 = vrot.lane.b32.xlu0 %v6522_v60, %s7121_s28  ;;  %6513 = vrot.lane.b32.xlu1 %v6522_v60, %s7121_s28  ;;  %v2749_v39 = vld [vmem:[#allocation2 + $0x19] sm:$0xff]  ;;  %v2782_v17 = vld [vmem:[#allocation2 + $0x22] sm:$0xff] }
 0x1fd   : > { %v5754_v28 = vpop.f32.mrf.mxu1  ;;  %5952 = vmatprep.subr.mxu0 %v9795_v43  ;;  %v6552_v18 = vpack.i.bf16 %v2750_v30, %v2749_v39  ;;  %v2781_v53 = vld [vmem:[#allocation2 + $0x1a] sm:$0xff]  ;;  %5829 = vmatpush3.bf16.msra.mxu1 %v7010_v38 }
 0x1fe   : > { %2689 = vst.msk [vmem:[#allocation2 + $0x61] sm:$0xff] %vm384_vm0, %v2657_v62  ;;  %v2655_v36 = vmax.f32 %v2623_v13, 0.0  ;;  %v2626_v20 = vadd.f32 %v8282_v25, %v2589_v46  ;;  %v2587_v59 = vmul.f32 %v8277_v15, %v2550_v23  ;;  %v1768_v26 = vadd.f32 %v5754_v28, %v8223_v58  ;;  %5830 = vmatprep.subr.bf16.mxu1 %v7011_v32 }
 0x1ff   : > { %v1759_v41 = vpop.f32.mrf.mxu1  ;;  %v6557_v23 = vpack.i.bf16 %v2782_v17, %v2781_v53 }
 0x200   : > { %2687 = vst.msk [vmem:[#allocation2 + $0x49] sm:$0xff] %vm384_vm0, %v2655_v36  ;;  %v2658_v50 = vmax.f32 %v2626_v20, 0.0  ;;  %v2624_v10 = vadd.f32 %v8282_v25, %v2587_v59  ;;  %6528 = vrot.lane.b32.xlu0 %v6527_v40, %s7120_s20  ;;  %6518 = vrot.lane.b32.xlu1 %v6527_v40, %s7120_s20  ;;  %v1760_v62 = vadd.f32 %v1759_v41, %v8225_v21 }
 0x201   : > { %v5755_v27 = vpop.f32.mrf.mxu1  ;;  %5831 = vmatpush3.bf16.msra.mxu1 %v7011_v32 }
 0x202   : > { %2690 = vst.msk [vmem:[#allocation2 + $0x69] sm:$0xff] %vm384_vm0, %v2658_v50  ;;  %v2656_v52 = vmax.f32 %v2624_v10, 0.0  ;;  %v1771_v37 = vadd.f32 %v5755_v27, %v8227_v63 }
 0x203   : > { %v1762_v13 = vpop.f32.mrf.mxu1 }
 0x204   : > { %2688 = vst.msk [vmem:[#allocation2 + $0x51] sm:$0xff] %vm384_vm0, %v2656_v52  ;;  %6533 = vrot.lane.b32.xlu0 %v6522_v60, %s7121_s28  ;;  %6553 = vrot.lane.b32.xlu1 %v6552_v18, %s7121_s28  ;;  %v1763_v28 = vadd.f32 %v1762_v13, %v8229_v61 }
 0x205   : > { %v5798_v34 = vpop.f32.mrf.mxu0  ;;  %v3197_v20 = vld [vmem:[#allocation2 + $0x61] sm:$0xff] }
 0x206   : > { %v2555_v46 = vadd.f32 %v5798_v34, %v1768_v26 }
 0x207   : > { %v2450_v16 = vpop.f32.mrf.mxu0 }
 0x208   : > { %v2592_v58 = vmul.f32 %v8277_v15, %v2555_v46  ;;  %v2553_v60 = vadd.f32 %v2450_v16, %v1760_v62  ;;  %6538 = vrot.lane.b32.xlu0 %v6527_v40, %s7120_s20  ;;  %6558 = vrot.lane.b32.xlu1 %v6557_v23, %s7120_s20 }
 0x209   : > { %v5799_v36 = vpop.f32.mrf.mxu0  ;;  %v3198_v21 = vld [vmem:[#allocation2 + $0x69] sm:$0xff] }
 0x20a   : > { %v2629_v59 = vadd.f32 %v8282_v25, %v2592_v58  ;;  %v2590_v41 = vmul.f32 %v8277_v15, %v2553_v60  ;;  %v2556_v30 = vadd.f32 %v5799_v36, %v1771_v37  ;;  %v6562_v50 = vpack.i.bf16 %v3198_v21, %v3197_v20  ;;  %v3229_v63 = vld [vmem:[#allocation2 + $0x62] sm:$0xff]  ;;  %v3230_v38 = vld [vmem:[#allocation2 + $0x6a] sm:$0xff] }
 0x20b   : > { %v2453_v10 = vpop.f32.mrf.mxu0  ;;  %v6567_v32 = vpack.i.bf16 %v3230_v38, %v3229_v63  ;;  %v4129_v62 = vld [vmem:[#allocation2 + $0x51] sm:$0xff] }
 0x20c   : > { %v2661_v39 = vmax.f32 %v2629_v59, 0.0  ;;  %v2627_v52 = vadd.f32 %v8282_v25, %v2590_v41  ;;  %v2593_v40 = vmul.f32 %v8277_v15, %v2556_v30  ;;  %v2554_v27 = vadd.f32 %v2453_v10, %v1763_v28  ;;  %6543 = vrot.lane.b32.xlu0 %v6552_v18, %s7121_s28  ;;  %6563 = vrot.lane.b32.xlu1 %v6562_v50, %s7121_s28  ;;  %v4128_v18 = vld [vmem:[#allocation2 + $0x49] sm:$0xff]  ;;  %v4161_v28 = vld [vmem:[#allocation2 + $0x52] sm:$0xff] }
 0x20d   : > { %v5758_v61 = vpop.f32.mrf.mxu1  ;;  %v6602_v37 = vpack.i.bf16 %v4129_v62, %v4128_v18  ;;  %v4160_v60 = vld [vmem:[#allocation2 + $0x4a] sm:$0xff] }
 0x20e   : > { %2693 = vst.msk [vmem:[#allocation2 + $0x91] sm:$0xff] %vm384_vm0, %v2661_v39  ;;  %v2659_v53 = vmax.f32 %v2627_v52, 0.0  ;;  %v2630_v17 = vadd.f32 %v8282_v25, %v2593_v40  ;;  %v2591_v26 = vmul.f32 %v8277_v15, %v2554_v27  ;;  %v1784_v36 = vadd.f32 %v5758_v61, %v8231_v19 }
 0x20f   : > { %v1775_v34 = vpop.f32.mrf.mxu1  ;;  %v6607_v59 = vpack.i.bf16 %v4161_v28, %v4160_v60 }
 0x210   : > { %2691 = vst.msk [vmem:[#allocation2 + $0x79] sm:$0xff] %vm384_vm0, %v2659_v53  ;;  %v2662_v13 = vmax.f32 %v2630_v17, 0.0  ;;  %v2628_v46 = vadd.f32 %v8282_v25, %v2591_v26  ;;  %6548 = vrot.lane.b32.xlu0 %v6557_v23, %s7120_s20  ;;  %6568 = vrot.lane.b32.xlu1 %v6567_v32, %s7120_s20  ;;  %v1776_v23 = vadd.f32 %v1775_v34, %v8233_v14 }
 0x211   : > { %v5759_v58 = vpop.f32.mrf.mxu1 }
 0x212   : > { %2694 = vst.msk [vmem:[#allocation2 + $0x99] sm:$0xff] %vm384_vm0, %v2662_v13  ;;  %v2660_v16 = vmax.f32 %v2628_v46, 0.0  ;;  %v1787_v10 = vadd.f32 %v5759_v58, %v8235_v55 }
 0x213   : > { %v1778_v41 = vpop.f32.mrf.mxu1 }
 0x214   : > { %2692 = vst.msk [vmem:[#allocation2 + $0x81] sm:$0xff] %vm384_vm0, %v2660_v16  ;;  %6573 = vrot.lane.b32.xlu0 %v6562_v50, %s7121_s28  ;;  %6603 = vrot.lane.b32.xlu1 %v6602_v37, %s7121_s28  ;;  %v1779_v39 = vadd.f32 %v1778_v41, %v8237_v57 }
 0x215   : > { %v5802_v20 = vpop.f32.mrf.mxu0 }
 0x216   : > { %v2559_v21 = vadd.f32 %v5802_v20, %v1784_v36 }
 0x217   : > { %v2466_v30 = vpop.f32.mrf.mxu0 }
 0x218   : > { %v2596_v63 = vmul.f32 %v8277_v15, %v2559_v21  ;;  %v2557_v38 = vadd.f32 %v2466_v30, %v1776_v23  ;;  %6578 = vrot.lane.b32.xlu0 %v6567_v32, %s7120_s20  ;;  %6608 = vrot.lane.b32.xlu1 %v6607_v59, %s7120_s20 }
 0x219   : > { %v5803_v19 = vpop.f32.mrf.mxu0  ;;  %v3202_v46 = vld [vmem:[#allocation2 + $0x99] sm:$0xff] }
 0x21a   : > { %v2633_v52 = vadd.f32 %v8282_v25, %v2596_v63  ;;  %v2594_v14 = vmul.f32 %v8277_v15, %v2557_v38  ;;  %v2560_v40 = vadd.f32 %v5803_v19, %v1787_v10  ;;  %v3233_v36 = vld [vmem:[#allocation2 + $0x92] sm:$0xff]  ;;  %v3234_v20 = vld [vmem:[#allocation2 + $0x9a] sm:$0xff] }
 0x21b   : > { %v2469_v27 = vpop.f32.mrf.mxu0  ;;  %v6627_v30 = vpack.i.bf16 %v3234_v20, %v3233_v36  ;;  %v4133_v10 = vld [vmem:[#allocation2 + $0x81] sm:$0xff] }
 0x21c   : > { %v2665_v61 = vmax.f32 %v2633_v52, 0.0  ;;  %v2631_v53 = vadd.f32 %v8282_v25, %v2594_v14  ;;  %v2597_v55 = vmul.f32 %v8277_v15, %v2560_v40  ;;  %v2558_v17 = vadd.f32 %v2469_v27, %v1779_v39  ;;  %6583 = vrot.lane.b32.xlu0 %v6562_v50, %s7121_s28  ;;  %6613 = vrot.lane.b32.xlu1 %v6602_v37, %s7121_s28  ;;  %v3201_v50 = vld [vmem:[#allocation2 + $0x91] sm:$0xff] }
 0x21d   : > { %v5762_v26 = vpop.f32.mrf.mxu1  ;;  %v6622_v60 = vpack.i.bf16 %v3202_v46, %v3201_v50 }
 0x21e   : > { %2697 = vst.msk [vmem:[#allocation2 + $0xc1] sm:$0xff] %vm384_vm0, %v2665_v61  ;;  %v2663_v57 = vmax.f32 %v2631_v53, 0.0  ;;  %v2634_v34 = vadd.f32 %v8282_v25, %v2597_v55  ;;  %v2595_v62 = vmul.f32 %v8277_v15, %v2558_v17  ;;  %v1800_v23 = vadd.f32 %v5762_v26, %v8239_v35  ;;  %v4132_v35 = vld [vmem:[#allocation2 + $0x79] sm:$0xff] }
 0x21f   : > { %v1791_v13 = vpop.f32.mrf.mxu1  ;;  %v6662_v14 = vpack.i.bf16 %v4133_v10, %v4132_v35  ;;  %v4164_v55 = vld [vmem:[#allocation2 + $0x7a] sm:$0xff] }
 0x220   : > { %2695 = vst.msk [vmem:[#allocation2 + $0xa9] sm:$0xff] %vm384_vm0, %v2663_v57  ;;  %v2666_v18 = vmax.f32 %v2634_v34, 0.0  ;;  %v2632_v16 = vadd.f32 %v8282_v25, %v2595_v62  ;;  %6588 = vrot.lane.b32.xlu0 %v6567_v32, %s7120_s20  ;;  %6618 = vrot.lane.b32.xlu1 %v6607_v59, %s7120_s20  ;;  %v1792_v32 = vadd.f32 %v1791_v13, %v8241_v29 }
 0x221   : > { %v5763_v28 = vpop.f32.mrf.mxu1 }
 0x222   : > { %2698 = vst.msk [vmem:[#allocation2 + $0xc9] sm:$0xff] %vm384_vm0, %v2666_v18  ;;  %v2664_v58 = vmax.f32 %v2632_v16, 0.0  ;;  %v1803_v19 = vadd.f32 %v5763_v28, %v8243_v44  ;;  %v4165_v44 = vld [vmem:[#allocation2 + $0x82] sm:$0xff] }
 0x223   : > { %v1794_v63 = vpop.f32.mrf.mxu1  ;;  %v6667_v46 = vpack.i.bf16 %v4165_v44, %v4164_v55 }
 0x224   : > { %2696 = vst.msk [vmem:[#allocation2 + $0xb1] sm:$0xff] %vm384_vm0, %v2664_v58  ;;  %6593 = vrot.lane.b32.xlu0 %v6602_v37, %s7121_s28  ;;  %6623 = vrot.lane.b32.xlu1 %v6622_v60, %s7121_s28  ;;  %v1795_v40 = vadd.f32 %v1794_v63, %v8245_v24 }
 0x225   : > { %v5806_v21 = vpop.f32.mrf.mxu0 }
 0x226   : > { %v2563_v41 = vadd.f32 %v5806_v21, %v1800_v23 }
 0x227   : > { %v2482_v38 = vpop.f32.mrf.mxu0 }
 0x228   : > { %v2600_v39 = vmul.f32 %v8277_v15, %v2563_v41  ;;  %v2561_v52 = vadd.f32 %v2482_v38, %v1792_v32  ;;  %6598 = vrot.lane.b32.xlu0 %v6607_v59, %s7120_s20  ;;  %6628 = vrot.lane.b32.xlu1 %v6627_v30, %s7120_s20 }
 0x229   : > { %v5807_v37 = vpop.f32.mrf.mxu0  ;;  %v3206_v32 = vld [vmem:[#allocation2 + $0xc9] sm:$0xff] }
 0x22a   : > { %v2637_v29 = vadd.f32 %v8282_v25, %v2600_v39  ;;  %v2598_v27 = vmul.f32 %v8277_v15, %v2561_v52  ;;  %v2564_v61 = vadd.f32 %v5807_v37, %v1803_v19 }
 0x22b   : > { %v2485_v53 = vpop.f32.mrf.mxu0 }
 0x22c   : > { %v2669_v17 = vmax.f32 %v2637_v29, 0.0  ;;  %v2635_v26 = vadd.f32 %v8282_v25, %v2598_v27  ;;  %v2601_v59 = vmul.f32 %v8277_v15, %v2564_v61  ;;  %v2562_v57 = vadd.f32 %v2485_v53, %v1795_v40  ;;  %6633 = vrot.lane.b32.xlu0 %v6622_v60, %s7121_s28  ;;  %6663 = vrot.lane.b32.xlu1 %v6662_v14, %s7121_s28  ;;  %v3238_v29 = vld [vmem:[#allocation2 + $0xca] sm:$0xff] }
 0x22d   : > { %v5766_v34 = vpop.f32.mrf.mxu1 }
 0x22e   : > { %2701 = vst.msk [vmem:[#allocation2 + $0xf1] sm:$0xff] %vm384_vm0, %v2669_v17  ;;  %v2667_v24 = vmax.f32 %v2635_v26, 0.0  ;;  %v2638_v62 = vadd.f32 %v8282_v25, %v2601_v59  ;;  %v2599_v13 = vmul.f32 %v8277_v15, %v2562_v57  ;;  %v1816_v36 = vadd.f32 %v5766_v34, %v8247_v49  ;;  %v3205_v49 = vld [vmem:[#allocation2 + $0xc1] sm:$0xff]  ;;  %v4137_v34 = vld [vmem:[#allocation2 + $0xb1] sm:$0xff] }
 0x22f   : > { %v1807_v18 = vpop.f32.mrf.mxu1  ;;  %v8435_v39 = vpack.i.bf16 %v3206_v32, %v3205_v49 }
 0x230   : > { %2699 = vst.msk [vmem:[#allocation2 + $0xd9] sm:$0xff] %vm384_vm0, %v2667_v24  ;;  %v2670_v16 = vmax.f32 %v2638_v62, 0.0  ;;  %v2636_v50 = vadd.f32 %v8282_v25, %v2599_v13  ;;  %6638 = vrot.lane.b32.xlu0 %v6627_v30, %s7120_s20  ;;  %6668 = vrot.lane.b32.xlu1 %v6667_v46, %s7120_s20  ;;  %v1808_v23 = vadd.f32 %v1807_v18, %v8249_v47  ;;  %v4136_v62 = vld [vmem:[#allocation2 + $0xa9] sm:$0xff] }
 0x231   : > { %v5767_v28 = vpop.f32.mrf.mxu1  ;;  %v6712_v18 = vpack.i.bf16 %v4137_v34, %v4136_v62 }
 0x232   : > { %2702 = vst.msk [vmem:[#allocation2 + $0xf9] sm:$0xff] %vm384_vm0, %v2670_v16  ;;  %v2668_v58 = vmax.f32 %v2636_v50, 0.0  ;;  %v1819_v63 = vadd.f32 %v5767_v28, %v8251_v0  ;;  %v8443_v0 = vld [vmem:[%s9720_s2 + $0x88] sm:$0xff]  }
 0x233   : > { %v1810_v41 = vpop.f32.mrf.mxu1  ;;  %5908 = vmatprep.subr.bf16.mxu1 %v8443_v0  ;;  %v4168_v50 = vld [vmem:[#allocation2 + $0xaa] sm:$0xff] }
 0x234   : > { %2700 = vst.msk [vmem:[#allocation2 + $0xe1] sm:$0xff] %vm384_vm0, %v2668_v58  ;;  %6643 = vrot.lane.b32.xlu0 %v6622_v60, %s7121_s28  ;;  %6673 = vrot.lane.b32.xlu1 %v6662_v14, %s7121_s28  ;;  %v1811_v52 = vadd.f32 %v1810_v41, %v8253_v56  ;;  %v4169_v58 = vld [vmem:[#allocation2 + $0xb2] sm:$0xff] }
 0x235   : > { %v5810_v20 = vpop.f32.mrf.mxu0 }
 0x236   : > { %v2567_v21 = vadd.f32 %v5810_v20, %v1816_v36 }
 0x237   : > { %v2498_v10 = vpop.f32.mrf.mxu0 }
 0x238   : > { %v2604_v38 = vmul.f32 %v8277_v15, %v2567_v21  ;;  %v2565_v19 = vadd.f32 %v2498_v10, %v1808_v23  ;;  %6648 = vrot.lane.b32.xlu0 %v6627_v30, %s7120_s20  ;;  %6678 = vrot.lane.b32.xlu1 %v6667_v46, %s7120_s20  ;;  %v3237_v30 = vld [vmem:[#allocation2 + $0xc2] sm:$0xff]  ;;  %v6717_v23 = vpack.i.bf16 %v4169_v58, %v4168_v50 }
 0x239   : > { %v5811_v60 = vpop.f32.mrf.mxu0  ;;  %v8454_v59 = vpack.i.bf16 %v3238_v29, %v3237_v30  ;;  %v3241_v34 = vld [vmem:[#allocation2 + $0xf2] sm:$0xff] }
 0x23a   : > { %v2641_v47 = vadd.f32 %v8282_v25, %v2604_v38  ;;  %v2602_v35 = vmul.f32 %v8277_v15, %v2565_v19  ;;  %v2568_v37 = vadd.f32 %v5811_v60, %v1819_v63 }
 0x23b   : > { %v2501_v40 = vpop.f32.mrf.mxu0  ;;  %v3240_v62 = vld [vmem:[#allocation2 + $0xe2] sm:$0xff] }
 0x23c   : > { %v2673_v27 = vmax.f32 %v2641_v47, 0.0  ;;  %v2639_v61 = vadd.f32 %v8282_v25, %v2602_v35  ;;  %v2605_v53 = vmul.f32 %v8277_v15, %v2568_v37  ;;  %v2566_v55 = vadd.f32 %v2501_v40, %v1811_v52  ;;  %6653 = vrot.lane.b32.xlu0 %v6662_v14, %s7121_s28  ;;  %6683 = vrot.lane.b32.xlu1 %v8435_v39, %s7121_s28 }
 0x23d   : > { %v5770_v56 = vpop.f32.mrf.mxu1 }
 0x23e   : > { %2705 = vst.msk [vmem:[#allocation2 + $0x121] sm:$0xff] %vm384_vm0, %v2673_v27  ;;  %v2671_v44 = vmax.f32 %v2639_v61, 0.0  ;;  %v2642_v17 = vadd.f32 %v8282_v25, %v2605_v53  ;;  %v2603_v26 = vmul.f32 %v8277_v15, %v2566_v55  ;;  %v1832_v28 = vadd.f32 %v5770_v56, %v8255_v31  ;;  %v3208_v27 = vld [vmem:[#allocation2 + $0xe1] sm:$0xff]  ;;  %v3210_v61 = vld [vmem:[#allocation2 + $0xf9] sm:$0xff] }
 0x23f   : > { %v1823_v57 = vpop.f32.mrf.mxu1  ;;  %v3207_v56 = vld [vmem:[#allocation2 + $0xd9] sm:$0xff] }
 0x240   : > { %2703 = vst.msk [vmem:[#allocation2 + $0x109] sm:$0xff] %vm384_vm0, %v2671_v44  ;;  %v2674_v14 = vmax.f32 %v2642_v17, 0.0  ;;  %v2640_v24 = vadd.f32 %v8282_v25, %v2603_v26  ;;  %6658 = vrot.lane.b32.xlu0 %v6667_v46, %s7120_s20  ;;  %6688 = vrot.lane.b32.xlu1 %v8454_v59, %s7120_s20  ;;  %v1824_v36 = vadd.f32 %v1823_v57, %v8257_v51  ;;  %v3209_v44 = vld [vmem:[#allocation2 + $0xf1] sm:$0xff] }
 0x241   : > { %v5771_v16 = vpop.f32.mrf.mxu1  ;;  %v8488_v26 = vpack.i.bf16 %v3208_v27, %v3207_v56  ;;  %v8490_v57 = vpack.i.bf16 %v3210_v61, %v3209_v44 }
 0x242   : > { %2706 = vst.msk [vmem:[#allocation2 + $0x129] sm:$0xff] %vm384_vm0, %v2674_v14  ;;  %v2672_v13 = vmax.f32 %v2640_v24, 0.0  ;;  %v1835_v41 = vadd.f32 %v5771_v16, %v8259_v54  ;;  %v3239_v24 = vld [vmem:[#allocation2 + $0xda] sm:$0xff] }
 0x243   : > { %v1826_v21 = vpop.f32.mrf.mxu1 }
 0x244   : > { %2704 = vst.msk [vmem:[#allocation2 + $0x111] sm:$0xff] %vm384_vm0, %v2672_v13  ;;  %6693 = vrot.lane.b32.xlu0 %v8435_v39, %s7121_s28  ;;  %6713 = vrot.lane.b32.xlu1 %v6712_v18, %s7121_s28  ;;  %v1827_v38 = vadd.f32 %v1826_v21, %v8261_v33  ;;  %v3242_v13 = vld [vmem:[#allocation2 + $0xfa] sm:$0xff] }
 0x245   : > { %v5814_v46 = vpop.f32.mrf.mxu0 }
 0x246   : > { %v2571_v20 = vadd.f32 %v5814_v46, %v1832_v28  ;;  %v8499_v28 = vpack.i.bf16 %v3240_v62, %v3239_v24  ;;  %v8501_v46 = vpack.i.bf16 %v3242_v13, %v3241_v34 }
 0x247   : > { %v2514_v32 = vpop.f32.mrf.mxu0 }
 0x248   : > { %v2608_v10 = vmul.f32 %v8277_v15, %v2571_v20  ;;  %v2569_v63 = vadd.f32 %v2514_v32, %v1824_v36  ;;  %6698 = vrot.lane.b32.xlu0 %v8454_v59, %s7120_s20  ;;  %6718 = vrot.lane.b32.xlu1 %v6717_v23, %s7120_s20 }
 0x249   : > { %v5815_v31 = vpop.f32.mrf.mxu0  ;;  %v3245_v44 = vld [vmem:[#allocation2 + $0x122] sm:$0xff] }
 0x24a   : > { %v2645_v19 = vadd.f32 %v8282_v25, %v2608_v10  ;;  %v2606_v51 = vmul.f32 %v8277_v15, %v2569_v63  ;;  %v2572_v49 = vadd.f32 %v5815_v31, %v1835_v41 }
 0x24b   : > { %v2517_v60 = vpop.f32.mrf.mxu0  ;;  %v3212_v36 = vld [vmem:[#allocation2 + $0x111] sm:$0xff] }
 0x24c   : > { %v2677_v52 = vmax.f32 %v2645_v19, 0.0  ;;  %v2643_v54 = vadd.f32 %v8282_v25, %v2606_v51  ;;  %v2609_v47 = vmul.f32 %v8277_v15, %v2572_v49  ;;  %v2570_v35 = vadd.f32 %v2517_v60, %v1827_v38  ;;  %6703 = vrot.lane.b32.xlu0 %v6712_v18, %s7121_s28  ;;  %6723 = vrot.lane.b32.xlu1 %v6712_v18, %s7121_s28  ;;  %v3243_v51 = vld [vmem:[#allocation2 + $0x10a] sm:$0xff]  ;;  %v3244_v49 = vld [vmem:[#allocation2 + $0x112] sm:$0xff] }
 0x24d   : > { %v5774_v37 = vpop.f32.mrf.mxu1 }
 0x24e   : > { %2709 = vst.msk [vmem:[#allocation2 + $0x151] sm:$0xff] %vm384_vm0, %v2677_v52  ;;  %v2675_v33 = vmax.f32 %v2643_v54, 0.0  ;;  %v2646_v40 = vadd.f32 %v8282_v25, %v2609_v47  ;;  %v2607_v30 = vmul.f32 %v8277_v15, %v2570_v35  ;;  %v1848_v18 = vadd.f32 %v5774_v37, %v8263_v45 }
 0x24f   : > { %v1839_v29 = vpop.f32.mrf.mxu1 }
 0x250   : > { %2707 = vst.msk [vmem:[#allocation2 + $0x139] sm:$0xff] %vm384_vm0, %v2675_v33  ;;  %v2678_v53 = vmax.f32 %v2646_v40, 0.0  ;;  %v2644_v55 = vadd.f32 %v8282_v25, %v2607_v30  ;;  %6708 = vrot.lane.b32.xlu0 %v6717_v23, %s7120_s20  ;;  %6728 = vrot.lane.b32.xlu1 %v6717_v23, %s7120_s20  ;;  %v1840_v50 = vadd.f32 %v1839_v29, %v8265_v22  ;;  %v3211_v22 = vld [vmem:[#allocation2 + $0x109] sm:$0xff] }
 0x251   : > { %v5775_v14 = vpop.f32.mrf.mxu1  ;;  %v8509_v10 = vpack.i.bf16 %v3212_v36, %v3211_v22  ;;  %v8523_v33 = vpack.i.bf16 %v3244_v49, %v3243_v51  ;;  %v3214_v30 = vld [vmem:[#allocation2 + $0x129] sm:$0xff] }
 0x252   : > { %2710 = vst.msk [vmem:[#allocation2 + $0x159] sm:$0xff] %vm384_vm0, %v2678_v53  ;;  %v2676_v17 = vmax.f32 %v2644_v55, 0.0  ;;  %v1851_v21 = vadd.f32 %v5775_v14, %v8267_v48  ;;  %v3213_v53 = vld [vmem:[#allocation2 + $0x121] sm:$0xff]  ;;  %v3246_v14 = vld [vmem:[#allocation2 + $0x12a] sm:$0xff] }
 0x253   : > { %v1842_v20 = vpop.f32.mrf.mxu1  ;;  %v8534_v56 = vpack.i.bf16 %v3214_v30, %v3213_v53  ;;  %v8543_v24 = vpack.i.bf16 %v3246_v14, %v3245_v44 }
 0x254   : > { %2708 = vst.msk [vmem:[#allocation2 + $0x141] sm:$0xff] %vm384_vm0, %v2676_v17  ;;  %6743 = vrot.lane.b32.xlu0 %v8488_v26, %s7121_s28  ;;  %6733 = vrot.lane.b32.xlu1 %v8490_v57, %s7121_s28  ;;  %v1843_v63 = vadd.f32 %v1842_v20, %v8269_v42 }
 0x255   : > { %v5818_v16 = vpop.f32.mrf.mxu0  ;;  %v3217_v13 = vld [vmem:[#allocation2 + $0x151] sm:$0xff] }
 0x256   : > { %v2575_v58 = vadd.f32 %v5818_v16, %v1848_v18 }
 0x257   : > { %v2530_v23 = vpop.f32.mrf.mxu0  ;;  %v3215_v61 = vld [vmem:[#allocation2 + $0x139] sm:$0xff] }
 0x258   : > { %v2612_v45 = vmul.f32 %v8277_v15, %v2575_v58  ;;  %v2573_v32 = vadd.f32 %v2530_v23, %v1840_v50  ;;  %6748 = vrot.lane.b32.xlu0 %v8499_v28, %s7120_s20  ;;  %6738 = vrot.lane.b32.xlu1 %v8501_v46, %s7120_s20 }
 0x259   : > { %v5819_v41 = vpop.f32.mrf.mxu0  ;;  %v3218_v62 = vld [vmem:[#allocation2 + $0x159] sm:$0xff] }
 0x25a   : > { %v2649_v31 = vadd.f32 %v8282_v25, %v2612_v45  ;;  %v2610_v38 = vmul.f32 %v8277_v15, %v2573_v32  ;;  %v2576_v48 = vadd.f32 %v5819_v41, %v1851_v21  ;;  %v8549_v18 = vpack.i.bf16 %v3218_v62, %v3217_v13  ;;  %v3249_v16 = vld [vmem:[#allocation2 + $0x152] sm:$0xff]  ;;  %v3250_v36 = vld [vmem:[#allocation2 + $0x15a] sm:$0xff] }
 0x25b   : > { %v2533_v19 = vpop.f32.mrf.mxu0  ;;  %v3216_v40 = vld [vmem:[#allocation2 + $0x141] sm:$0xff]  ;;  %v8559_v22 = vpack.i.bf16 %v3250_v36, %v3249_v16  ;;  %v2717_v16 = vld [vmem:[#allocation2 + $0x18] sm:$0xff] }
 0x25c   : > { %v2681_v60 = vmax.f32 %v2649_v31, 0.0  ;;  %v2647_v52 = vadd.f32 %v8282_v25, %v2610_v38  ;;  %v2613_v54 = vmul.f32 %v8277_v15, %v2576_v48  ;;  %v2574_v47 = vadd.f32 %v2533_v19, %v1843_v63  ;;  %6773 = vrot.lane.b32.xlu0 %v8509_v10, %s7121_s28  ;;  %6753 = vrot.lane.b32.xlu1 %v8488_v26, %s7121_s28  ;;  %v3247_v17 = vld [vmem:[#allocation2 + $0x13a] sm:$0xff]  ;;  %v3248_v34 = vld [vmem:[#allocation2 + $0x142] sm:$0xff]  ;;  %v4094_v38 = vld [vmem:[#allocation2 + $0x30] sm:$0xff] }
 0x25d   : > { %v8532_v55 = vpack.i.bf16 %v3216_v40, %v3215_v61  ;;  %v4095_v48 = vld [vmem:[#allocation2 + $0x38] sm:$0xff] }
 0x25e   : > { %2713 = vst.msk [vmem:[#allocation2 + $0x181] sm:$0xff] %vm384_vm0, %v2681_v60  ;;  %v2679_v42 = vmax.f32 %v2647_v52, 0.0  ;;  %v2650_v35 = vadd.f32 %v8282_v25, %v2613_v54  ;;  %v2611_v37 = vmul.f32 %v8277_v15, %v2574_v47 }
 0x260   : > { %2711 = vst.msk [vmem:[#allocation2 + $0x169] sm:$0xff] %vm384_vm0, %v2679_v42  ;;  %v2682_v29 = vmax.f32 %v2650_v35, 0.0  ;;  %v2648_v27 = vadd.f32 %v8282_v25, %v2611_v37  ;;  %6778 = vrot.lane.b32.xlu0 %v8523_v33, %s7120_s20  ;;  %6758 = vrot.lane.b32.xlu1 %v8499_v28, %s7120_s20  ;;  %v8541_v25 = vpack.i.bf16 %v3248_v34, %v3247_v17 }
 0x262   : > { %2714 = vst.msk [vmem:[#allocation2 + $0x189] sm:$0xff] %vm384_vm0, %v2682_v29  ;;  %v2680_v15 = vmax.f32 %v2648_v27, 0.0 }
 0x264   : > { %2712 = vst.msk [vmem:[#allocation2 + $0x171] sm:$0xff] %vm384_vm0, %v2680_v15  ;;  %6793 = vrot.lane.b32.xlu0 %v8532_v55, %s7121_s28  ;;  %6763 = vrot.lane.b32.xlu1 %v8534_v56, %s7121_s28 }
 0x265   : > { %v3221_v60 = vld [vmem:[#allocation2 + $0x181] sm:$0xff] }
 0x267   : > { %v3219_v50 = vld [vmem:[#allocation2 + $0x169] sm:$0xff] }
 0x268   : > { %6798 = vrot.lane.b32.xlu0 %v8541_v25, %s7120_s20  ;;  %6768 = vrot.lane.b32.xlu1 %v8543_v24, %s7120_s20 }
 0x269   : > { %v3222_v31 = vld [vmem:[#allocation2 + $0x189] sm:$0xff] }
 0x26a   : > { %v8569_v47 = vpack.i.bf16 %v3222_v31, %v3221_v60  ;;  %v3253_v37 = vld [vmem:[#allocation2 + $0x182] sm:$0xff]  ;;  %v3254_v40 = vld [vmem:[#allocation2 + $0x18a] sm:$0xff] }
 0x26b   : > { %v3220_v58 = vld [vmem:[#allocation2 + $0x171] sm:$0xff]  ;;  %v8583_v15 = vpack.i.bf16 %v3254_v40, %v3253_v37 }
 0x26c   : > { %6783 = vrot.lane.b32.xlu1 %v8549_v18, %s7121_s28  ;;  %v8553_v20 = vpack.i.bf16 %v3220_v58, %v3219_v50  ;;  %v3251_v23 = vld [vmem:[#allocation2 + $0x16a] sm:$0xff]  ;;  %v3252_v21 = vld [vmem:[#allocation2 + $0x172] sm:$0xff]  ;;  %v2718_v50 = vld [vmem:[#allocation2 + $0x20] sm:$0xff] }
 0x26d   : > { %v8563_v19 = vpack.i.bf16 %v3252_v21, %v3251_v23 }
 0x26e   : > { %v6524_v45 = vpop.permute.xlu0 %6523  ;;  %v8555_v32 = vpop.permute.xlu1 %6513  ;;  %6813 = vrot.lane.b32.xlu0 %v8553_v20, %s7121_s28 }
 0x26f   : > { %v6526_v41 = vunpack.i.h.bf16 %v6524_v45  ;;  %v6525_v63 = vunpack.i.l.bf16 %v6524_v45  ;;  %v6516_v60 = vunpack.i.h.bf16 %v8555_v32 }
 0x270   : > { %6788 = vrot.lane.b32.xlu1 %v8559_v22, %s7120_s20 }
 0x271   : > { %v4446_v51 = vsel %vm384_vm0, %v4094_v38, %v6525_v63  ;;  %v4447_v49 = vsel %vm384_vm0, %v4095_v48, %v6526_v41 }
 0x272   : > { %v6529_v52 = vpop.permute.xlu0 %6528  ;;  %v6519_v54 = vpop.permute.xlu1 %6518  ;;  %6818 = vrot.lane.b32.xlu0 %v8563_v19, %s7120_s20 }
 0x273   : > { %v6531_v42 = vunpack.i.h.bf16 %v6529_v52  ;;  %v6530_v35 = vunpack.i.l.bf16 %v6529_v52  ;;  %v6515_v52 = vunpack.i.l.bf16 %v8555_v32 }
 0x274   : > { %6803 = vrot.lane.b32.xlu1 %v8569_v47, %s7121_s28 }
 0x275   : > { %v8574_v30 = vsel %vm857_vm2, %v4446_v51, %v6530_v35  ;;  %v8577_v29 = vsel %vm857_vm2, %v4447_v49, %v6531_v42  ;;  %v3513_v32 = vsel %vm384_vm0, %v4094_v38, %v6515_v52 }
 0x276   : > { %v6534_v61 = vpop.permute.xlu0 %6533  ;;  %6823 = vrot.lane.b32.xlu0 %v8435_v39, %s7121_s28  ;;  %v6554_v53 = vpop.permute.xlu1 %6553 }
 0x277   : > { %v6536_v44 = vunpack.i.h.bf16 %v6534_v61  ;;  %v6535_v17 = vunpack.i.l.bf16 %v6534_v61  ;;  %v6556_v34 = vunpack.i.h.bf16 %v6554_v53  ;;  %v6555_v14 = vunpack.i.l.bf16 %v6554_v53 }
 0x278   : > { %6808 = vrot.lane.b32.xlu1 %v8583_v15, %s7120_s20  ;;  %v6520_v61 = vunpack.i.l.bf16 %v6519_v54 }
 0x279   : > { %v3071_v21 = vsel %vm384_vm0, %v4094_v38, %v6535_v17  ;;  %v3072_v45 = vsel %vm384_vm0, %v4095_v48, %v6536_v44  ;;  %v3069_v41 = vsel %vm384_vm0, %v2717_v16, %v6555_v14  ;;  %v3070_v63 = vsel %vm384_vm0, %v2718_v50, %v6556_v34 }
 0x27a   : > { %v6539_v62 = vpop.permute.xlu0 %6538  ;;  %6833 = vrot.lane.b32.xlu0 %v8454_v59, %s7120_s20  ;;  %v6559_v13 = vpop.permute.xlu1 %6558  ;;  %v3514_v17 = vsel %vm384_vm0, %v4095_v48, %v6516_v60  ;;  %v8634_v60 = vld [vmem:[#allocation2 + $0x50] sm:$0xff] }
 0x27b   : > { %v6541_v58 = vunpack.i.h.bf16 %v6539_v62  ;;  %v6540_v36 = vunpack.i.l.bf16 %v6539_v62  ;;  %v6561_v39 = vunpack.i.h.bf16 %v6559_v13  ;;  %v6560_v23 = vunpack.i.l.bf16 %v6559_v13 }
 0x27c   : > { %6828 = vrot.lane.b32.xlu1 %v8488_v26, %s7121_s28  ;;  %v6521_v26 = vunpack.i.h.bf16 %v6519_v54  ;;  %v3545_v54 = vsel %vm857_vm2, %v3513_v32, %v6520_v61 }
 0x27d   : > { %v3103_v59 = vsel %vm857_vm2, %v3071_v21, %v6540_v36  ;;  %v3104_v31 = vsel %vm857_vm2, %v3072_v45, %v6541_v58  ;;  %v3101_v51 = vsel %vm857_vm2, %v3069_v41, %v6560_v23  ;;  %v3102_v49 = vsel %vm857_vm2, %v3070_v63, %v6561_v39  ;;  %v8625_v41 = vld [vmem:[#allocation2 + $0x60] sm:$0xff] }
 0x27e   : > { %v3133_v42 = vpack.c.bf16 %v3104_v31, %v3103_v59  ;;  %v3132_v35 = vpack.c.bf16 %v3102_v49, %v3101_v51  ;;  %6843 = vrot.lane.b32.xlu0 %v8490_v57, %s7121_s28  ;;  %v6544_v37 = vpop.permute.xlu0 %6543  ;;  %v8603_v40 = vpop.permute.xlu1 %6563  ;;  %v3546_v62 = vsel %vm857_vm2, %v3514_v17, %v6521_v26  ;;  %v7013_v31 = vld [vmem:[%s9720_s2 + $0x80] sm:$0xff]   ;;  %v8630_v51 = vld [vmem:[#allocation2 + $0x68] sm:$0xff]  ;;  %v7014_v17 = vld [vmem:[%s9720_s2 + $0x78] sm:$0xff]  }
 0x27f   : > { %v6546_v53 = vunpack.i.h.bf16 %v6544_v37  ;;  %v6545_v44 = vunpack.i.l.bf16 %v6544_v37  ;;  %v3576_v39 = vpack.c.bf16 %v3546_v62, %v3545_v54  ;;  %v8632_v49 = vld [vmem:[#allocation2 + $0x48] sm:$0xff] }
 0x280   : > { %6838 = vrot.lane.b32.xlu1 %v8499_v28, %s7120_s20  ;;  %5877 = vmatmul.mubr.msk.bf16.vlgmr.msra.gmra.mxu0 %vm1399_vm3, %v3132_v35 }
 0x281   : > { %5880 = vmatprep.mubr.msk.bf16.mxu0 %vm1399_vm3, %v3133_v42  ;;  %v3511_v58 = vsel %vm384_vm0, %v2717_v16, %v6545_v44  ;;  %v3512_v36 = vsel %vm384_vm0, %v2718_v50, %v6546_v53 }
 0x282   : > { %6853 = vrot.lane.b32.xlu0 %v8501_v46, %s7120_s20  ;;  %v6549_v34 = vpop.permute.xlu0 %6548  ;;  %v8613_v14 = vpop.permute.xlu1 %6568 }
 0x283   : > { %v6551_v13 = vunpack.i.h.bf16 %v6549_v34  ;;  %v6550_v28 = vunpack.i.l.bf16 %v6549_v34 }
 0x284   : > { %6848 = vrot.lane.b32.xlu1 %v8509_v10, %s7121_s28 }
 0x285   : > { %v3543_v38 = vsel %vm857_vm2, %v3511_v58, %v6550_v28  ;;  %v3544_v48 = vsel %vm857_vm2, %v3512_v36, %v6551_v13  ;;  %v7015_v58 = vld [vmem:[%s9720_s2 + $0x70] sm:$0xff]  }
 0x286   : > { %v3575_v23 = vpack.c.bf16 %v3544_v48, %v3543_v38  ;;  %6863 = vrot.lane.b32.xlu0 %v8490_v57, %s7121_s28  ;;  %v6574_v21 = vpop.permute.xlu0 %6573  ;;  %v6604_v45 = vpop.permute.xlu1 %6603 }
 0x287   : > { %v6576_v63 = vunpack.i.h.bf16 %v6574_v21  ;;  %v6575_v16 = vunpack.i.l.bf16 %v6574_v21  ;;  %v6606_v59 = vunpack.i.h.bf16 %v6604_v45  ;;  %v6605_v50 = vunpack.i.l.bf16 %v6604_v45 }
 0x288   : > { %5832 = vmatprep.mubr.msk.bf16.mxu1 %vm1399_vm3, %v3575_v23  ;;  %6858 = vrot.lane.b32.xlu1 %v8523_v33, %s7120_s20 }
 0x289   : > { %v4451_v57 = vsel %vm384_vm0, %v8630_v51, %v6576_v63  ;;  %v4450_v52 = vsel %vm384_vm0, %v8625_v41, %v6575_v16  ;;  %v4449_v42 = vsel %vm384_vm0, %v8634_v60, %v6606_v59  ;;  %v4448_v35 = vsel %vm384_vm0, %v8632_v49, %v6605_v50  ;;  %5833 = vmatmul.mubr.msk.bf16.vlgmr.msra.gmra.mxu1 %vm1399_vm3, %v3576_v39  ;;  %v7016_v50 = vld [vmem:[%s9720_s2 + $0x68] sm:$0xff]  }
 0x28a   : > { %6873 = vrot.lane.b32.xlu0 %v8501_v46, %s7120_s20  ;;  %v6579_v37 = vpop.permute.xlu0 %6578  ;;  %v6609_v26 = vpop.permute.xlu1 %6608  ;;  %5909 = vmatpush3.bf16.msra.mxu1 %v8443_v0 }
 0x28b   : > { %v6581_v61 = vunpack.i.h.bf16 %v6579_v37  ;;  %v6580_v53 = vunpack.i.l.bf16 %v6579_v37  ;;  %v6611_v44 = vunpack.i.h.bf16 %v6609_v26  ;;  %v6610_v32 = vunpack.i.l.bf16 %v6609_v26  ;;  %5910 = vmatprep.subr.bf16.mxu1 %v7013_v31 }
 0x28c   : > { %6868 = vrot.lane.b32.xlu1 %v8509_v10, %s7121_s28 }
 0x28d   : > { %v8657_v34 = vsel %vm857_vm2, %v4450_v52, %v6580_v53  ;;  %v8660_v46 = vsel %vm857_vm2, %v4451_v57, %v6581_v61  ;;  %v8663_v0 = vsel %vm857_vm2, %v4448_v35, %v6610_v32  ;;  %v8666_v54 = vsel %vm857_vm2, %v4449_v42, %v6611_v44 }
 0x28e   : > { %6883 = vrot.lane.b32.xlu0 %v8534_v56, %s7121_s28  ;;  %v6584_v10 = vpop.permute.xlu0 %6583  ;;  %v6614_v28 = vpop.permute.xlu1 %6613  ;;  %5911 = vmatpush3.bf16.msra.mxu1 %v7013_v31  ;;  %v6566_v61 = vunpack.i.h.bf16 %v8603_v40  ;;  %v6565_v53 = vunpack.i.l.bf16 %v8603_v40 }
 0x28f   : > { %5912 = vmatprep.subr.bf16.mxu1 %v7014_v17  ;;  %v6586_v36 = vunpack.i.h.bf16 %v6584_v10  ;;  %v6585_v38 = vunpack.i.l.bf16 %v6584_v10  ;;  %v6616_v48 = vunpack.i.h.bf16 %v6614_v28  ;;  %v6615_v39 = vunpack.i.l.bf16 %v6614_v28 }
 0x290   : > { %6878 = vrot.lane.b32.xlu1 %v8523_v33, %s7120_s20  ;;  %v6571_v28 = vunpack.i.h.bf16 %v8613_v14 }
 0x291   : > { %v3076_v31 = vsel %vm384_vm0, %v8630_v51, %v6586_v36  ;;  %v3075_v33 = vsel %vm384_vm0, %v8625_v41, %v6585_v38  ;;  %v3074_v57 = vsel %vm384_vm0, %v8634_v60, %v6616_v48  ;;  %v3073_v52 = vsel %vm384_vm0, %v8632_v49, %v6615_v39  ;;  %v7017_v38 = vld [vmem:[%s9720_s2 + $0x60] sm:$0xff]  }
 0x292   : > { %6893 = vrot.lane.b32.xlu0 %v8543_v24, %s7120_s20  ;;  %v6589_v23 = vpop.permute.xlu0 %6588  ;;  %v6619_v21 = vpop.permute.xlu1 %6618  ;;  %5913 = vmatpush3.bf16.msra.mxu1 %v7014_v17  ;;  %v6570_v36 = vunpack.i.l.bf16 %v8613_v14  ;;  %v3517_v14 = vsel %vm384_vm0, %v8625_v41, %v6565_v53 }
 0x293   : > { %v6591_v45 = vunpack.i.h.bf16 %v6589_v23  ;;  %v6590_v63 = vunpack.i.l.bf16 %v6589_v23  ;;  %v6621_v16 = vunpack.i.h.bf16 %v6619_v21  ;;  %v6620_v59 = vunpack.i.l.bf16 %v6619_v21  ;;  %5914 = vmatprep.subr.bf16.mxu1 %v7015_v58 }
 0x294   : > { %6888 = vrot.lane.b32.xlu1 %v8532_v55, %s7121_s28  ;;  %v3549_v23 = vsel %vm857_vm2, %v3517_v14, %v6570_v36 }
 0x295   : > { %v3107_v42 = vsel %vm857_vm2, %v3075_v33, %v6590_v63  ;;  %v3108_v35 = vsel %vm857_vm2, %v3076_v31, %v6591_v45  ;;  %v3105_v37 = vsel %vm857_vm2, %v3073_v52, %v6620_v59  ;;  %v3106_v26 = vsel %vm857_vm2, %v3074_v57, %v6621_v16  ;;  %v4156_v59 = vld [vmem:[#allocation2 + $0x199] sm:$0xff] }
 0x296   : > { %v3135_v44 = vpack.c.bf16 %v3108_v35, %v3107_v42  ;;  %v3134_v32 = vpack.c.bf16 %v3106_v26, %v3105_v37  ;;  %6903 = vrot.lane.b32.xlu0 %v8534_v56, %s7121_s28  ;;  %v6594_v17 = vpop.permute.xlu0 %6593  ;;  %v8702_v10 = vpop.permute.xlu1 %6623  ;;  %5915 = vmatpush3.bf16.msra.mxu1 %v7015_v58  ;;  %v3518_v56 = vsel %vm384_vm0, %v8630_v51, %v6566_v61  ;;  %v8736_v37 = vld [vmem:[#allocation2 + $0x98] sm:$0xff]  ;;  %v8740_v61 = vld [vmem:[#allocation2 + $0x80] sm:$0xff] }
 0x297   : > { %5916 = vmatprep.subr.bf16.mxu1 %v7016_v50  ;;  %v6596_v48 = vunpack.i.h.bf16 %v6594_v17  ;;  %v6595_v40 = vunpack.i.l.bf16 %v6594_v17  ;;  %v3550_v21 = vsel %vm857_vm2, %v3518_v56, %v6571_v28  ;;  %v8738_v26 = vld [vmem:[#allocation2 + $0x78] sm:$0xff] }
 0x298   : > { %6898 = vrot.lane.b32.xlu1 %v8541_v25, %s7120_s20  ;;  %5881 = vmatmul.mubr.msk.bf16.gmra.mxu0 %vm1399_vm3, %v3134_v32  ;;  %v3578_v31 = vpack.c.bf16 %v3550_v21, %v3549_v23 }
 0x299   : > { %5884 = vmatprep.mubr.msk.bf16.mxu0 %vm1399_vm3, %v3135_v44  ;;  %v3516_v51 = vsel %vm384_vm0, %v8634_v60, %v6596_v48  ;;  %v3515_v41 = vsel %vm384_vm0, %v8632_v49, %v6595_v40  ;;  %v8733_v60 = vld [vmem:[#allocation2 + $0x90] sm:$0xff] }
 0x29a   : > { %6913 = vrot.lane.b32.xlu0 %v8543_v24, %s7120_s20  ;;  %v6599_v58 = vpop.permute.xlu0 %6598  ;;  %v8719_v39 = vpop.permute.xlu1 %6628  ;;  %5917 = vmatpush3.bf16.msra.mxu1 %v7016_v50  ;;  %v4157_v50 = vld [vmem:[#allocation2 + $0x1a1] sm:$0xff] }
 0x29b   : > { %v6601_v45 = vunpack.i.h.bf16 %v6599_v58  ;;  %v6600_v63 = vunpack.i.l.bf16 %v6599_v58  ;;  %5918 = vmatprep.subr.bf16.mxu1 %v7017_v38  ;;  %v6947_v53 = vpack.i.bf16 %v4157_v50, %v4156_v59 }
 0x29c   : > { %6908 = vrot.lane.b32.xlu1 %v8532_v55, %s7121_s28 }
 0x29d   : > { %v3547_v24 = vsel %vm857_vm2, %v3515_v41, %v6600_v63  ;;  %v3548_v16 = vsel %vm857_vm2, %v3516_v51, %v6601_v45 }
 0x29e   : > { %v3577_v33 = vpack.c.bf16 %v3548_v16, %v3547_v24  ;;  %6923 = vrot.lane.b32.xlu0 %v8549_v18, %s7121_s28  ;;  %v6634_v57 = vpop.permute.xlu0 %6633  ;;  %v6664_v52 = vpop.permute.xlu1 %6663  ;;  %5919 = vmatpush3.bf16.msra.mxu1 %v7017_v38 }
 0x29f   : > { %v6636_v49 = vunpack.i.h.bf16 %v6634_v57  ;;  %v6635_v42 = vunpack.i.l.bf16 %v6634_v57  ;;  %v6666_v35 = vunpack.i.h.bf16 %v6664_v52  ;;  %v6665_v55 = vunpack.i.l.bf16 %v6664_v52  ;;  %5963 = vmatprep.subr.mxu1 %v9795_v43 }
 0x2a0   : > { %5836 = vmatprep.mubr.msk.bf16.mxu1 %vm1399_vm3, %v3577_v33  ;;  %6918 = vrot.lane.b32.xlu1 %v8541_v25, %s7120_s20 }
 0x2a1   : > { %v4455_v44 = vsel %vm384_vm0, %v8736_v37, %v6636_v49  ;;  %v4454_v32 = vsel %vm384_vm0, %v8733_v60, %v6635_v42  ;;  %v4453_v17 = vsel %vm384_vm0, %v8740_v61, %v6666_v35  ;;  %v4452_v28 = vsel %vm384_vm0, %v8738_v26, %v6665_v55  ;;  %5837 = vmatmul.mubr.msk.bf16.gmra.mxu1 %vm1399_vm3, %v3578_v31 }
 0x2a2   : > { %6928 = vrot.lane.b32.xlu0 %v8559_v22, %s7120_s20  ;;  %v6639_v36 = vpop.permute.xlu0 %6638  ;;  %v6669_v25 = vpop.permute.xlu1 %6668 }
 0x2a3   : > { %v6641_v38 = vunpack.i.h.bf16 %v6639_v36  ;;  %v6640_v48 = vunpack.i.l.bf16 %v6639_v36  ;;  %v6671_v40 = vunpack.i.h.bf16 %v6669_v25  ;;  %v6670_v56 = vunpack.i.l.bf16 %v6669_v25 }
 0x2a4   : > { %6948 = vrot.lane.b32.xlu1 %v6947_v53, %s7121_s28  ;;  %v6625_v36 = vunpack.i.l.bf16 %v8702_v10 }
 0x2a5   : > { %v8758_v14 = vsel %vm857_vm2, %v4454_v32, %v6640_v48  ;;  %v8761_v58 = vsel %vm857_vm2, %v4455_v44, %v6641_v38  ;;  %v8764_v23 = vsel %vm857_vm2, %v4452_v28, %v6670_v56  ;;  %v8767_v21 = vsel %vm857_vm2, %v4453_v17, %v6671_v40 }
 0x2a6   : > { %6933 = vrot.lane.b32.xlu0 %v8549_v18, %s7121_s28  ;;  %v6644_v51 = vpop.permute.xlu0 %6643  ;;  %v6674_v41 = vpop.permute.xlu1 %6673  ;;  %v6626_v28 = vunpack.i.h.bf16 %v8702_v10  ;;  %v6631_v56 = vunpack.i.h.bf16 %v8719_v39  ;;  %v4188_v10 = vld [vmem:[#allocation2 + $0x19a] sm:$0xff] }
 0x2a7   : > { %v6646_v24 = vunpack.i.h.bf16 %v6644_v51  ;;  %v6645_v16 = vunpack.i.l.bf16 %v6644_v51  ;;  %v6676_v59 = vunpack.i.h.bf16 %v6674_v41  ;;  %v6675_v50 = vunpack.i.l.bf16 %v6674_v41 }
 0x2a8   : > { %6953 = vrot.lane.b32.xlu1 %v8553_v20, %s7121_s28  ;;  %v6630_v51 = vunpack.i.l.bf16 %v8719_v39 }
 0x2a9   : > { %v3080_v18 = vsel %vm384_vm0, %v8736_v37, %v6646_v24  ;;  %v3079_v35 = vsel %vm384_vm0, %v8733_v60, %v6645_v16  ;;  %v3078_v55 = vsel %vm384_vm0, %v8740_v61, %v6676_v59  ;;  %v3077_v53 = vsel %vm384_vm0, %v8738_v26, %v6675_v50  ;;  %v4189_v16 = vld [vmem:[#allocation2 + $0x1a2] sm:$0xff] }
 0x2aa   : > { %6938 = vrot.lane.b32.xlu0 %v8559_v22, %s7120_s20  ;;  %v6649_v31 = vpop.permute.xlu0 %6648  ;;  %v6679_v33 = vpop.permute.xlu1 %6678  ;;  %v3521_v59 = vsel %vm384_vm0, %v8733_v60, %v6625_v36  ;;  %v6977_v60 = vpack.i.bf16 %v4189_v16, %v4188_v10 }
 0x2ab   : > { %v6651_v57 = vunpack.i.h.bf16 %v6649_v31  ;;  %v6650_v52 = vunpack.i.l.bf16 %v6649_v31  ;;  %v6681_v49 = vunpack.i.h.bf16 %v6679_v33  ;;  %v6680_v42 = vunpack.i.l.bf16 %v6679_v33 }
 0x2ac   : > { %6958 = vrot.lane.b32.xlu1 %v8563_v19, %s7120_s20  ;;  %v3553_v31 = vsel %vm857_vm2, %v3521_v59, %v6630_v51 }
 0x2ad   : > { %v3111_v22 = vsel %vm857_vm2, %v3079_v35, %v6650_v52  ;;  %v3112_v44 = vsel %vm857_vm2, %v3080_v18, %v6651_v57  ;;  %v3109_v32 = vsel %vm857_vm2, %v3077_v53, %v6680_v42  ;;  %v3110_v17 = vsel %vm857_vm2, %v3078_v55, %v6681_v49  ;;  %v8821_v53 = vld [vmem:[#allocation2 + $0xc0] sm:$0xff] }
 0x2ae   : > { %v3137_v25 = vpack.c.bf16 %v3112_v44, %v3111_v22  ;;  %v3136_v38 = vpack.c.bf16 %v3110_v17, %v3109_v32  ;;  %6943 = vrot.lane.b32.xlu0 %v8569_v47, %s7121_s28  ;;  %v6654_v48 = vpop.permute.xlu0 %6653  ;;  %v8797_v40 = vpop.permute.xlu1 %6683  ;;  %v3522_v47 = vsel %vm384_vm0, %v8736_v37, %v6626_v28  ;;  %v8823_v17 = vld [vmem:[#allocation2 + $0xc8] sm:$0xff]  ;;  %v4105_v28 = vld [vmem:[#allocation2 + $0xb0] sm:$0xff] }
 0x2af   : > { %v6656_v41 = vunpack.i.h.bf16 %v6654_v48  ;;  %v6655_v24 = vunpack.i.l.bf16 %v6654_v48  ;;  %v6686_v16 = vunpack.i.h.bf16 %v8797_v40 }
 0x2b0   : > { %6963 = vrot.lane.b32.xlu1 %v8553_v20, %s7121_s28  ;;  %5885 = vmatmul.mubr.msk.bf16.gmra.mxu0 %vm1399_vm3, %v3136_v38  ;;  %v3554_v20 = vsel %vm857_vm2, %v3522_v47, %v6631_v56  ;;  %v6685_v47 = vunpack.i.l.bf16 %v8797_v40 }
 0x2b1   : > { %5888 = vmatprep.mubr.msk.bf16.mxu0 %vm1399_vm3, %v3137_v25  ;;  %v3520_v52 = vsel %vm384_vm0, %v8740_v61, %v6656_v41  ;;  %v3519_v37 = vsel %vm384_vm0, %v8738_v26, %v6655_v24  ;;  %v3580_v42 = vpack.c.bf16 %v3554_v20, %v3553_v31  ;;  %v4104_v26 = vld [vmem:[#allocation2 + $0xa8] sm:$0xff] }
 0x2b2   : > { %6973 = vrot.lane.b32.xlu0 %v8583_v15, %s7120_s20  ;;  %v6659_v39 = vpop.permute.xlu0 %6658  ;;  %v6689_v50 = vpop.permute.xlu1 %6688 }
 0x2b3   : > { %v6661_v33 = vunpack.i.h.bf16 %v6659_v39  ;;  %v6660_v57 = vunpack.i.l.bf16 %v6659_v39 }
 0x2b4   : > { %6968 = vrot.lane.b32.xlu1 %v8563_v19, %s7120_s20 }
 0x2b5   : > { %v3551_v15 = vsel %vm857_vm2, %v3519_v37, %v6660_v57  ;;  %v3552_v49 = vsel %vm857_vm2, %v3520_v52, %v6661_v33  ;;  %v6691_v33 = vunpack.i.h.bf16 %v6689_v50  ;;  %v6690_v57 = vunpack.i.l.bf16 %v6689_v50 }
 0x2b6   : > { %v3579_v18 = vpack.c.bf16 %v3552_v49, %v3551_v15  ;;  %v6694_v35 = vpop.permute.xlu0 %6693  ;;  %v6714_v55 = vpop.permute.xlu1 %6713 }
 0x2b7   : > { %v6696_v22 = vunpack.i.h.bf16 %v6694_v35  ;;  %v6695_v44 = vunpack.i.l.bf16 %v6694_v35  ;;  %v6716_v61 = vunpack.i.h.bf16 %v6714_v55  ;;  %v6715_v32 = vunpack.i.l.bf16 %v6714_v55 }
 0x2b8   : > { %6978 = vrot.lane.b32.xlu1 %v6977_v60, %s7120_s20  ;;  %5840 = vmatprep.mubr.msk.bf16.mxu1 %vm1399_vm3, %v3579_v18  ;;  %v3526_v35 = vsel %vm384_vm0, %v8823_v17, %v6686_v16  ;;  %v3525_v55 = vsel %vm384_vm0, %v8821_v53, %v6685_v47  ;;  %s7123_s20 = smov [#allocation6]  }
 0x2b9   : > { %v4459_v19 = vsel %vm384_vm0, %v8823_v17, %v6696_v22  ;;  %v4458_v36 = vsel %vm384_vm0, %v8821_v53, %v6695_v44  ;;  %v4457_v25 = vsel %vm384_vm0, %v4105_v28, %v6716_v61  ;;  %v4456_v38 = vsel %vm384_vm0, %v4104_v26, %v6715_v32  ;;  %5841 = vmatmul.mubr.msk.bf16.gmra.mxu1 %vm1399_vm3, %v3580_v42  ;;  %s7054_s28 = sshll.u32 %s7123_s20, 4  ;;  %s7055_s28 = int_to_ptr.vmem [resolvable:$false] %s7054_s28 }
 0x2ba   : > { %v6699_v48 = vpop.permute.xlu0 %6698  ;;  %v6719_v56 = vpop.permute.xlu1 %6718  ;;  %v3557_v50 = vsel %vm857_vm2, %v3525_v55, %v6690_v57  ;;  %v3558_v22 = vsel %vm857_vm2, %v3526_v35, %v6691_v33  ;;  %s7056_s18 = scalar_lea.vmem %s7055_s28, 8192  ;;  %p7057_p5 = scmp.lt.s32.totalorder %s9647_s16, %s7055_s28 }
 0x2bb   : > { %v6701_v51 = vunpack.i.h.bf16 %v6699_v48  ;;  %v6700_v41 = vunpack.i.l.bf16 %v6699_v48  ;;  %v6721_v24 = vunpack.i.h.bf16 %v6719_v56  ;;  %v6720_v10 = vunpack.i.l.bf16 %v6719_v56  ;;  %p7058_p7 = scmp.lt.s32.totalorder %s7056_s18, %s7050_s24 }
 0x2bd   : > { %v8837_v59 = vsel %vm857_vm2, %v4458_v36, %v6700_v41  ;;  %v8840_v39 = vsel %vm857_vm2, %v4459_v19, %v6701_v51  ;;  %v8843_v31 = vsel %vm857_vm2, %v4456_v38, %v6720_v10  ;;  %v8846_v20 = vsel %vm857_vm2, %v4457_v25, %v6721_v24  ;;  %p7059_p8 = por %p7058_p7, %p7057_p5 }
 0x2be   : > { %v6704_v37 = vpop.permute.xlu0 %6703  ;;  %v6724_v60 = vpop.permute.xlu1 %6723 }
 0x2bf   : > { %v6706_v15 = vunpack.i.h.bf16 %v6704_v37  ;;  %v6705_v49 = vunpack.i.l.bf16 %v6704_v37  ;;  %v6726_v42 = vunpack.i.h.bf16 %v6724_v60  ;;  %v6725_v18 = vunpack.i.l.bf16 %v6724_v60  ;;  %p7060_p10 = pnand %p7059_p8, %p7053_p4 }
 0x2c0   : > { %v3582_v60 = vpack.c.bf16 %v3558_v22, %v3557_v50 }
 0x2c1   : > { %v3524_v38 = vsel %vm384_vm0, %v4105_v28, %v6706_v15  ;;  %v3523_v48 = vsel %vm384_vm0, %v4104_v26, %v6705_v49  ;;  %v3082_v56 = vsel %vm384_vm0, %v4105_v28, %v6726_v42  ;;  %v3081_v51 = vsel %vm384_vm0, %v4104_v26, %v6725_v18  ;;  %v8869_v26 = vld [vmem:[#allocation2 + $0xf0] sm:$0xff]  ;;  %v8871_v18 = vld [vmem:[#allocation2 + $0xd8] sm:$0xff] }
 0x2c2   : > { %v6709_v44 = vpop.permute.xlu0 %6708  ;;  %v6729_v61 = vpop.permute.xlu1 %6728 }
 0x2c3   : > { %v6711_v32 = vunpack.i.h.bf16 %v6709_v44  ;;  %v6710_v19 = vunpack.i.l.bf16 %v6709_v44  ;;  %v6731_v36 = vunpack.i.h.bf16 %v6729_v61  ;;  %v6730_v25 = vunpack.i.l.bf16 %v6729_v61  ;;  %v8873_v44 = vld [vmem:[#allocation2 + $0xe0] sm:$0xff]  ;;  %v8875_v61 = vld [vmem:[#allocation2 + $0xf8] sm:$0xff] }
 0x2c5   : > { %v3555_v41 = vsel %vm857_vm2, %v3523_v48, %v6710_v19  ;;  %v3556_v24 = vsel %vm857_vm2, %v3524_v38, %v6711_v32  ;;  %v3113_v10 = vsel %vm857_vm2, %v3081_v51, %v6730_v25  ;;  %v3114_v16 = vsel %vm857_vm2, %v3082_v56, %v6731_v36 }
 0x2c6   : > { %v3581_v47 = vpack.c.bf16 %v3556_v24, %v3555_v41  ;;  %v3138_v33 = vpack.c.bf16 %v3114_v16, %v3113_v10  ;;  %v6744_v57 = vpop.permute.xlu0 %6743  ;;  %v6734_v37 = vpop.permute.xlu1 %6733 }
 0x2c7   : > { %v6746_v15 = vunpack.i.h.bf16 %v6744_v57  ;;  %v6745_v35 = vunpack.i.l.bf16 %v6744_v57  ;;  %v6736_v49 = vunpack.i.h.bf16 %v6734_v37  ;;  %v6735_v55 = vunpack.i.l.bf16 %v6734_v37 }
 0x2c8   : > { %5844 = vmatprep.mubr.msk.bf16.mxu1 %vm1399_vm3, %v3581_v47  ;;  %5889 = vmatmul.mubr.msk.bf16.gmra.mxu0 %vm1399_vm3, %v3138_v33 }
 0x2c9   : > { %5845 = vmatmul.mubr.msk.bf16.gmra.mxu1 %vm1399_vm3, %v3582_v60  ;;  %v3528_v36 = vsel %vm384_vm0, %v8873_v44, %v6746_v15  ;;  %v3527_v25 = vsel %vm384_vm0, %v8871_v18, %v6745_v35  ;;  %v3530_v38 = vsel %vm384_vm0, %v8875_v61, %v6736_v49  ;;  %v3529_v48 = vsel %vm384_vm0, %v8869_v26, %v6735_v55  ;;  %v8891_v55 = vld [vmem:[#allocation2 + $0x108] sm:$0xff] }
 0x2ca   : > { %v6749_v28 = vpop.permute.xlu0 %6748  ;;  %v6739_v42 = vpop.permute.xlu1 %6738 }
 0x2cb   : > { %v6751_v50 = vunpack.i.h.bf16 %v6749_v28  ;;  %v6750_v22 = vunpack.i.l.bf16 %v6749_v28  ;;  %v6741_v32 = vunpack.i.h.bf16 %v6739_v42  ;;  %v6740_v19 = vunpack.i.l.bf16 %v6739_v42  ;;  %v8893_v28 = vld [vmem:[#allocation2 + $0x110] sm:$0xff] }
 0x2cd   : > { %v3559_v56 = vsel %vm857_vm2, %v3527_v25, %v6750_v22  ;;  %v3560_v51 = vsel %vm857_vm2, %v3528_v36, %v6751_v50  ;;  %v3561_v41 = vsel %vm857_vm2, %v3529_v48, %v6740_v19  ;;  %v3562_v24 = vsel %vm857_vm2, %v3530_v38, %v6741_v32 }
 0x2ce   : > { %v3583_v10 = vpack.c.bf16 %v3560_v51, %v3559_v56  ;;  %v3584_v16 = vpack.c.bf16 %v3562_v24, %v3561_v41  ;;  %v6774_v47 = vpop.permute.xlu0 %6773  ;;  %v6754_v33 = vpop.permute.xlu1 %6753 }
 0x2cf   : > { %v6776_v57 = vunpack.i.h.bf16 %v6774_v47  ;;  %v6775_v37 = vunpack.i.l.bf16 %v6774_v47  ;;  %v6756_v60 = vunpack.i.h.bf16 %v6754_v33  ;;  %v6755_v15 = vunpack.i.l.bf16 %v6754_v33 }
 0x2d0   : > { %5848 = vmatprep.mubr.msk.bf16.mxu1 %vm1399_vm3, %v3583_v10 }
 0x2d1   : > { %5849 = vmatmul.mubr.msk.bf16.gmra.mxu1 %vm1399_vm3, %v3584_v16  ;;  %v3532_v19 = vsel %vm384_vm0, %v8893_v28, %v6776_v57  ;;  %v3531_v36 = vsel %vm384_vm0, %v8891_v55, %v6775_v37  ;;  %v4461_v25 = vsel %vm384_vm0, %v8873_v44, %v6756_v60  ;;  %v4460_v38 = vsel %vm384_vm0, %v8871_v18, %v6755_v15  ;;  %v8914_v15 = vld [vmem:[#allocation2 + $0x120] sm:$0xff] }
 0x2d2   : > { %v6779_v35 = vpop.permute.xlu0 %6778  ;;  %v6759_v49 = vpop.permute.xlu1 %6758 }
 0x2d3   : > { %v6781_v42 = vunpack.i.h.bf16 %v6779_v35  ;;  %v6780_v50 = vunpack.i.l.bf16 %v6779_v35  ;;  %v6761_v22 = vunpack.i.h.bf16 %v6759_v49  ;;  %v6760_v32 = vunpack.i.l.bf16 %v6759_v49 }
 0x2d5   : > { %v3563_v48 = vsel %vm857_vm2, %v3531_v36, %v6780_v50  ;;  %v3564_v56 = vsel %vm857_vm2, %v3532_v19, %v6781_v42  ;;  %v8906_v51 = vsel %vm857_vm2, %v4460_v38, %v6760_v32  ;;  %v8909_v41 = vsel %vm857_vm2, %v4461_v25, %v6761_v22  ;;  %v8916_v42 = vld [vmem:[#allocation2 + $0x138] sm:$0xff]  ;;  %v8918_v50 = vld [vmem:[#allocation2 + $0x140] sm:$0xff]  ;;  %v8920_v22 = vld [vmem:[#allocation2 + $0x128] sm:$0xff] }
 0x2d6   : > { %v3585_v24 = vpack.c.bf16 %v3564_v56, %v3563_v48  ;;  %v6794_v16 = vpop.permute.xlu0 %6793  ;;  %v6764_v47 = vpop.permute.xlu1 %6763 }
 0x2d7   : > { %v6796_v33 = vunpack.i.h.bf16 %v6794_v16  ;;  %v6795_v57 = vunpack.i.l.bf16 %v6794_v16  ;;  %v6766_v37 = vunpack.i.h.bf16 %v6764_v47  ;;  %v6765_v60 = vunpack.i.l.bf16 %v6764_v47 }
 0x2d8   : > { %5852 = vmatprep.mubr.msk.bf16.mxu1 %vm1399_vm3, %v3585_v24 }
 0x2d9   : > { %v3536_v38 = vsel %vm384_vm0, %v8918_v50, %v6796_v33  ;;  %v3535_v48 = vsel %vm384_vm0, %v8916_v42, %v6795_v57  ;;  %v3534_v56 = vsel %vm384_vm0, %v8920_v22, %v6766_v37  ;;  %v3533_v24 = vsel %vm384_vm0, %v8914_v15, %v6765_v60 }
 0x2da   : > { %v6799_v35 = vpop.permute.xlu0 %6798  ;;  %v6769_v49 = vpop.permute.xlu1 %6768 }
 0x2db   : > { %v6801_v32 = vunpack.i.h.bf16 %v6799_v35  ;;  %v6800_v19 = vunpack.i.l.bf16 %v6799_v35  ;;  %v6771_v36 = vunpack.i.h.bf16 %v6769_v49  ;;  %v6770_v25 = vunpack.i.l.bf16 %v6769_v49 }
 0x2dd   : > { %v3567_v16 = vsel %vm857_vm2, %v3535_v48, %v6800_v19  ;;  %v3568_v47 = vsel %vm857_vm2, %v3536_v38, %v6801_v32  ;;  %v3565_v35 = vsel %vm857_vm2, %v3533_v24, %v6770_v25  ;;  %v3566_v49 = vsel %vm857_vm2, %v3534_v56, %v6771_v36  ;;  %v8936_v19 = vld [vmem:[#allocation2 + $0x150] sm:$0xff]  ;;  %v8938_v32 = vld [vmem:[#allocation2 + $0x158] sm:$0xff]  ;;  %v8944_v24 = vld [vmem:[#allocation2 + $0x168] sm:$0xff] }
 0x2de   : > { %v3587_v10 = vpack.c.bf16 %v3568_v47, %v3567_v16  ;;  %v3586_v52 = vpack.c.bf16 %v3566_v49, %v3565_v35  ;;  %v6784_v33 = vpop.permute.xlu1 %6783 }
 0x2df   : > { %v6786_v40 = vunpack.i.h.bf16 %v6784_v33  ;;  %v6785_v45 = vunpack.i.l.bf16 %v6784_v33 }
 0x2e0   : > { %v6814_v57 = vpop.permute.xlu0 %6813  ;;  %5853 = vmatmul.mubr.msk.bf16.gmra.mxu1 %vm1399_vm3, %v3586_v52  ;;  %v8946_v52 = vld [vmem:[#allocation2 + $0x170] sm:$0xff] }
 0x2e1   : > { %5856 = vmatprep.mubr.msk.bf16.mxu1 %vm1399_vm3, %v3587_v10  ;;  %v6816_v37 = vunpack.i.h.bf16 %v6814_v57  ;;  %v6815_v60 = vunpack.i.l.bf16 %v6814_v57  ;;  %v3538_v36 = vsel %vm384_vm0, %v8938_v32, %v6786_v40  ;;  %v3537_v48 = vsel %vm384_vm0, %v8936_v19, %v6785_v45 }
 0x2e2   : > { %v6789_v63 = vpop.permute.xlu1 %6788 }
 0x2e3   : > { %v6791_v25 = vunpack.i.h.bf16 %v6789_v63  ;;  %v6790_v38 = vunpack.i.l.bf16 %v6789_v63  ;;  %v3540_v63 = vsel %vm384_vm0, %v8946_v52, %v6816_v37  ;;  %v3539_v40 = vsel %vm384_vm0, %v8944_v24, %v6815_v60  ;;  %v8958_v37 = vld [vmem:[#allocation2 + $0x180] sm:$0xff]  ;;  %v8960_v60 = vld [vmem:[#allocation2 + $0x188] sm:$0xff] }
 0x2e4   : > { %v6819_v56 = vpop.permute.xlu0 %6818 }
 0x2e5   : > { %v3569_v10 = vsel %vm857_vm2, %v3537_v48, %v6790_v38  ;;  %v3570_v16 = vsel %vm857_vm2, %v3538_v36, %v6791_v25  ;;  %v6821_v47 = vunpack.i.h.bf16 %v6819_v56  ;;  %v6820_v35 = vunpack.i.l.bf16 %v6819_v56 }
 0x2e6   : > { %v3588_v49 = vpack.c.bf16 %v3570_v16, %v3569_v10  ;;  %v6804_v33 = vpop.permute.xlu1 %6803 }
 0x2e7   : > { %v3571_v45 = vsel %vm857_vm2, %v3539_v40, %v6820_v35  ;;  %v3572_v57 = vsel %vm857_vm2, %v3540_v63, %v6821_v47  ;;  %v6806_v13 = vunpack.i.h.bf16 %v6804_v33  ;;  %v6805_v27 = vunpack.i.l.bf16 %v6804_v33 }
 0x2e8   : > { %v3589_v62 = vpack.c.bf16 %v3572_v57, %v3571_v45  ;;  %v6824_v38 = vpop.permute.xlu0 %6823  ;;  %5857 = vmatmul.mubr.msk.bf16.gmra.mxu1 %vm1399_vm3, %v3588_v49 }
 0x2e9   : > { %v6826_v25 = vunpack.i.h.bf16 %v6824_v38  ;;  %v6825_v36 = vunpack.i.l.bf16 %v6824_v38  ;;  %v3542_v16 = vsel %vm384_vm0, %v8960_v60, %v6806_v13  ;;  %v3541_v47 = vsel %vm384_vm0, %v8958_v37, %v6805_v27 }
 0x2ea   : > { %v6809_v48 = vpop.permute.xlu1 %6808  ;;  %5860 = vmatprep.mubr.msk.bf16.mxu1 %vm1399_vm3, %v3589_v62 }
 0x2eb   : > { %v6811_v56 = vunpack.i.h.bf16 %v6809_v48  ;;  %v6810_v10 = vunpack.i.l.bf16 %v6809_v48  ;;  %v3084_v62 = vsel %vm384_vm0, %v8823_v17, %v6826_v25  ;;  %v3083_v45 = vsel %vm384_vm0, %v8821_v53, %v6825_v36 }
 0x2ec   : > { %v6834_v35 = vpop.permute.xlu0 %6833 }
 0x2ed   : > { %v3573_v63 = vsel %vm857_vm2, %v3541_v47, %v6810_v10  ;;  %v3574_v40 = vsel %vm857_vm2, %v3542_v16, %v6811_v56  ;;  %v6836_v49 = vunpack.i.h.bf16 %v6834_v35  ;;  %v6835_v33 = vunpack.i.l.bf16 %v6834_v35 }
 0x2ee   : > { %v3590_v57 = vpack.c.bf16 %v3574_v40, %v3573_v63  ;;  %v6829_v38 = vpop.permute.xlu1 %6828  ;;  %v9796_v56 = vpack.c.bf16 %v8577_v29, %v8574_v30 }
 0x2ef   : > { %v3115_v13 = vsel %vm857_vm2, %v3083_v45, %v6835_v33  ;;  %v3116_v48 = vsel %vm857_vm2, %v3084_v62, %v6836_v49  ;;  %v6831_v9 = vunpack.i.h.bf16 %v6829_v38  ;;  %v6830_v12 = vunpack.i.l.bf16 %v6829_v38 }
 0x2f0   : > { %v3139_v27 = vpack.c.bf16 %v3116_v48, %v3115_v13  ;;  %v6844_v10 = vpop.permute.xlu0 %6843  ;;  %5861 = vmatmul.mubr.msk.bf16.gmra.mxu1 %vm1399_vm3, %v3590_v57  ;;  %v9797_v48 = vpack.c.bf16 %v8666_v54, %v8663_v0 }
 0x2f1   : > { %5920 = vmatprep.mubr.msk.bf16.mxu1 %vm1399_vm3, %v9796_v56  ;;  %v6846_v17 = vunpack.i.h.bf16 %v6844_v10  ;;  %v6845_v25 = vunpack.i.l.bf16 %v6844_v10  ;;  %v3086_v47 = vsel %vm384_vm0, %v8873_v44, %v6831_v9  ;;  %v3085_v35 = vsel %vm384_vm0, %v8871_v18, %v6830_v12 }
 0x2f2   : > { %v6839_v53 = vpop.permute.xlu1 %6838  ;;  %5892 = vmatprep.mubr.msk.bf16.mxu0 %vm1399_vm3, %v3139_v27  ;;  %v9798_v27 = vpack.c.bf16 %v8660_v46, %v8657_v34 }
 0x2f3   : > { %v6841_v36 = vunpack.i.h.bf16 %v6839_v53  ;;  %v6840_v16 = vunpack.i.l.bf16 %v6839_v53  ;;  %v4463_v33 = vsel %vm384_vm0, %v8875_v61, %v6846_v17  ;;  %v4462_v62 = vsel %vm384_vm0, %v8869_v26, %v6845_v25 }
 0x2f4   : > { %v6854_v63 = vpop.permute.xlu0 %6853 }
 0x2f5   : > { %v3117_v40 = vsel %vm857_vm2, %v3085_v35, %v6840_v16  ;;  %v3118_v30 = vsel %vm857_vm2, %v3086_v47, %v6841_v36  ;;  %v6856_v29 = vunpack.i.h.bf16 %v6854_v63  ;;  %v6855_v49 = vunpack.i.l.bf16 %v6854_v63 }
 0x2f6   : > { %v3140_v45 = vpack.c.bf16 %v3118_v30, %v3117_v40  ;;  %v6849_v57 = vpop.permute.xlu1 %6848 }
 0x2f7   : > { %v8991_v9 = vsel %vm857_vm2, %v4462_v62, %v6855_v49  ;;  %v8994_v12 = vsel %vm857_vm2, %v4463_v33, %v6856_v29  ;;  %v6851_v44 = vunpack.i.h.bf16 %v6849_v57  ;;  %v6850_v38 = vunpack.i.l.bf16 %v6849_v57 }
 0x2f8   : > { %v4518_v18 = vpack.c.bf16 %v8994_v12, %v8991_v9  ;;  %v6864_v13 = vpop.permute.xlu0 %6863  ;;  %5893 = vmatmul.mubr.msk.bf16.gmra.mxu0 %vm1399_vm3, %v3140_v45  ;;  %5921 = vmatmul.mubr.msk.bf16.vlgmr.msra.gmra.mxu1 %vm1399_vm3, %v9797_v48 }
 0x2f9   : > { %5924 = vmatprep.mubr.msk.bf16.mxu1 %vm1399_vm3, %v9798_v27  ;;  %v6866_v10 = vunpack.i.h.bf16 %v6864_v13  ;;  %v6865_v56 = vunpack.i.l.bf16 %v6864_v13  ;;  %v4465_v36 = vsel %vm384_vm0, %v8893_v28, %v6851_v44  ;;  %v4464_v16 = vsel %vm384_vm0, %v8891_v55, %v6850_v38 }
 0x2fa   : > { %v6859_v17 = vpop.permute.xlu1 %6858  ;;  %v9799_v44 = vpack.c.bf16 %v8767_v21, %v8764_v23 }
 0x2fb   : > { %v6861_v25 = vunpack.i.h.bf16 %v6859_v17  ;;  %v6860_v53 = vunpack.i.l.bf16 %v6859_v17  ;;  %v3088_v35 = vsel %vm384_vm0, %v8875_v61, %v6866_v10  ;;  %v3087_v63 = vsel %vm384_vm0, %v8869_v26, %v6865_v56 }
 0x2fc   : > { %v6874_v47 = vpop.permute.xlu0 %6873  ;;  %v9800_v26 = vpack.c.bf16 %v8761_v58, %v8758_v14  ;;  %v9801_v17 = vpack.c.bf16 %v8846_v20, %v8843_v31 }
 0x2fd   : > { %v9012_v0 = vsel %vm857_vm2, %v4464_v16, %v6860_v53  ;;  %v9015_v54 = vsel %vm857_vm2, %v4465_v36, %v6861_v25  ;;  %v6876_v34 = vunpack.i.h.bf16 %v6874_v47  ;;  %v6875_v46 = vunpack.i.l.bf16 %v6874_v47 }
 0x2fe   : > { %v4519_v40 = vpack.c.bf16 %v9015_v54, %v9012_v0  ;;  %v6869_v30 = vpop.permute.xlu1 %6868 }
 0x2ff   : > { %v3119_v29 = vsel %vm857_vm2, %v3087_v63, %v6875_v46  ;;  %v3120_v49 = vsel %vm857_vm2, %v3088_v35, %v6876_v34  ;;  %v6871_v62 = vunpack.i.h.bf16 %v6869_v30  ;;  %v6870_v45 = vunpack.i.l.bf16 %v6869_v30 }
 0x300   : > { %v3141_v33 = vpack.c.bf16 %v3120_v49, %v3119_v29  ;;  %v6884_v57 = vpop.permute.xlu0 %6883  ;;  %5925 = vmatmul.mubr.msk.bf16.gmra.mxu1 %vm1399_vm3, %v9799_v44 }
 0x301   : > { %5928 = vmatprep.mubr.msk.bf16.mxu1 %vm1399_vm3, %v9800_v26  ;;  %v3090_v48 = vsel %vm384_vm0, %v8893_v28, %v6871_v62  ;;  %v3089_v27 = vsel %vm384_vm0, %v8891_v55, %v6870_v45  ;;  %v9802_v28 = vpack.c.bf16 %v8840_v39, %v8837_v59  ;;  %v6886_v16 = vunpack.i.h.bf16 %v6884_v57 }
 0x302   : > { %v6879_v61 = vpop.permute.xlu1 %6878  ;;  %5896 = vmatprep.mubr.msk.bf16.mxu0 %vm1399_vm3, %v3141_v33  ;;  %v6885_v47 = vunpack.i.l.bf16 %v6884_v57  ;;  %v9803_v45 = vpack.c.bf16 %v8909_v41, %v8906_v51 }
 0x303   : > { %v6881_v38 = vunpack.i.h.bf16 %v6879_v61  ;;  %v6880_v13 = vunpack.i.l.bf16 %v6879_v61  ;;  %v4467_v57 = vsel %vm384_vm0, %v8920_v22, %v6886_v16 }
 0x304   : > { %v6894_v10 = vpop.permute.xlu0 %6893  ;;  %v4466_v44 = vsel %vm384_vm0, %v8914_v15, %v6885_v47 }
 0x305   : > { %v3121_v23 = vsel %vm857_vm2, %v3089_v27, %v6880_v13  ;;  %v3122_v21 = vsel %vm857_vm2, %v3090_v48, %v6881_v38  ;;  %v6896_v35 = vunpack.i.h.bf16 %v6894_v10  ;;  %v6895_v63 = vunpack.i.l.bf16 %v6894_v10 }
 0x306   : > { %v3142_v56 = vpack.c.bf16 %v3122_v21, %v3121_v23  ;;  %v6889_v14 = vpop.permute.xlu1 %6888 }
 0x307   : > { %v4498_v26 = vsel %vm857_vm2, %v4466_v44, %v6895_v63  ;;  %v4499_v61 = vsel %vm857_vm2, %v4467_v57, %v6896_v35  ;;  %v6891_v51 = vunpack.i.h.bf16 %v6889_v14  ;;  %v6890_v41 = vunpack.i.l.bf16 %v6889_v14 }
 0x308   : > { %v6904_v58 = vpop.permute.xlu0 %6903  ;;  %5897 = vmatmul.mubr.msk.bf16.gmra.mxu0 %vm1399_vm3, %v3142_v56  ;;  %5929 = vmatmul.mubr.msk.bf16.gmra.mxu1 %vm1399_vm3, %v9801_v17 }
 0x309   : > { %5932 = vmatprep.mubr.msk.bf16.mxu1 %vm1399_vm3, %v9802_v28  ;;  %v6906_v55 = vunpack.i.h.bf16 %v6904_v58  ;;  %v6905_v25 = vunpack.i.l.bf16 %v6904_v58  ;;  %v4520_v28 = vpack.c.bf16 %v4499_v61, %v4498_v26 }
 0x30a   : > { %v6899_v53 = vpop.permute.xlu1 %6898 }
 0x30b   : > { %v3092_v31 = vsel %vm384_vm0, %v8920_v22, %v6906_v55  ;;  %v3091_v20 = vsel %vm384_vm0, %v8914_v15, %v6905_v25  ;;  %v6901_v22 = vunpack.i.h.bf16 %v6899_v53  ;;  %v6900_v27 = vunpack.i.l.bf16 %v6899_v53 }
 0x30c   : > { %v6914_v36 = vpop.permute.xlu0 %6913  ;;  %v4469_v55 = vsel %vm384_vm0, %v8918_v50, %v6891_v51  ;;  %v4468_v25 = vsel %vm384_vm0, %v8916_v42, %v6890_v41 }
 0x30d   : > { %v6916_v34 = vunpack.i.h.bf16 %v6914_v36  ;;  %v6915_v46 = vunpack.i.l.bf16 %v6914_v36  ;;  %v4500_v36 = vsel %vm857_vm2, %v4468_v25, %v6900_v27  ;;  %v4501_v16 = vsel %vm857_vm2, %v4469_v55, %v6901_v22 }
 0x30e   : > { %v6909_v30 = vpop.permute.xlu1 %6908  ;;  %v4521_v35 = vpack.c.bf16 %v4501_v16, %v4500_v36 }
 0x30f   : > { %v3123_v59 = vsel %vm857_vm2, %v3091_v20, %v6915_v46  ;;  %v3124_v39 = vsel %vm857_vm2, %v3092_v31, %v6916_v34  ;;  %v6911_v49 = vunpack.i.h.bf16 %v6909_v30  ;;  %v6910_v33 = vunpack.i.l.bf16 %v6909_v30 }
 0x310   : > { %v3143_v29 = vpack.c.bf16 %v3124_v39, %v3123_v59  ;;  %v6924_v62 = vpop.permute.xlu0 %6923  ;;  %5933 = vmatmul.mubr.msk.bf16.gmra.mxu1 %vm1399_vm3, %v9803_v45 }
 0x311   : > { %5936 = vmatprep.mubr.msk.bf16.mxu1 %vm1399_vm3, %v4518_v18  ;;  %v3094_v15 = vsel %vm384_vm0, %v8918_v50, %v6911_v49  ;;  %v3093_v9 = vsel %vm384_vm0, %v8916_v42, %v6910_v33  ;;  %v6926_v18 = vunpack.i.h.bf16 %v6924_v62  ;;  %v6925_v10 = vunpack.i.l.bf16 %v6924_v62 }
 0x312   : > { %v6919_v38 = vpop.permute.xlu1 %6918  ;;  %5900 = vmatprep.mubr.msk.bf16.mxu0 %vm1399_vm3, %v3143_v29 }
 0x313   : > { %v6921_v13 = vunpack.i.h.bf16 %v6919_v38  ;;  %v6920_v48 = vunpack.i.l.bf16 %v6919_v38  ;;  %v4471_v47 = vsel %vm384_vm0, %v8938_v32, %v6926_v18  ;;  %v4470_v50 = vsel %vm384_vm0, %v8936_v19, %v6925_v10 }
 0x314   : > { %v6929_v12 = vpop.permute.xlu0 %6928 }
 0x315   : > { %v3125_v23 = vsel %vm857_vm2, %v3093_v9, %v6920_v48  ;;  %v3126_v21 = vsel %vm857_vm2, %v3094_v15, %v6921_v13  ;;  %v6931_v58 = vunpack.i.h.bf16 %v6929_v12  ;;  %v6930_v14 = vunpack.i.l.bf16 %v6929_v12 }
 0x316   : > { %v3144_v56 = vpack.c.bf16 %v3126_v21, %v3125_v23  ;;  %v9076_v17 = vpop.permute.xlu1 %6948 }
 0x317   : > { %v4502_v42 = vsel %vm857_vm2, %v4470_v50, %v6930_v14  ;;  %v4503_v34 = vsel %vm857_vm2, %v4471_v47, %v6931_v58  ;;  %v6951_v12 = vunpack.i.h.bf16 %v9076_v17  ;;  %v6950_v55 = vunpack.i.l.bf16 %v9076_v17 }
 0x318   : > { %v6934_v53 = vpop.permute.xlu0 %6933  ;;  %5901 = vmatmul.mubr.msk.bf16.gmra.mxu0 %vm1399_vm3, %v3144_v56  ;;  %5937 = vmatmul.mubr.msk.bf16.gmra.mxu1 %vm1399_vm3, %v4519_v40  ;;  %v4522_v63 = vpack.c.bf16 %v4503_v34, %v4502_v42 }
 0x319   : > { %5940 = vmatprep.mubr.msk.bf16.mxu1 %vm1399_vm3, %v4520_v28  ;;  %v6936_v46 = vunpack.i.h.bf16 %v6934_v53  ;;  %v6935_v0 = vunpack.i.l.bf16 %v6934_v53 }
 0x31a   : > { %v6954_v54 = vpop.permute.xlu1 %6953 }
 0x31b   : > { %v3096_v30 = vsel %vm384_vm0, %v8938_v32, %v6936_v46  ;;  %v3095_v59 = vsel %vm384_vm0, %v8936_v19, %v6935_v0  ;;  %v6956_v39 = vunpack.i.h.bf16 %v6954_v54  ;;  %v6955_v29 = vunpack.i.l.bf16 %v6954_v54 }
 0x31c   : > { %v6939_v40 = vpop.permute.xlu0 %6938 }
 0x31d   : > { %v6941_v31 = vunpack.i.h.bf16 %v6939_v40  ;;  %v6940_v20 = vunpack.i.l.bf16 %v6939_v40  ;;  %v4473_v32 = vsel %vm384_vm0, %v8946_v52, %v6956_v39  ;;  %v4472_v19 = vsel %vm384_vm0, %v8944_v24, %v6955_v29  ;;  %v4964_v40 = vld [vmem:[%s9723_s5 + $0x18] sm:$0xff] }
 0x31e   : > { %v6959_v49 = vpop.permute.xlu1 %6958  ;;  %5953 = vmatpush3.msra.mxu0 %v4964_v40 }
 0x31f   : > { %v3127_v33 = vsel %vm857_vm2, %v3095_v59, %v6940_v20  ;;  %v3128_v62 = vsel %vm857_vm2, %v3096_v30, %v6941_v31  ;;  %v6961_v45 = vunpack.i.h.bf16 %v6959_v49  ;;  %v6960_v57 = vunpack.i.l.bf16 %v6959_v49  ;;  %5954 = vmatprep.subr.mxu0 %v9795_v43  ;;  %v4963_v59 = vld [vmem:[%s9723_s5 + $0x10] sm:$0xff] }
 0x320   : > { %v3145_v44 = vpack.c.bf16 %v3128_v62, %v3127_v33  ;;  %v6944_v26 = vpop.permute.xlu0 %6943  ;;  %5941 = vmatmul.mubr.msk.bf16.gmra.mxu1 %vm1399_vm3, %v4521_v35  ;;  %5955 = vmatpush3.msra.mxu0 %v4963_v59  ;;  %v4962_v62 = vld [vmem:[%s9723_s5 + $0x8] sm:$0xff] }
 0x321   : > { %5944 = vmatprep.mubr.msk.bf16.mxu1 %vm1399_vm3, %v4522_v63  ;;  %v6946_v61 = vunpack.i.h.bf16 %v6944_v26  ;;  %v6945_v38 = vunpack.i.l.bf16 %v6944_v26  ;;  %v4504_v41 = vsel %vm857_vm2, %v4472_v19, %v6960_v57  ;;  %v4505_v13 = vsel %vm857_vm2, %v4473_v32, %v6961_v45  ;;  %5956 = vmatprep.subr.mxu0 %v9795_v43 }
 0x322   : > { %v6964_v51 = vpop.permute.xlu1 %6963  ;;  %5904 = vmatprep.mubr.msk.bf16.mxu0 %vm1399_vm3, %v3145_v44  ;;  %v4523_v18 = vpack.c.bf16 %v4505_v13, %v4504_v41  ;;  %5957 = vmatpush3.msra.mxu0 %v4962_v62  ;;  %v4961_v41 = vld [vmem:[%s9723_s5] sm:$0xff] }
 0x323   : > { %v6966_v48 = vunpack.i.h.bf16 %v6964_v51  ;;  %v6965_v22 = vunpack.i.l.bf16 %v6964_v51  ;;  %v4475_v10 = vsel %vm384_vm0, %v8960_v60, %v6946_v61  ;;  %v4474_v23 = vsel %vm384_vm0, %v8958_v37, %v6945_v38  ;;  %v4124_v60 = vld [vmem:[#allocation2 + $0x198] sm:$0xff]  ;;  %v4125_v37 = vld [vmem:[#allocation2 + $0x1a0] sm:$0xff]  ;;  %5958 = vmatprep.subr.mxu0 %v9795_v43 }
 0x324   : > { %v6974_v27 = vpop.permute.xlu0 %6973  ;;  %v4476_v46 = vsel %vm384_vm0, %v4124_v60, %v6950_v55  ;;  %5959 = vmatpush3.msra.mxu0 %v4961_v41 }
 0x325   : > { %v6976_v15 = vunpack.i.h.bf16 %v6974_v27  ;;  %v6975_v9 = vunpack.i.l.bf16 %v6974_v27  ;;  %v3098_v25 = vsel %vm384_vm0, %v8946_v52, %v6966_v48  ;;  %v3097_v53 = vsel %vm384_vm0, %v8944_v24, %v6965_v22  ;;  %v5040_v22 = vld [vmem:[%s9725_s7] sm:$0x3] }
 0x326   : > { %v6969_v21 = vpop.permute.xlu1 %6968  ;;  %v4477_v52 = vsel %vm384_vm0, %v4125_v37, %v6951_v12  ;;  %5964 = vmatpush3.msk.msra.mxu1 %vm5046_vm5, %v5040_v22 }
 0x327   : > { %v4506_v56 = vsel %vm857_vm2, %v4474_v23, %v6975_v9  ;;  %v4507_v58 = vsel %vm857_vm2, %v4475_v10, %v6976_v15  ;;  %v6971_v14 = vunpack.i.h.bf16 %v6969_v21  ;;  %v6970_v28 = vunpack.i.l.bf16 %v6969_v21 }
 0x328   : > { %v4524_v36 = vpack.c.bf16 %v4507_v58, %v4506_v56  ;;  %5945 = vmatmul.mubr.msk.bf16.gmra.mxu1 %vm1399_vm3, %v4523_v18 }
 0x329   : > { %v3129_v16 = vsel %vm857_vm2, %v3097_v53, %v6970_v28  ;;  %v3130_v47 = vsel %vm857_vm2, %v3098_v25, %v6971_v14 }
 0x32a   : > { %v3146_v50 = vpack.c.bf16 %v3130_v47, %v3129_v16  ;;  %v6979_v42 = vpop.permute.xlu1 %6978  ;;  %5948 = vmatprep.mubr.msk.bf16.mxu1 %vm1399_vm3, %v4524_v36 }
 0x32b   : > { %v6981_v17 = vunpack.i.h.bf16 %v6979_v42  ;;  %v6980_v34 = vunpack.i.l.bf16 %v6979_v42 }
 0x32c   : > { %5905 = vmatmul.mubr.msk.bf16.gmra.mxu0 %vm1399_vm3, %v3146_v50 }
 0x32d   : > { %v4508_v24 = vsel %vm857_vm2, %v4476_v46, %v6980_v34  ;;  %v4509_v0 = vsel %vm857_vm2, %v4477_v52, %v6981_v17  ;;  %5960 = vmatprep.mubr.msk.f32.mxu0 %vm7122_vm4, %v9795_v43 }
 0x32e   : > { %v4525_v54 = vpack.c.bf16 %v4509_v0, %v4508_v24 }
 0x330   : > { %5949 = vmatmul.mubr.msk.bf16.gmra.mxu1 %vm1399_vm3, %v4525_v54 }
 0x331   : > { %5965 = vmatprep.mubr.msk.f32.mxu1 %vm7122_vm4, %v9795_v43 }
 0x340   : > { %v5878_v32 = vpop.f32.mrf.mxu0 }
 0x342   : > { %v3967_v38 = vpop.f32.mrf.mxu0 }
 0x344   : > { %v5879_v13 = vpop.f32.mrf.mxu0 }
 0x346   : > { %v3970_v27 = vpop.f32.mrf.mxu0 }
 0x349   : > { %v9136_v35 = vpop.f32.mrf.mxu1 }
 0x34a   : > { %v3976_v0 = vadd.f32 %v5878_v32, %v9136_v35 }
 0x34b   : > { %v3722_v63 = vpop.f32.mrf.mxu1 }
 0x34c   : > { %v3968_v24 = vadd.f32 %v3967_v38, %v3722_v63 }
 0x34d   : > { %v9139_v31 = vpop.f32.mrf.mxu1 }
 0x34e   : > { %v3979_v59 = vadd.f32 %v5879_v13, %v9139_v31 }
 0x34f   : > { %v9141_v20 = vpop.f32.mrf.mxu1 }
 0x350   : > { %v3971_v6 = vadd.f32 %v3970_v27, %v9141_v20 }
 0x358   : > { %v5882_v9 = vpop.f32.mrf.mxu0 }
 0x35a   : > { %v3983_v18 = vpop.f32.mrf.mxu0 }
 0x35c   : > { %v5883_v23 = vpop.f32.mrf.mxu0 }
 0x35e   : > { %v3986_v56 = vpop.f32.mrf.mxu0 }
 0x361   : > { %v9143_v30 = vpop.f32.mrf.mxu1 }
 0x363   : > { %v9149_v39 = vpop.f32.mrf.mxu1 }
 0x365   : > { %v9151_v29 = vpop.f32.mrf.mxu1 }
 0x367   : > { %v9153_v49 = vpop.f32.mrf.mxu1 }
 0x370   : > { %v9197_v14 = vpop.f32.mrf.mxu0 }
 0x372   : > { %v3999_v25 = vpop.f32.mrf.mxu0 }
 0x374   : > { %v9207_v60 = vpop.f32.mrf.mxu0 }
 0x376   : > { %v9213_v47 = vpop.f32.mrf.mxu0 }
 0x379   : > { %v9155_v33 = vpop.f32.mrf.mxu1 }
 0x37b   : > { %v9160_v45 = vpop.f32.mrf.mxu1 }
 0x37d   : > { %v9163_v57 = vpop.f32.mrf.mxu1 }
 0x37f   : > { %v9165_v44 = vpop.f32.mrf.mxu1 }
 0x388   : > { %v9217_v42 = vpop.f32.mrf.mxu0 }
 0x389   : > { %v9167_v26 = vpop.f32.mrf.mxu1 }
 0x38a   : > { %v9223_v52 = vpop.f32.mrf.mxu0 }
 0x38b   : > { %v9169_v19 = vpop.f32.mrf.mxu1 }
 0x38c   : > { %v9227_v62 = vpop.f32.mrf.mxu0 }
 0x38d   : > { %v9171_v61 = vpop.f32.mrf.mxu1 }
 0x38e   : > { %v9236_v35 = vpop.f32.mrf.mxu0 }
 0x38f   : > { %v9173_v51 = vpop.f32.mrf.mxu1 }
 0x391   : > { %v9180_v48 = vpop.f32.mrf.mxu1 }
 0x393   : > { %v9185_v15 = vpop.f32.mrf.mxu1 }
 0x395   : > { %v9187_v12 = vpop.f32.mrf.mxu1 }
 0x397   : > { %v9189_v10 = vpop.f32.mrf.mxu1 }
 0x3a0   : > { %v9191_v43 = vpop.f32.mrf.mxu1 }
 0x3a2   : > { %v9193_v21 = vpop.f32.mrf.mxu1 }
 0x3a4   : > { %v9195_v58 = vpop.f32.mrf.mxu1 }
 0x3a6   : > { %v9199_v28 = vpop.f32.mrf.mxu1 }
 0x3a8   : > { %v9201_v55 = vpop.f32.mrf.mxu1 }
 0x3aa   : > { %v9203_v53 = vpop.f32.mrf.mxu1 }
 0x3ac   : > { %v9205_v36 = vpop.f32.mrf.mxu1 }
 0x3ae   : > { %v9209_v37 = vpop.f32.mrf.mxu1 }
 0x3b0   : > { %v9211_v16 = vpop.f32.mrf.mxu1 }
 0x3b2   : > { %v9215_v50 = vpop.f32.mrf.mxu1 }
 0x3b4   : > { %v9219_v17 = vpop.f32.mrf.mxu1 }
 0x3b6   : > { %v9221_v34 = vpop.f32.mrf.mxu1 }
 0x3b8   : > { %v5922_v46 = vpop.f32.mrf.mxu1  ;;  %v9246_v20 = vpop.f32.mrf.mxu0 }
 0x3b9   : > { %v4786_v41 = vadd.f32 %v5922_v46, %v3976_v0  ;;  %v3984_v46 = vadd.f32 %v3983_v18, %v9149_v39  ;;  %v3992_v0 = vadd.f32 %v5882_v9, %v9143_v30  ;;  %v3995_v39 = vadd.f32 %v5883_v23, %v9151_v29 }
 0x3ba   : > { %v4657_v54 = vpop.f32.mrf.mxu1 }
 0x3bb   : > { %v4784_v40 = vadd.f32 %v4657_v54, %v3968_v24  ;;  %v4823_v32 = vmul.f32 %v9232_v11, %v4786_v41  ;;  %v9243_v24 = vld [vmem:[%s9722_s4 + $0x1] ss:$0 sm:$0xff] }
 0x3bc   : > { %v5923_v22 = vpop.f32.mrf.mxu1 }
 0x3bd   : > { %v4821_v5 = vmul.f32 %v9232_v11, %v4784_v40  ;;  %v4787_v63 = vadd.f32 %v5923_v22, %v3979_v59  ;;  %v9255_v18 = vadd.f32 %v9243_v24, %v4823_v32  ;;  %v3987_v22 = vadd.f32 %v3986_v56, %v9153_v49 }
 0x3be   : > { %v4660_v38 = vpop.f32.mrf.mxu1 }
 0x3bf   : > { %v4785_v31 = vadd.f32 %v4660_v38, %v3971_v6  ;;  %v9249_v27 = vadd.f32 %v9243_v24, %v4821_v5  ;;  %v4824_v54 = vmul.f32 %v9232_v11, %v4787_v63  ;;  %v9262_v38 = vpop.f32.mrf.mxu0 }
 0x3c0   : > { %v5926_v13 = vpop.f32.mrf.mxu1 }
 0x3c1   : > { %v4822_v40 = vmul.f32 %v9232_v11, %v4785_v31  ;;  %v4790_v30 = vadd.f32 %v5926_v13, %v3992_v0  ;;  %v4890_v63 = vsel %vm384_vm0, %v9249_v27, 0.0  ;;  %v9267_v31 = vadd.f32 %v9243_v24, %v4824_v54  ;;  %v9280_v8 = vpop.f32.mrf.mxu0 }
 0x3c2   : > { %v4673_v6 = vpop.f32.mrf.mxu1  ;;  %v4893_v13 = vsel %vm384_vm0, %v9255_v18, 0.0 }
 0x3c3   : > { %v4788_v59 = vadd.f32 %v4673_v6, %v3984_v46  ;;  %v9258_v41 = vadd.f32 %v9243_v24, %v4822_v40  ;;  %v4827_v49 = vmul.f32 %v9232_v11, %v4790_v30  ;;  %v4000_v6 = vadd.f32 %v3999_v25, %v9160_v45 }
 0x3c4   : > { %v5927_v9 = vpop.f32.mrf.mxu1 }
 0x3c5   : > { %v4825_v5 = vmul.f32 %v9232_v11, %v4788_v59  ;;  %v4891_v29 = vsel %vm384_vm0, %v9258_v41, 0.0  ;;  %v4791_v23 = vadd.f32 %v5927_v9, %v3995_v39  ;;  %v4008_v59 = vadd.f32 %v9197_v14, %v9155_v33 }
 0x3c6   : > { %v4676_v32 = vpop.f32.mrf.mxu1  ;;  %v4892_v46 = vadd.f32 %v4891_v29, %v4890_v63  ;;  %v4895_v39 = vsel %vm384_vm0, %v9267_v31, 0.0  ;;  %v9289_v45 = vadd.f32 %v9243_v24, %v4827_v49 }
 0x3c7   : > { %v9275_v56 = vadd.f32 %v9243_v24, %v4825_v5  ;;  %v4789_v0 = vadd.f32 %v4676_v32, %v3987_v22  ;;  %v4828_v9 = vmul.f32 %v9232_v11, %v4791_v23  ;;  %v4011_v22 = vadd.f32 %v9207_v60, %v9163_v57  ;;  %v4034_v57 = vpop.f32.mrf.mxu0 }
 0x3c8   : > { %v5930_v40 = vpop.f32.mrf.mxu1  ;;  %v4894_v54 = vadd.f32 %v4893_v13, %v4892_v46  ;;  %v4003_v13 = vadd.f32 %v9213_v47, %v9165_v44 }
 0x3c9   : > { %v4826_v30 = vmul.f32 %v9232_v11, %v4789_v0  ;;  %v4897_v33 = vsel %vm384_vm0, %v9275_v56, 0.0  ;;  %v4794_v25 = vadd.f32 %v5930_v40, %v4008_v59  ;;  %v9300_v60 = vadd.f32 %v9243_v24, %v4828_v9  ;;  %v9306_v59 = vpop.f32.mrf.mxu0 }
 0x3ca   : > { %v4689_v63 = vpop.f32.mrf.mxu1  ;;  %v4896_v5 = vadd.f32 %v4895_v39, %v4894_v54  ;;  %v4901_v40 = vsel %vm384_vm0, %v9289_v45, 0.0  ;;  %v4016_v9 = vadd.f32 %v9223_v52, %v9169_v19 }
 0x3cb   : > { %v4792_v29 = vadd.f32 %v4689_v63, %v4000_v6  ;;  %v9294_v14 = vadd.f32 %v9243_v24, %v4826_v30  ;;  %v4831_v39 = vmul.f32 %v9232_v11, %v4794_v25  ;;  %v4047_v19 = vpop.f32.mrf.mxu0 }
 0x3cc   : > { %v5931_v32 = vpop.f32.mrf.mxu1  ;;  %v4898_v23 = vadd.f32 %v4897_v33, %v4896_v5  ;;  %v4903_v5 = vsel %vm384_vm0, %v9300_v60, 0.0 }
 0x3cd   : > { %v4829_v46 = vmul.f32 %v9232_v11, %v4792_v29  ;;  %v4899_v49 = vsel %vm384_vm0, %v9294_v14, 0.0  ;;  %v4795_v0 = vadd.f32 %v5931_v32, %v4011_v22  ;;  %v4024_v22 = vadd.f32 %v9217_v42, %v9167_v26 }
 0x3ce   : > { %v4692_v6 = vpop.f32.mrf.mxu1  ;;  %v4900_v54 = vadd.f32 %v4899_v49, %v4898_v23  ;;  %v4027_v32 = vadd.f32 %v9227_v62, %v9171_v61  ;;  %v4019_v61 = vadd.f32 %v9236_v35, %v9173_v51  ;;  %v4032_v35 = vadd.f32 %v9262_v38, %v9185_v15 }
 0x3cf   : > { %v9310_v30 = vadd.f32 %v9243_v24, %v4829_v46  ;;  %v4793_v44 = vadd.f32 %v4692_v6, %v4003_v13  ;;  %v4832_v29 = vmul.f32 %v9232_v11, %v4795_v0  ;;  %v9323_v13 = vadd.f32 %v9243_v24, %v4831_v39 }
 0x3d0   : > { %v5934_v47 = vpop.f32.mrf.mxu1  ;;  %v4902_v63 = vadd.f32 %v4901_v40, %v4900_v54 }
 0x3d1   : > { %v4830_v33 = vmul.f32 %v9232_v11, %v4793_v44  ;;  %v4905_v26 = vsel %vm384_vm0, %v9310_v30, 0.0  ;;  %v4798_v52 = vadd.f32 %v5934_v47, %v4024_v22  ;;  %v9334_v62 = vadd.f32 %v9243_v24, %v4832_v29  ;;  %v5899_v47 = vpop.f32.mrf.mxu0 }
 0x3d2   : > { %v4705_v25 = vpop.f32.mrf.mxu1  ;;  %v4904_v23 = vadd.f32 %v4903_v5, %v4902_v63 }
 0x3d3   : > { %v4796_v46 = vadd.f32 %v4705_v25, %v4016_v9  ;;  %v9328_v42 = vadd.f32 %v9243_v24, %v4830_v33  ;;  %v4909_v9 = vsel %vm384_vm0, %v9323_v13, 0.0  ;;  %v4835_v63 = vmul.f32 %v9232_v11, %v4798_v52 }
 0x3d4   : > { %v5935_v49 = vpop.f32.mrf.mxu1  ;;  %v4906_v0 = vadd.f32 %v4905_v26, %v4904_v23  ;;  %v4040_v33 = vadd.f32 %v9246_v20, %v9180_v48  ;;  %v4911_v25 = vsel %vm384_vm0, %v9334_v62, 0.0  ;;  %v4043_v26 = vadd.f32 %v9280_v8, %v9187_v12 }
 0x3d5   : > { %v4833_v6 = vmul.f32 %v9232_v11, %v4796_v46  ;;  %v4907_v54 = vsel %vm384_vm0, %v9328_v42, 0.0  ;;  %v4799_v40 = vadd.f32 %v5935_v49, %v4027_v32  ;;  %v9355_v15 = vadd.f32 %v9243_v24, %v4835_v63 }
 0x3d6   : > { %v4708_v39 = vpop.f32.mrf.mxu1  ;;  %v4908_v44 = vadd.f32 %v4907_v54, %v4906_v0  ;;  %v4050_v0 = vpop.f32.mrf.mxu0 }
 0x3d7   : > { %v9342_v22 = vadd.f32 %v9243_v24, %v4833_v6  ;;  %v4797_v5 = vadd.f32 %v4708_v39, %v4019_v61  ;;  %v4836_v32 = vmul.f32 %v9232_v11, %v4799_v40  ;;  %v4035_v40 = vadd.f32 %v4034_v57, %v9189_v10 }
 0x3d8   : > { %v5938_v51 = vpop.f32.mrf.mxu1  ;;  %v4910_v29 = vadd.f32 %v4909_v9, %v4908_v44  ;;  %v5902_v39 = vpop.f32.mrf.mxu0  ;;  %v4048_v57 = vadd.f32 %v4047_v19, %v9193_v21 }
 0x3d9   : > { %v4834_v23 = vmul.f32 %v9232_v11, %v4797_v5  ;;  %v4913_v48 = vsel %vm384_vm0, %v9342_v22, 0.0  ;;  %v4802_v38 = vadd.f32 %v5938_v51, %v4040_v33  ;;  %v9365_v8 = vadd.f32 %v9243_v24, %v4836_v32 }
 0x3da   : > { %v4721_v46 = vpop.f32.mrf.mxu1  ;;  %v4912_v52 = vadd.f32 %v4911_v25, %v4910_v29  ;;  %v4917_v5 = vsel %vm384_vm0, %v9355_v15, 0.0  ;;  %v4056_v25 = vadd.f32 %v9306_v59, %v9191_v43 }
 0x3db   : > { %v4800_v49 = vadd.f32 %v4721_v46, %v4032_v35  ;;  %v9360_v20 = vadd.f32 %v9243_v24, %v4834_v23  ;;  %v4839_v51 = vmul.f32 %v9232_v11, %v4802_v38  ;;  %v4919_v32 = vsel %vm384_vm0, %v9365_v8, 0.0  ;;  %v4063_v23 = vpop.f32.mrf.mxu0 }
 0x3dc   : > { %v5939_v6 = vpop.f32.mrf.mxu1  ;;  %v4914_v61 = vadd.f32 %v4913_v48, %v4912_v52 }
 0x3dd   : > { %v4837_v54 = vmul.f32 %v9232_v11, %v4800_v49  ;;  %v4915_v12 = vsel %vm384_vm0, %v9360_v20, 0.0  ;;  %v4803_v44 = vadd.f32 %v5939_v6, %v4043_v26  ;;  %v4059_v49 = vadd.f32 %v5899_v47, %v9195_v58 }
 0x3de   : > { %v4724_v9 = vpop.f32.mrf.mxu1  ;;  %v4916_v63 = vadd.f32 %v4915_v12, %v4914_v61  ;;  %v9384_v6 = vadd.f32 %v9243_v24, %v4839_v51  ;;  %v5903_v12 = vpop.f32.mrf.mxu0 }
 0x3df   : > { %v9373_v35 = vadd.f32 %v9243_v24, %v4837_v54  ;;  %v4801_v29 = vadd.f32 %v4724_v9, %v4035_v40  ;;  %v4840_v46 = vmul.f32 %v9232_v11, %v4803_v44  ;;  %v4051_v40 = vadd.f32 %v4050_v0, %v9199_v28 }
 0x3e0   : > { %v5942_v10 = vpop.f32.mrf.mxu1  ;;  %v4918_v33 = vadd.f32 %v4917_v5, %v4916_v63  ;;  %v4925_v5 = vsel %vm384_vm0, %v9384_v6, 0.0  ;;  %v4072_v0 = vadd.f32 %v5902_v39, %v9201_v55 }
 0x3e1   : > { %v4838_v26 = vmul.f32 %v9232_v11, %v4801_v29  ;;  %v4921_v21 = vsel %vm384_vm0, %v9373_v35, 0.0  ;;  %v4806_v59 = vadd.f32 %v5942_v10, %v4056_v25  ;;  %v9394_v58 = vadd.f32 %v9243_v24, %v4840_v46 }
 0x3e2   : > { %v4737_v52 = vpop.f32.mrf.mxu1  ;;  %v4920_v48 = vadd.f32 %v4919_v32, %v4918_v33  ;;  %v4066_v32 = vpop.f32.mrf.mxu0 }
 0x3e3   : > { %v4804_v38 = vadd.f32 %v4737_v52, %v4048_v57  ;;  %v9389_v43 = vadd.f32 %v9243_v24, %v4838_v26  ;;  %v4843_v51 = vmul.f32 %v9232_v11, %v4806_v59  ;;  %v4064_v57 = vadd.f32 %v4063_v23, %v9203_v53 }
 0x3e4   : > { %v5943_v19 = vpop.f32.mrf.mxu1  ;;  %v4922_v61 = vadd.f32 %v4921_v21, %v4920_v48  ;;  %v4927_v25 = vsel %vm384_vm0, %v9394_v58, 0.0  ;;  %v4075_v21 = vadd.f32 %v5903_v12, %v9205_v36 }
 0x3e5   : > { %v4841_v54 = vmul.f32 %v9232_v11, %v4804_v38  ;;  %v4923_v47 = vsel %vm384_vm0, %v9389_v43, 0.0  ;;  %v4807_v44 = vadd.f32 %v5943_v19, %v4059_v49  ;;  %v9412_v59 = vadd.f32 %v9243_v24, %v4843_v51 }
 0x3e6   : > { %v4740_v9 = vpop.f32.mrf.mxu1  ;;  %v4924_v63 = vadd.f32 %v4923_v47, %v4922_v61 }
 0x3e7   : > { %v9402_v29 = vadd.f32 %v9243_v24, %v4841_v54  ;;  %v4805_v10 = vadd.f32 %v4740_v9, %v4051_v40  ;;  %v4844_v46 = vmul.f32 %v9232_v11, %v4807_v44  ;;  %v4067_v54 = vadd.f32 %v4066_v32, %v9209_v37 }
 0x3e8   : > { %v5946_v28 = vpop.f32.mrf.mxu1  ;;  %v4926_v33 = vadd.f32 %v4925_v5, %v4924_v63  ;;  %v4933_v5 = vsel %vm384_vm0, %v9412_v59, 0.0 }
 0x3e9   : > { %v4842_v26 = vmul.f32 %v9232_v11, %v4805_v10  ;;  %v4810_v48 = vadd.f32 %v5946_v28, %v4072_v0  ;;  %v4929_v55 = vsel %vm384_vm0, %v9402_v29, 0.0  ;;  %v9422_v40 = vadd.f32 %v9243_v24, %v4844_v46 }
 0x3ea   : > { %v4753_v52 = vpop.f32.mrf.mxu1  ;;  %v4928_v49 = vadd.f32 %v4927_v25, %v4926_v33 }
 0x3eb   : > { %v4808_v38 = vadd.f32 %v4753_v52, %v4064_v57  ;;  %v9417_v53 = vadd.f32 %v9243_v24, %v4842_v26  ;;  %v4847_v63 = vmul.f32 %v9232_v11, %v4810_v48  ;;  %v4935_v33 = vsel %vm384_vm0, %v9422_v40, 0.0 }
 0x3ec   : > { %v5906_v39 = vpop.f32.mrf.mxu0  ;;  %v5947_v23 = vpop.f32.mrf.mxu1  ;;  %v4930_v19 = vadd.f32 %v4929_v55, %v4928_v49 }
 0x3ed   : > { %v4845_v61 = vmul.f32 %v9232_v11, %v4808_v38  ;;  %v4931_v36 = vsel %vm384_vm0, %v9417_v53, 0.0  ;;  %v4811_v12 = vadd.f32 %v5947_v23, %v4075_v21  ;;  %v4088_v25 = vadd.f32 %v5906_v39, %v9211_v16 }
 0x3ee   : > { %v4079_v47 = vpop.f32.mrf.mxu0  ;;  %v4756_v44 = vpop.f32.mrf.mxu1  ;;  %v4932_v9 = vadd.f32 %v4931_v36, %v4930_v19  ;;  %v9439_v52 = vadd.f32 %v9243_v24, %v4847_v63 }
 0x3ef   : > { %v9430_v51 = vadd.f32 %v9243_v24, %v4845_v61  ;;  %v4809_v10 = vadd.f32 %v4756_v44, %v4067_v54  ;;  %v4080_v57 = vadd.f32 %v4079_v47, %v9215_v50  ;;  %v4848_v32 = vmul.f32 %v9232_v11, %v4811_v12 }
 0x3f0   : > { %v5907_v37 = vpop.f32.mrf.mxu0  ;;  %v5950_v28 = vpop.f32.mrf.mxu1  ;;  %v4934_v0 = vadd.f32 %v4933_v5, %v4932_v9  ;;  %v4941_v9 = vsel %vm384_vm0, %v9439_v52, 0.0 }
 0x3f1   : > { %v4846_v46 = vmul.f32 %v9232_v11, %v4809_v10  ;;  %v4937_v21 = vsel %vm384_vm0, %v9430_v51, 0.0  ;;  %v4091_v55 = vadd.f32 %v5907_v37, %v9219_v17  ;;  %v4814_v16 = vadd.f32 %v5950_v28, %v4088_v25 }
 0x3f2   : > { %v4769_v26 = vpop.f32.mrf.mxu1  ;;  %v4936_v49 = vadd.f32 %v4935_v33, %v4934_v0  ;;  %v4082_v48 = vpop.f32.mrf.mxu0  ;;  %v9449_v61 = vadd.f32 %v9243_v24, %v4848_v32 }
 0x3f3   : > { %v4812_v38 = vadd.f32 %v4769_v26, %v4080_v57  ;;  %v9444_v50 = vadd.f32 %v9243_v24, %v4846_v46  ;;  %v4083_v36 = vadd.f32 %v4082_v48, %v9221_v34  ;;  %v4851_v17 = vmul.f32 %v9232_v11, %v4814_v16 }
 0x3f4   : > { %v5951_v39 = vpop.f32.mrf.mxu1  ;;  %v4938_v23 = vadd.f32 %v4937_v21, %v4936_v49  ;;  %v4943_v37 = vsel %vm384_vm0, %v9449_v61, 0.0 }
 0x3f5   : > { %v4849_v19 = vmul.f32 %v9232_v11, %v4812_v38  ;;  %v4939_v54 = vsel %vm384_vm0, %v9444_v50, 0.0  ;;  %v4815_v12 = vadd.f32 %v5951_v39, %v4091_v55  ;;  %v9465_v57 = vadd.f32 %v9243_v24, %v4851_v17  ;;  %v5041_v17 = vld [vmem:[%s9726_s8] sm:$0x1] }
 0x3f6   : > { %v4772_v47 = vpop.f32.mrf.mxu1  ;;  %v4940_v44 = vadd.f32 %v4939_v54, %v4938_v23 }
 0x3f7   : > { %v9458_v63 = vadd.f32 %v9243_v24, %v4849_v19  ;;  %v4813_v5 = vadd.f32 %v4772_v47, %v4083_v36  ;;  %v4852_v28 = vmul.f32 %v9232_v11, %v4815_v12  ;;  %v4965_v36 = vld [vmem:[%s9724_s6] sm:$0x1] }
 0x3f8   : > { %v4942_v10 = vadd.f32 %v4941_v9, %v4940_v44 }
 0x3f9   : > { %v4850_v34 = vmul.f32 %v9232_v11, %v4813_v5  ;;  %v4945_v33 = vsel %vm384_vm0, %v9458_v63, 0.0  ;;  %v9473_v46 = vadd.f32 %v9243_v24, %v4852_v28  ;;  %v4949_v11 = vsel %vm384_vm0, %v9465_v57, 0.0 }
 0x3fa   : > { %v4944_v0 = vadd.f32 %v4943_v37, %v4942_v10 }
 0x3fb   : > { %v9470_v25 = vadd.f32 %v9243_v24, %v4850_v34  ;;  %v4951_v38 = vsel %vm384_vm0, %v9473_v46, 0.0 }
 0x3fc   : > { %v4946_v32 = vadd.f32 %v4945_v33, %v4944_v0  ;;  %v5126_v33 = vlaneseq }
 0x3fd   : > { %v4947_v26 = vsel %vm384_vm0, %v9470_v25, 0.0 }
 0x3fe   : > { %v4948_v49 = vadd.f32 %v4947_v26, %v4946_v32  ;;  %v5127_v32 = vshrl.u32 %v5126_v33, 7  ;;  %v9815_v33 = vld [vmem:[#allocation24_spill] sm:$0xff] }
 0x400   : > { %v4950_v48 = vadd.f32 %v4949_v11, %v4948_v49  ;;  %v5128_v26 = vsub.s32 0, %v5127_v32 }
 0x402   : > { %v4952_v21 = vadd.f32 %v4951_v38, %v4950_v48 }
 0x404   : > { %v4953_v55 = vrot.slane %v4952_v21, 4 }
 0x406   : > { %v4954_v16 = vadd.f32 %v4953_v55, %v4952_v21 }
 0x408   : > { %v4955_v39 = vrot.slane %v4954_v16, 2 }
 0x40a   : > { %v4956_v23 = vadd.f32 %v4955_v39, %v4954_v16 }
 0x40c   : > { %v4957_v19 = vrot.slane %v4956_v23, 1 }
 0x40e   : > { %v4958_v54 = vadd.f32 %v4957_v19, %v4956_v23 }
 0x410   : > { %v4960_v24 = vmul.f32 0.00390625, %v4958_v54 }
 0x412   : > { %5961 = vmatmul.mubr.msk.f32.vlgmr.msra.gmra.mxu0 %vm384_vm0, %v4960_v24 }
 0x4d2   : > { %v5035_v12 = vpop.f32.mrf.mxu0 }
 0x4d3   : > { %v5036_v47 = vadd.f32 %v5035_v12, %v4965_v36  ;;  %v9804_v36 = vld [vmem:[#allocation13_spill] sm:$0xff]  ;;  %v9805_v12 = vld [vmem:[#allocation11_spill] sm:$0xff] }
 0x4d4   : > { %v5962_v44 = vpop.f32.mrf.mxu0 }
 0x4d5   : > { %v5039_v9 = vmax.f32 %v5036_v47, 0.0  ;;  %v9806_v47 = vld [vmem:[#allocation12_spill] sm:$0xff] }
 0x4d6   : > { %v9807_v44 = vld [vmem:[#allocation16_spill] sm:$0xff] }
 0x4d7   : > { %5966 = vmatmul.mubr.msk.f32.vlgmr.msra.gmra.mxu1 %vm5042_vm6, %v5039_v9  ;;  %v9808_v9 = vld [vmem:[#allocation17_spill] sm:$0xff] }
 0x597   : > { %v5116_v5 = vpop.f32.mrf.mxu1 }
 0x598   : > { %v5117_v10 = vadd.f32 %v5116_v5, %v5041_v17  ;;  %v9809_v17 = vld [vmem:[#allocation14_spill] sm:$0xff]  ;;  %v9810_v5 = vld [vmem:[#allocation15_spill] sm:$0xff] }
 0x599   : > { %v5967_v37 = vpop.f32.mrf.mxu1 }
 0x59a   : > { %v5541_v28 = vmul.f32 -1.442695, %v5117_v10  ;;  %v9811_v10 = vld [vmem:[#allocation20_spill] sm:$0xff]  ;;  %v9812_v37 = vld [vmem:[#allocation21_spill] sm:$0xff] }
 0x59c   : > { %7018 = vpow2.f32 %v5541_v28  ;;  %v9813_v28 = vld [vmem:[#allocation18_spill] sm:$0xff] }
 0x5a9   : > { %v7019_v34 = vpop.eup %7018 }
 0x5aa   : > { %v5123_v0 = vadd.f32 1.0, %v7019_v34  ;;  %v9814_v34 = vld [vmem:[#allocation19_spill] sm:$0xff] }
 0x5ac   : > { %7020 = vrcp.f32 %v5123_v0 }
 0x5b9   : > { %v7021_v49 = vpop.eup %7020 }
 0x5ba   : > { %v5129_v11 = vrot.slane %v7021_v49, %v5128_v26  ;;  %v9816_v26 = vld [vmem:[#allocation25_spill] sm:$0xff] }
 0x5bc   : > { %v5130_v48 = vmul.f32 %v5129_v11, %v9249_v27  ;;  %v5131_v38 = vmul.f32 %v5129_v11, %v9258_v41  ;;  %v5132_v21 = vmul.f32 %v5129_v11, %v9255_v18  ;;  %v5133_v55 = vmul.f32 %v5129_v11, %v9267_v31 }
 0x5bd   : > { %v5134_v16 = vmul.f32 %v5129_v11, %v9275_v56  ;;  %v5135_v39 = vmul.f32 %v5129_v11, %v9294_v14  ;;  %v5136_v23 = vmul.f32 %v5129_v11, %v9289_v45  ;;  %v5137_v19 = vmul.f32 %v5129_v11, %v9300_v60 }
 0x5be   : > { %v5138_v54 = vmul.f32 %v5129_v11, %v9310_v30  ;;  %v5139_v24 = vmul.f32 %v5129_v11, %v9328_v42  ;;  %v5140_v27 = vmul.f32 %v5129_v11, %v9323_v13  ;;  %v5141_v41 = vmul.f32 %v5129_v11, %v9334_v62 }
 0x5bf   : > { %v5142_v18 = vmul.f32 %v5129_v11, %v9342_v22  ;;  %v5143_v31 = vmul.f32 %v5129_v11, %v9360_v20  ;;  %v5144_v56 = vmul.f32 %v5129_v11, %v9355_v15  ;;  %v5145_v14 = vmul.f32 %v5129_v11, %v9365_v8 }
 0x5c0   : > { %v5146_v45 = vmul.f32 %v5129_v11, %v9373_v35  ;;  %v5147_v60 = vmul.f32 %v5129_v11, %v9389_v43  ;;  %v5148_v30 = vmul.f32 %v5129_v11, %v9384_v6  ;;  %v5149_v42 = vmul.f32 %v5129_v11, %v9394_v58 }
 0x5c1   : > { %v5150_v13 = vmul.f32 %v5129_v11, %v9402_v29  ;;  %v5151_v62 = vmul.f32 %v5129_v11, %v9417_v53  ;;  %v5152_v22 = vmul.f32 %v5129_v11, %v9412_v59  ;;  %v5153_v20 = vmul.f32 %v5129_v11, %v9422_v40 }
 0x5c2   : > { %v5154_v15 = vmul.f32 %v5129_v11, %v9430_v51  ;;  %v5155_v8 = vmul.f32 %v5129_v11, %v9444_v50  ;;  %v5156_v35 = vmul.f32 %v5129_v11, %v9439_v52  ;;  %v5157_v43 = vmul.f32 %v5129_v11, %v9449_v61 }
 0x5c3   : > { %v5158_v6 = vmul.f32 %v5129_v11, %v9458_v63  ;;  %v5159_v58 = vmul.f32 %v5129_v11, %v9470_v25  ;;  %v5160_v29 = vmul.f32 %v5129_v11, %v9465_v57  ;;  %v5161_v53 = vmul.f32 %v5129_v11, %v9473_v46  ;;  %v9817_v11 = vld [vmem:[#allocation22_spill] sm:$0xff] }
 0x5c4   : > { %v5162_v59 = vadd.f32 %v5130_v48, %v7394_v1  ;;  %v5163_v40 = vadd.f32 %v5131_v38, %v7397_v2  ;;  %v5164_v51 = vadd.f32 %v5132_v21, %v7400_v3  ;;  %v5165_v50 = vadd.f32 %v5133_v55, %v7407_v4  ;;  %v9818_v38 = vld [vmem:[#allocation23_spill] sm:$0xff]  ;;  %v9819_v55 = vld [vmem:[#allocation28_spill] sm:$0xff] }
 0x5c5   : > { %v5166_v52 = vadd.f32 %v5134_v16, %v7424_v7  ;;  %v5167_v61 = vadd.f32 %v5135_v39, %v9804_v36  ;;  %v5168_v63 = vadd.f32 %v5136_v23, %v9805_v12  ;;  %v5169_v25 = vadd.f32 %v5137_v19, %v9806_v47  ;;  %v9820_v39 = vld [vmem:[#allocation29_spill] sm:$0xff]  ;;  %v9821_v19 = vld [vmem:[#allocation26_spill] sm:$0xff] }
 0x5c6   : > { %v5170_v57 = vadd.f32 %v5138_v54, %v9807_v44  ;;  %v5171_v46 = vadd.f32 %v5139_v24, %v9808_v9  ;;  %v5172_v1 = vadd.f32 %v5140_v27, %v9809_v17  ;;  %v5173_v2 = vadd.f32 %v5141_v41, %v9810_v5  ;;  %v9822_v24 = vld [vmem:[#allocation27_spill] sm:$0xff]  ;;  %v9823_v41 = vld [vmem:[#allocation32_spill] sm:$0xff] }
 0x5c7   : > { %v5174_v3 = vadd.f32 %v5142_v18, %v9811_v10  ;;  %v5175_v4 = vadd.f32 %v5143_v31, %v9812_v37  ;;  %v5176_v7 = vadd.f32 %v5144_v56, %v9813_v28  ;;  %v5177_v0 = vadd.f32 %v5145_v14, %v9814_v34  ;;  %v9824_v31 = vld [vmem:[#allocation33_spill] sm:$0xff]  ;;  %v9825_v14 = vld [vmem:[#allocation30_spill] sm:$0xff] }
 0x5c8   : > { %v9537_v32 = vadd.f32 %v5146_v45, %v9815_v33  ;;  %v9540_v49 = vadd.f32 %v5147_v60, %v9816_v26  ;;  %v9543_v48 = vadd.f32 %v5148_v30, %v9817_v11  ;;  %v9546_v21 = vadd.f32 %v5149_v42, %v9818_v38  ;;  %v9826_v60 = vld [vmem:[#allocation31_spill] sm:$0xff]  ;;  %v9827_v42 = vld [vmem:[#allocation36_spill] sm:$0xff] }
 0x5c9   : > { %v9549_v16 = vadd.f32 %v5150_v13, %v9819_v55  ;;  %v9552_v23 = vadd.f32 %v5151_v62, %v9820_v39  ;;  %v9555_v54 = vadd.f32 %v5152_v22, %v9821_v19  ;;  %v9558_v27 = vadd.f32 %v5153_v20, %v9822_v24  ;;  %v9828_v62 = vld [vmem:[#allocation37_spill] sm:$0xff]  ;;  %v9829_v20 = vld [vmem:[#allocation34_spill] sm:$0xff] }
 0x5ca   : > { %v9561_v18 = vadd.f32 %v5154_v15, %v9823_v41  ;;  %v9564_v56 = vadd.f32 %v5155_v8, %v9824_v31  ;;  %v9567_v45 = vadd.f32 %v5156_v35, %v9825_v14  ;;  %v9570_v30 = vadd.f32 %v5157_v43, %v9826_v60  ;;  %v9830_v15 = vld [vmem:[#allocation35_spill] sm:$0xff] }
 0x5cb   : > { %v9573_v13 = vadd.f32 %v5158_v6, %v9827_v42  ;;  %v9576_v22 = vadd.f32 %v5159_v58, %v9828_v62  ;;  %v9579_v36 = vadd.f32 %v5160_v29, %v9829_v20  ;;  %v9582_v12 = vadd.f32 %v5161_v53, %v9830_v15 }
 0x5cc   : > { %v5194_v8 = vmax.f32 %v5162_v59, 0.0  ;;  %v5195_v47 = vmax.f32 %v5163_v40, 0.0  ;;  %v5196_v35 = vmax.f32 %v5164_v51, 0.0  ;;  %v5197_v44 = vmax.f32 %v5165_v50, 0.0 }
 0x5cd   : > { %v5198_v9 = vmax.f32 %v5166_v52, 0.0  ;;  %v5199_v43 = vmax.f32 %v5167_v61, 0.0  ;;  %v5200_v17 = vmax.f32 %v5168_v63, 0.0  ;;  %v5201_v5 = vmax.f32 %v5169_v25, 0.0 }
 0x5ce   : > { %v5202_v6 = vmax.f32 %v5170_v57, 0.0  ;;  %v5203_v10 = vmax.f32 %v5171_v46, 0.0  ;;  %v5204_v37 = vmax.f32 %v5172_v1, 0.0  ;;  %v5205_v58 = vmax.f32 %v5173_v2, 0.0  ;;  %5226 = vst.msk [vmem:[%s9586_s14] sm:$0xff] %vm384_vm0, %v5194_v8  ;;  %5227 = vst.msk [vmem:[%s9586_s14 + $0x8] sm:$0xff] %vm384_vm0, %v5195_v47 }
 0x5cf   : > { %5228 = vst.msk [vmem:[%s9586_s14 + $0x10] sm:$0xff] %vm384_vm0, %v5196_v35  ;;  %5229 = vst.msk [vmem:[%s9586_s14 + $0x18] sm:$0xff] %vm384_vm0, %v5197_v44  ;;  %v5206_v29 = vmax.f32 %v5174_v3, 0.0  ;;  %v5207_v53 = vmax.f32 %v5175_v4, 0.0  ;;  %v5208_v59 = vmax.f32 %v5176_v7, 0.0  ;;  %v5209_v40 = vmax.f32 %v5177_v0, 0.0 }
 0x5d0   : > { %5230 = vst.msk [vmem:[%s9586_s14 + $0x20] sm:$0xff] %vm384_vm0, %v5198_v9  ;;  %5231 = vst.msk [vmem:[%s9586_s14 + $0x28] sm:$0xff] %vm384_vm0, %v5199_v43  ;;  %v5210_v51 = vmax.f32 %v9537_v32, 0.0  ;;  %v5211_v50 = vmax.f32 %v9540_v49, 0.0  ;;  %v5212_v52 = vmax.f32 %v9543_v48, 0.0  ;;  %v5213_v61 = vmax.f32 %v9546_v21, 0.0 }
 0x5d1   : > { %5232 = vst.msk [vmem:[%s9586_s14 + $0x30] sm:$0xff] %vm384_vm0, %v5200_v17  ;;  %5233 = vst.msk [vmem:[%s9586_s14 + $0x38] sm:$0xff] %vm384_vm0, %v5201_v5  ;;  %v5214_v63 = vmax.f32 %v9549_v16, 0.0  ;;  %v5215_v25 = vmax.f32 %v9552_v23, 0.0  ;;  %v5216_v57 = vmax.f32 %v9555_v54, 0.0  ;;  %v5217_v46 = vmax.f32 %v9558_v27, 0.0 }
 0x5d2   : > { %5234 = vst.msk [vmem:[%s9586_s14 + $0x40] sm:$0xff] %vm384_vm0, %v5202_v6  ;;  %5235 = vst.msk [vmem:[%s9586_s14 + $0x48] sm:$0xff] %vm384_vm0, %v5203_v10  ;;  %v5218_v1 = vmax.f32 %v9561_v18, 0.0  ;;  %v5219_v2 = vmax.f32 %v9564_v56, 0.0  ;;  %v5220_v3 = vmax.f32 %v9567_v45, 0.0  ;;  %v5221_v4 = vmax.f32 %v9570_v30, 0.0 }
 0x5d3   : > { %5236 = vst.msk [vmem:[%s9586_s14 + $0x50] sm:$0xff] %vm384_vm0, %v5204_v37  ;;  %5237 = vst.msk [vmem:[%s9586_s14 + $0x58] sm:$0xff] %vm384_vm0, %v5205_v58  ;;  %v5222_v28 = vmax.f32 %v9573_v13, 0.0  ;;  %v5223_v7 = vmax.f32 %v9576_v22, 0.0  ;;  %v5224_v34 = vmax.f32 %v9579_v36, 0.0  ;;  %v5225_v0 = vmax.f32 %v9582_v12, 0.0 }
 0x5d4   : > { %5238 = vst.msk [vmem:[%s9586_s14 + $0x60] sm:$0xff] %vm384_vm0, %v5206_v29  ;;  %5239 = vst.msk [vmem:[%s9586_s14 + $0x68] sm:$0xff] %vm384_vm0, %v5207_v53 }
 0x5d5   : > { %5240 = vst.msk [vmem:[%s9586_s14 + $0x70] sm:$0xff] %vm384_vm0, %v5208_v59  ;;  %5241 = vst.msk [vmem:[%s9586_s14 + $0x78] sm:$0xff] %vm384_vm0, %v5209_v40 }
 0x5d6   : > { %5242 = vst.msk [vmem:[%s9586_s14 + $0x80] sm:$0xff] %vm384_vm0, %v5210_v51  ;;  %5243 = vst.msk [vmem:[%s9586_s14 + $0x88] sm:$0xff] %vm384_vm0, %v5211_v50 }
 0x5d7   : > { %5244 = vst.msk [vmem:[%s9586_s14 + $0x90] sm:$0xff] %vm384_vm0, %v5212_v52  ;;  %5245 = vst.msk [vmem:[%s9586_s14 + $0x98] sm:$0xff] %vm384_vm0, %v5213_v61 }
 0x5d8   : > { %5246 = vst.msk [vmem:[%s9586_s14 + $0xa0] sm:$0xff] %vm384_vm0, %v5214_v63  ;;  %5247 = vst.msk [vmem:[%s9586_s14 + $0xa8] sm:$0xff] %vm384_vm0, %v5215_v25 }
 0x5d9   : > { %5248 = vst.msk [vmem:[%s9586_s14 + $0xb0] sm:$0xff] %vm384_vm0, %v5216_v57  ;;  %5249 = vst.msk [vmem:[%s9586_s14 + $0xb8] sm:$0xff] %vm384_vm0, %v5217_v46 }
 0x5da   : > { %5250 = vst.msk [vmem:[%s9586_s14 + $0xc0] sm:$0xff] %vm384_vm0, %v5218_v1  ;;  %5251 = vst.msk [vmem:[%s9586_s14 + $0xc8] sm:$0xff] %vm384_vm0, %v5219_v2 }
 0x5db   : > { %5252 = vst.msk [vmem:[%s9586_s14 + $0xd0] sm:$0xff] %vm384_vm0, %v5220_v3  ;;  %5253 = vst.msk [vmem:[%s9586_s14 + $0xd8] sm:$0xff] %vm384_vm0, %v5221_v4 }
 0x5dc   : > { %5254 = vst.msk [vmem:[%s9586_s14 + $0xe0] sm:$0xff] %vm384_vm0, %v5222_v28  ;;  %5255 = vst.msk [vmem:[%s9586_s14 + $0xe8] sm:$0xff] %vm384_vm0, %v5223_v7 }
 0x5dd   : > { %5256 = vst.msk [vmem:[%s9586_s14 + $0xf0] sm:$0xff] %vm384_vm0, %v5224_v34  ;;  %5257 = vst.msk [vmem:[%s9586_s14 + $0xf8] sm:$0xff] %vm384_vm0, %v5225_v0 }
 0x5de   : > { %7063 = shalt.err (!%p7060_p10)
}
 0x5df   : > { %s7064_s26 = scalar_lea.hbm %s9645_s23, 4096  ;;  %s7068_s14 = scalar_lea.hbm %s9727_s9, 8192 }
 0x5e0   : > { %p7065_p0 = scmp.ne.s32.totalorder %s9645_s23, %s7064_s26  ;;  %p7069_p1 = scmp.lt.s32.totalorder %s9645_s23, %s9727_s9 }
 0x5e1   : > { %p7070_p3 = scmp.lt.s32.totalorder %s7068_s14, %s7064_s26 }
 0x5e2   : > { %p7066_p2 = pnand %p7065_p0, %p9831_p12 }
 0x5e3   : > { %p7071_p6 = por %p7070_p3, %p7069_p1 }
 0x5e4   : > { %p7067_p9 = pneg %p7066_p2 }
 0x5e6   : > { %p7072_p11 = pnand %p7071_p6, %p7067_p9 }
 0x5e8   : > { %7075 = shalt.err (!%p7072_p11)
}
 0x5e9   : > { %s7124_s17 = smov 128   ;;  %s7125_s24 = smov 8  }
 0x5ea   : > { %5970 = dma.vmem_to_hbm [thread:$0]  (%p9831_p12), %s9647_s16, 4096, %s9645_s23, %s5259_s29, %s7124_s17, %s7124_s17, %s7125_s24  }
 0x5eb PF: > { %s5287_s20 = sand.u32 1, %s7102_s30   ;;  %p9832_p13 = scmp.ne.s32.totalorder %s9765_s22, 0 }
 0x5ec   : > { %p9833_p4 = scmp.ge.s32.totalorder %s7114_s12, 2  ;;  %s5288_s28 = scalar_lea.sflag [#allocation5], %s5287_s20 }
 0x5ee   : > { %p5977_p5 = pnand %p9833_p4, %p9832_p13 }
 0x5f0   : > { %p5978_p7 = pneg %p5977_p5 }
 0x5f2   : > { %7097 = dma.done.wait (%p5978_p7), %s5288_s28, 4096  }
 0x5f3   : > { %7099 = vsyncadd (%p5978_p7), %s5288_s28, 4294963200  ;;  %s9834_s18 = sld [smem:[#allocation9_spill]]  ;;  %p22_p8 = scmp.ge.s32.totalorder %s7201_s15, 4  }
 0x5f4   : > { %s9835_s11 = sld [smem:[#allocation10_spill]]  ;;  %s9836_s30 = smov %s7106_s10 }
 0x5f5   : > { %s9838_s12 = smov %s7201_s15  ;;  %24 = sbr.rel (!%p22_p8) target bundleno = 5 (0x5), region = 107 }
 0x5f9   : > { %s9837_s10 = smov %s9834_s18 }
 0x5fa   :  { %5293 = vsyncpa [#allocation4], 1 }
 0x5fb   :  { %5295 = vsyncpa [#allocation4 + $0x1], 1 }
 0x5fc   :  { %5296 = vsyncpa [#allocation5], 1 }
 0x5fd   :  { %5298 = vsyncpa [#allocation5 + $0x1], 1 }

</bundles_post_ra>
